<compile_context>
chip_gen: v5e
topology: v5e:2x2
jax: 0.10.0
libtpu: 0.0.40
codegen_flags: <defaults>
</compile_context>

<pallas_src>
import jax
import jax.numpy as jnp
from jax.experimental import pallas as pl
from jax.experimental.pallas import tpu as pltpu

BF16 = jnp.bfloat16
F32 = jnp.float32


# ---------------------------------------------------------------------------
# Pass 1: running min of conv1(base(x)) over (batch, spatial-tile).
# grid = (B, N // TN); the spatial axis is an "arbitrary" reduction axis that
# accumulates a min into a lane-dense (1, 128) output block per batch.
# ---------------------------------------------------------------------------
def _min_kernel(img_ref, wbase_ref, w1_ref, b1_ref, bmin_ref):
    j = pl.program_id(1)

    @pl.when(j == 0)
    def _():
        bmin_ref[...] = jnp.full_like(bmin_ref, jnp.inf)

    img = img_ref[0]                                                     # (TN, Cin) bf16
    base = jnp.maximum(
        jnp.dot(img, wbase_ref[...], preferred_element_type=F32), 0.0)   # (TN, Cf)
    x1 = jnp.dot(base.astype(BF16), w1_ref[...],
                 preferred_element_type=F32) + b1_ref[...]               # (TN, D2)
    tmin = jnp.min(x1, keepdims=True)                                    # (1, 1)
    bmin_ref[0] = jnp.minimum(bmin_ref[0], jnp.broadcast_to(tmin, (1, 128)))


# ---------------------------------------------------------------------------
# Pass 2: full head (attention map, BN1/BN2, non-local block, pooling,
# stacked classifier, feature concat).  One grid step per batch element.
# ---------------------------------------------------------------------------
def _make_head_kernel(D1, D2, TK, n_kt):
    def head_kernel(gmin_ref, img_ref, wbase_ref, w1_ref, b1_ref,
                    wmars_ref, w2_ref, b2_ref, wtg_ref, wz_ref,
                    bn1s_ref, bn1b_ref, bn2s_ref, bn2b_ref, wc_ref,
                    y_ref, feat_ref):
        gmin = gmin_ref[0]                                               # scalar (SMEM)
        img = img_ref[0]                                                 # (N, Cin) bf16

        # --- base backbone stand-in -> conv1 (1x1) ---
        base = jnp.maximum(
            jnp.dot(img, wbase_ref[...], preferred_element_type=F32), 0.0)
        x1 = jnp.dot(base.astype(BF16), w1_ref[...],
                     preferred_element_type=F32) + b1_ref[...]           # (N, D2)
        agap = jnp.mean(x1, axis=0, keepdims=True)                       # (1, D2)

        # --- channel softmax of A_gap -> spatial attention map ---
        s = agap - jnp.max(agap, axis=-1, keepdims=True)
        e = jnp.exp(s)
        scores = e * pl.reciprocal(jnp.sum(e, axis=-1, keepdims=True),
                                   approx=True)                          # (1, D2)
        att_logit = jnp.sum(scores * (x1 - gmin), axis=-1, keepdims=True)  # (N, 1)
        att = pl.reciprocal(1.0 + jnp.exp(-att_logit), approx=True)      # sigmoid

        # --- F1 branch: eval-mode BatchNorm1d (classifier handled below) ---
        F1 = agap * bn1s_ref[...] + bn1b_ref[...]                        # (1, D2)

        # --- mars backbone stand-in -> conv2 (1x1), attention weighting ---
        mars = jnp.maximum(
            jnp.dot(img, wmars_ref[...], preferred_element_type=F32), 0.0)
        m2 = jnp.dot(mars.astype(BF16), w2_ref[...],
                     preferred_element_type=F32) + b2_ref[...]           # (N, D2)
        AiF1 = m2 * att                                                  # (N, D2)

        # --- non-local block: fused theta|g projection ---
        AiF1_bf = AiF1.astype(BF16)
        ftg = jnp.maximum(
            jnp.dot(AiF1_bf, wtg_ref[...], preferred_element_type=F32), 0.0)  # (N, 2*D1)
        f1 = ftg[:, :D1]                                                 # theta output
        fg = ftg[:, D1:]                                                 # g output
        inv_nrm = jax.lax.rsqrt(
            jnp.maximum(jnp.sum(f1 * f1, axis=-1, keepdims=True), 1e-24))
        f1n = (f1 * inv_nrm).astype(BF16)                                # F.normalize, (N, D1)
        fg_bf = fg.astype(BF16)

        # flash-style online softmax over key tiles: (N, N) never materialized
        m_i = jnp.full(att.shape, -jnp.inf, dtype=F32)                   # (N, 1)
        l_i = jnp.zeros(att.shape, dtype=F32)                            # (N, 1)
        acc = jnp.zeros(f1.shape, dtype=F32)                             # (N, D1)
        for kt in range(n_kt):
            k_blk = f1n[kt * TK:(kt + 1) * TK]                           # (TK, D1)
            v_blk = fg_bf[kt * TK:(kt + 1) * TK]                         # (TK, D1)
            sc = jax.lax.dot_general(f1n, k_blk, (((1,), (1,)), ((), ())),
                                     preferred_element_type=F32)         # (N, TK)
            m_new = jnp.maximum(m_i, jnp.max(sc, axis=-1, keepdims=True))
            alpha = jnp.exp(m_i - m_new)
            p = jnp.exp(sc - m_new)
            l_i = alpha * l_i + jnp.sum(p, axis=-1, keepdims=True)
            acc = alpha * acc + jnp.dot(p.astype(BF16), v_blk,
                                        preferred_element_type=F32)
            m_i = m_new
        f2 = acc * pl.reciprocal(l_i, approx=True)                       # (N, D1)

        zed = jnp.dot(f2.astype(BF16), wz_ref[...],
                      preferred_element_type=F32)                        # (N, D2)
        aif = zed + AiF1

        # --- attention-weighted spatial pooling + eval-mode BN2 ---
        inv_den = pl.reciprocal(jnp.sum(att, axis=0, keepdims=True), approx=True)
        F2 = (jnp.sum(aif, axis=0, keepdims=True) * inv_den) * bn2s_ref[...] + bn2b_ref[...]

        # --- shared classifier on stacked [F1; F2]: one lane-dense MXU pass ---
        y = jnp.dot(jnp.concatenate([F1, F2], axis=0).astype(BF16), wc_ref[...],
                    preferred_element_type=F32)                          # (2, NCp)
        y_ref[0] = y

        # write F1/F2 into disjoint lane-aligned slices (no in-kernel concat)
        feat_ref[0, :, 0:D2] = F1
        feat_ref[0, :, D2:2 * D2] = F2

    return head_kernel


# ---------------------------------------------------------------------------
# Wrapper
# ---------------------------------------------------------------------------
def resnet50ta_bt_image_forward(x_nchw, params, *, n_tile=128, kt_tile=128):
    B, Cin, H, W = x_nchw.shape
    N = H * W
    Cf = params["w_base"].shape[1]
    D2 = params["w1"].shape[1]
    D1 = params["w_theta"].shape[1]
    NC = params["w_cls"].shape[1]

    # channel-last (B, N, Cin); bf16 halves image HBM/VMEM traffic.
    img = jnp.transpose(x_nchw, (0, 2, 3, 1)).reshape(B, N, Cin).astype(BF16)

    # bf16 weights (MXU-native); biases/BN affines stay f32.
    wbase = params["w_base"].astype(BF16)
    wmars = params["w_mars"].astype(BF16)
    w1 = params["w1"].astype(BF16)
    w2 = params["w2"].astype(BF16)
    b1 = params["b1"].astype(F32)
    b2 = params["b2"].astype(F32)
    wtg = jnp.concatenate([params["w_theta"], params["w_g"]], axis=1).astype(BF16)  # (D2, 2*D1)
    wz = params["w_z"].astype(BF16)
    NCp = max(128, ((NC + 127) // 128) * 128)            # lane-dense classifier output
    wcls = jnp.pad(params["w_cls"], ((0, 0), (0, NCp - NC))).astype(BF16)

    # fold eval-mode BatchNorm1d into per-channel affine
    def bn_affine(p):
        scale = p["gamma"] / jnp.sqrt(p["var"] + 1e-5)
        shift = p["beta"] - p["mean"] * scale
        return scale.reshape(1, D2).astype(F32), shift.reshape(1, D2).astype(F32)

    bn1s, bn1b = bn_affine(params["bn1"])
    bn2s, bn2b = bn_affine(params["bn2"])

    def full(shp):
        return pl.BlockSpec(shp, lambda *_: (0,) * len(shp))

    # ---- pass 1: global min of conv1(base(x))  (torch.min(x), batch-global) ----
    TN = n_tile if (N % n_tile == 0) else N
    n_nt = N // TN
    bmin = pl.pallas_call(
        _min_kernel,
        grid=(B, n_nt),
        in_specs=[
            pl.BlockSpec((1, TN, Cin), lambda i, j: (i, j, 0)),
            full((Cin, Cf)),
            full((Cf, D2)),
            full((1, D2)),
        ],
        out_specs=pl.BlockSpec((1, 1, 128), lambda i, j: (i, 0, 0)),
        out_shape=jax.ShapeDtypeStruct((B, 1, 128), F32),
        compiler_params=pltpu.CompilerParams(
            dimension_semantics=("parallel", "arbitrary"),
            vmem_limit_bytes=32 * 1024 * 1024),
    )(img, wbase, w1, b1)
    gmin = jnp.min(bmin).reshape(1)                      # scalar -> SMEM in pass 2

    # ---- pass 2: full head (conv1 recomputed; no (B,N,D2) HBM round trip) ----
    TK = kt_tile if (N % kt_tile == 0) else N
    n_kt = N // TK
    head_kernel = _make_head_kernel(D1, D2, TK, n_kt)
    # TODO(synk): for very small B on v7x a second "parallel" spatial axis would
    # keep both TensorCores busy; the non-local block needs all N so it is kept
    # whole per batch here (the flash loop bounds its VMEM footprint).
    y, feat = pl.pallas_call(
        head_kernel,
        grid=(B,),
        in_specs=[
            pl.BlockSpec(memory_space=pltpu.MemorySpace.SMEM),           # gmin scalar
            pl.BlockSpec((1, N, Cin), lambda i: (i, 0, 0)),              # image
            full((Cin, Cf)), full((Cf, D2)), full((1, D2)),              # base / conv1
            full((Cin, Cf)), full((Cf, D2)), full((1, D2)),              # mars / conv2
            full((D2, 2 * D1)), full((D1, D2)),                          # theta|g, w_z
            full((1, D2)), full((1, D2)), full((1, D2)), full((1, D2)),  # bn1, bn2 affines
            full((D2, NCp)),                                             # classifier (padded)
        ],
        out_specs=[
            pl.BlockSpec((1, 2, NCp), lambda i: (i, 0, 0)),
            pl.BlockSpec((1, 1, 2 * D2), lambda i: (i, 0, 0)),
        ],
        out_shape=[
            jax.ShapeDtypeStruct((B, 2, NCp), F32),
            jax.ShapeDtypeStruct((B, 1, 2 * D2), F32),
        ],
        compiler_params=pltpu.CompilerParams(
            dimension_semantics=("parallel",),
            vmem_limit_bytes=48 * 1024 * 1024),
    )(gmin, img, wbase, w1, b1, wmars, w2, b2, wtg, wz,
      bn1s, bn1b, bn2s, bn2b, wcls)

    y1 = y[:, 0, :NC]
    y2 = y[:, 1, :NC]
    return y1, y2, feat.reshape(B, 2 * D2)


# ---------------------------------------------------------------------------
# Deterministic parameter init (weights are stored transposed: (Cin, Cout))
# ---------------------------------------------------------------------------
def init_params(key, cin, cf, d1, d2, nc):
    ks = jax.random.split(key, 12)
    nrm = lambda k, shp, s: (s * jax.random.normal(k, shp)).astype(jnp.float32)

    def bn_init(k, d):
        k1, k2, k3, k4 = jax.random.split(k, 4)
        return {
            "gamma": (1.0 + 0.1 * jax.random.normal(k1, (d,))).astype(jnp.float32),
            "beta": (0.1 * jax.random.normal(k2, (d,))).astype(jnp.float32),
            "mean": (0.1 * jax.random.normal(k3, (d,))).astype(jnp.float32),
            "var": jax.random.uniform(k4, (d,), minval=0.5, maxval=1.5).astype(jnp.float32),
        }

    return {
        "w_base": nrm(ks[0], (cin, cf), 0.1),        # backbone stand-in (base)
        "w_mars": nrm(ks[1], (cin, cf), 0.1),        # backbone stand-in (base_mars)
        "w1": nrm(ks[2], (cf, d2), 0.05),            # conv1 (1x1) weight^T
        "b1": nrm(ks[3], (1, d2), 0.05),             # conv1 bias
        "w2": nrm(ks[4], (cf, d2), 0.05),            # conv2 (1x1) weight^T
        "b2": nrm(ks[5], (1, d2), 0.05),             # conv2 bias
        "w_theta": nrm(ks[6], (d2, d1), 0.05),       # theta (1x1, no bias) weight^T
        "w_g": nrm(ks[7], (d2, d1), 0.05),           # g     (1x1, no bias) weight^T
        # NOTE: PyTorch __init__ zero-fills w_z; a small nonzero deterministic init
        # is used so the non-local branch contributes numerically.
        "w_z": nrm(ks[8], (d1, d2), 0.02),           # w_z   (1x1, no bias) weight^T
        "w_cls": nrm(ks[9], (d2, nc), d2 ** -0.5),   # classifier (no bias) weight^T
        "bn1": bn_init(ks[10], d2),
        "bn2": bn_init(ks[11], d2),
    }


if __name__ == "__main__":
    # small shapes: batch=2, input channels=4, spatial 16x16 (N=256),
    # feat_dim=64, middle_dim1=32, middle_dim2=128, num_classes=16
    B, CIN, H, W = 2, 4, 16, 16
    CF, D1, D2, NC = 64, 32, 128, 16

    key = jax.random.PRNGKey(0)
    kx, kp = jax.random.split(key)
    x = jax.random.normal(kx, (B, CIN, H, W), dtype=jnp.float32)
    params = init_params(kp, CIN, CF, D1, D2, NC)

    y1, y2, feat = jax.jit(resnet50ta_bt_image_forward)(x, params)
    jax.block_until_ready((y1, y2, feat))

    assert y1.shape == (B, NC) and y2.shape == (B, NC) and feat.shape == (B, 2 * D2)
    assert bool(jnp.all(jnp.isfinite(y1))) and bool(jnp.all(jnp.isfinite(y2)))
    assert bool(jnp.all(jnp.isfinite(feat)))
    print("KERNEL_OK")
</pallas_src>

<mosaic_0001>
module attributes {stable_mosaic.version = 11 : i64} {
  func.func @_min_kernel(%arg0: i32, %arg1: i32, %arg2: memref<1x128x4xbf16, #tpu.memory_space<vmem>>, %arg3: memref<4x64xbf16, #tpu.memory_space<vmem>>, %arg4: memref<64x128xbf16, #tpu.memory_space<vmem>>, %arg5: memref<1x128xf32, #tpu.memory_space<vmem>>, %arg6: memref<1x1x128xf32, #tpu.memory_space<vmem>>) attributes {dimension_semantics = [#tpu.dimension_semantics<parallel>, #tpu.dimension_semantics<arbitrary>], iteration_bounds = array<i64: 2, 2>, scalar_prefetch = 0 : i64, scratch_operands = 0 : i64, tpu.core_type = #tpu.core_type<tc>, window_params = [{transform_indices = @transform_0, window_bounds = array<i64: 1, 128, 4>}, {pipeline_mode = #tpu.pipeline_mode<synchronous>, transform_indices = @transform_1, window_bounds = array<i64: 4, 64>}, {pipeline_mode = #tpu.pipeline_mode<synchronous>, transform_indices = @transform_2, window_bounds = array<i64: 64, 128>}, {pipeline_mode = #tpu.pipeline_mode<synchronous>, transform_indices = @transform_3, window_bounds = array<i64: 1, 128>}, {transform_indices = @transform_4, window_bounds = array<i64: 1, 1, 128>}]} {
    %c0_i32 = arith.constant 0 : i32
    %0 = arith.cmpi eq, %arg1, %c0_i32 : i32
    %1 = arith.extui %0 : i1 to i32
    %c0_i32_0 = arith.constant 0 : i32
    %2 = arith.cmpi ne, %1, %c0_i32_0 : i32
    scf.if %2 {
      %cst_18 = arith.constant 0x7F800000 : f32
      %28 = vector.broadcast %cst_18 : f32 to vector<1x1x128xf32>
      %c0_19 = arith.constant 0 : index
      %c0_20 = arith.constant 0 : index
      %c0_21 = arith.constant 0 : index
      %29 = vector.load %arg6[%c0_19, %c0_20, %c0_21] : memref<1x1x128xf32, #tpu.memory_space<vmem>>, vector<1x1x128xf32>
      tpu.vector_store %arg6[%c0_19, %c0_20, %c0_21], %28 {strides = array<i32>} : memref<1x1x128xf32, #tpu.memory_space<vmem>>, vector<1x1x128xf32>,
    } else {
    }
    %c0 = arith.constant 0 : index
    %c0_1 = arith.constant 0 : index
    %c0_2 = arith.constant 0 : index
    %3 = vector.load %arg2[%c0, %c0_1, %c0_2] : memref<1x128x4xbf16, #tpu.memory_space<vmem>>, vector<1x128x4xbf16>
    %4 = vector.shape_cast %3 : vector<1x128x4xbf16> to vector<128x4xbf16>
    %c0_3 = arith.constant 0 : index
    %c0_4 = arith.constant 0 : index
    %5 = vector.load %arg3[%c0_3, %c0_4] : memref<4x64xbf16, #tpu.memory_space<vmem>>, vector<4x64xbf16>
    %cst = arith.constant dense<0.000000e+00> : vector<128x64xf32>
    %6 = tpu.matmul %4, %5, %cst {dimension_numbers = #tpu.dot_dimension_numbers<[1], [0], [0], [1], [0, 0, 1, 1], [], []>} : vector<128x4xbf16>, vector<4x64xbf16>, vector<128x64xf32> -> vector<128x64xf32>
    %cst_5 = arith.constant 0.000000e+00 : f32
    %7 = vector.broadcast %cst_5 : f32 to vector<128x64xf32>
    %8 = arith.maximumf %6, %7 : vector<128x64xf32>
    %9 = arith.truncf %8 : vector<128x64xf32> to vector<128x64xbf16>
    %c0_6 = arith.constant 0 : index
    %c0_7 = arith.constant 0 : index
    %10 = vector.load %arg4[%c0_6, %c0_7] : memref<64x128xbf16, #tpu.memory_space<vmem>>, vector<64x128xbf16>
    %cst_8 = arith.constant dense<0.000000e+00> : vector<128x128xf32>
    %11 = tpu.matmul %9, %10, %cst_8 {dimension_numbers = #tpu.dot_dimension_numbers<[1], [0], [0], [1], [0, 0, 1, 1], [], []>} : vector<128x64xbf16>, vector<64x128xbf16>, vector<128x128xf32> -> vector<128x128xf32>
    %c0_9 = arith.constant 0 : index
    %c0_10 = arith.constant 0 : index
    %12 = vector.load %arg5[%c0_9, %c0_10] : memref<1x128xf32, #tpu.memory_space<vmem>>, vector<1x128xf32>
    %13 = vector.broadcast %12 : vector<1x128xf32> to vector<128x128xf32>
    %14 = arith.addf %11, %13 : vector<128x128xf32>
    %15 = vector.shape_cast %14 : vector<128x128xf32> to vector<1x128x128xf32>
    %cst_11 = arith.constant dense<0x7F800000> : vector<1xf32>
    %16 = vector.multi_reduction <minimumf>, %15, %cst_11 [1, 2] : vector<1x128x128xf32> to vector<1xf32>
    %17 = vector.shape_cast %16 : vector<1xf32> to vector<1x1x1xf32>
    %18 = vector.extract %17[0, 0, 0] : f32 from vector<1x1x1xf32>
    %19 = vector.broadcast %18 : f32 to vector<1x1xf32>
    %c0_12 = arith.constant 0 : index
    %c0_13 = arith.constant 0 : index
    %c0_14 = arith.constant 0 : index
    %20 = vector.load %arg6[%c0_12, %c0_13, %c0_14] : memref<1x1x128xf32, #tpu.memory_space<vmem>>, vector<1x1x128xf32>
    %21 = vector.shape_cast %20 : vector<1x1x128xf32> to vector<1x128xf32>
    %22 = vector.shape_cast %19 : vector<1x1xf32> to vector<1x1xf32>
    %23 = vector.broadcast %22 : vector<1x1xf32> to vector<1x128xf32>
    %24 = arith.minimumf %21, %23 : vector<1x128xf32>
    %c0_15 = arith.constant 0 : index
    %c0_16 = arith.constant 0 : index
    %c0_17 = arith.constant 0 : index
    %25 = vector.load %arg6[%c0_15, %c0_16, %c0_17] : memref<1x1x128xf32, #tpu.memory_space<vmem>>, vector<1x1x128xf32>
    %26 = vector.shape_cast %25 : vector<1x1x128xf32> to vector<1x128xf32>
    %27 = vector.shape_cast %24 : vector<1x128xf32> to vector<1x1x128xf32>
    tpu.vector_store %arg6[%c0_15, %c0_16, %c0_17], %27 {strides = array<i32>} : memref<1x1x128xf32, #tpu.memory_space<vmem>>, vector<1x1x128xf32>,
    return
  }
  func.func @transform_0(%arg0: i32, %arg1: i32) -> (i32, i32, i32) {
    %c0_i32 = arith.constant 0 : i32
    %c0_i32_0 = arith.constant 0 : i32
    return %arg0, %arg1, %c0_i32 : i32, i32, i32
  }
  func.func @transform_1(%arg0: i32, %arg1: i32) -> (i32, i32) {
    %c0_i32 = arith.constant 0 : i32
    %c0_i32_0 = arith.constant 0 : i32
    %c0_i32_1 = arith.constant 0 : i32
    return %c0_i32, %c0_i32_0 : i32, i32
  }
  func.func @transform_2(%arg0: i32, %arg1: i32) -> (i32, i32) {
    %c0_i32 = arith.constant 0 : i32
    %c0_i32_0 = arith.constant 0 : i32
    %c0_i32_1 = arith.constant 0 : i32
    return %c0_i32, %c0_i32_0 : i32, i32
  }
  func.func @transform_3(%arg0: i32, %arg1: i32) -> (i32, i32) {
    %c0_i32 = arith.constant 0 : i32
    %c0_i32_0 = arith.constant 0 : i32
    %c0_i32_1 = arith.constant 0 : i32
    return %c0_i32, %c0_i32_0 : i32, i32
  }
  func.func @transform_4(%arg0: i32, %arg1: i32) -> (i32, i32, i32) {
    %c0_i32 = arith.constant 0 : i32
    %c0_i32_0 = arith.constant 0 : i32
    %c0_i32_1 = arith.constant 0 : i32
    return %arg0, %c0_i32, %c0_i32_0 : i32, i32, i32
  }
}

module attributes {stable_mosaic.version = 11 : i64} {
  func.func @head_kernel(%arg0: i32, %arg1: memref<1xf32, #tpu.memory_space<smem>>, %arg2: memref<1x256x4xbf16, #tpu.memory_space<vmem>>, %arg3: memref<4x64xbf16, #tpu.memory_space<vmem>>, %arg4: memref<64x128xbf16, #tpu.memory_space<vmem>>, %arg5: memref<1x128xf32, #tpu.memory_space<vmem>>, %arg6: memref<4x64xbf16, #tpu.memory_space<vmem>>, %arg7: memref<64x128xbf16, #tpu.memory_space<vmem>>, %arg8: memref<1x128xf32, #tpu.memory_space<vmem>>, %arg9: memref<128x64xbf16, #tpu.memory_space<vmem>>, %arg10: memref<32x128xbf16, #tpu.memory_space<vmem>>, %arg11: memref<1x128xf32, #tpu.memory_space<vmem>>, %arg12: memref<1x128xf32, #tpu.memory_space<vmem>>, %arg13: memref<1x128xf32, #tpu.memory_space<vmem>>, %arg14: memref<1x128xf32, #tpu.memory_space<vmem>>, %arg15: memref<128x128xbf16, #tpu.memory_space<vmem>>, %arg16: memref<1x2x128xf32, #tpu.memory_space<vmem>>, %arg17: memref<1x1x256xf32, #tpu.memory_space<vmem>>) attributes {dimension_semantics = [#tpu.dimension_semantics<parallel>], iteration_bounds = array<i64: 2>, scalar_prefetch = 0 : i64, scratch_operands = 0 : i64, tpu.core_type = #tpu.core_type<tc>, window_params = [{transform_indices = @transform_0, window_bounds = array<i64: 1>}, {transform_indices = @transform_1, window_bounds = array<i64: 1, 256, 4>}, {pipeline_mode = #tpu.pipeline_mode<synchronous>, transform_indices = @transform_2, window_bounds = array<i64: 4, 64>}, {pipeline_mode = #tpu.pipeline_mode<synchronous>, transform_indices = @transform_3, window_bounds = array<i64: 64, 128>}, {pipeline_mode = #tpu.pipeline_mode<synchronous>, transform_indices = @transform_4, window_bounds = array<i64: 1, 128>}, {pipeline_mode = #tpu.pipeline_mode<synchronous>, transform_indices = @transform_5, window_bounds = array<i64: 4, 64>}, {pipeline_mode = #tpu.pipeline_mode<synchronous>, transform_indices = @transform_6, window_bounds = array<i64: 64, 128>}, {pipeline_mode = #tpu.pipeline_mode<synchronous>, transform_indices = @transform_7, window_bounds = array<i64: 1, 128>}, {pipeline_mode = #tpu.pipeline_mode<synchronous>, transform_indices = @transform_8, window_bounds = array<i64: 128, 64>}, {pipeline_mode = #tpu.pipeline_mode<synchronous>, transform_indices = @transform_9, window_bounds = array<i64: 32, 128>}, {pipeline_mode = #tpu.pipeline_mode<synchronous>, transform_indices = @transform_10, window_bounds = array<i64: 1, 128>}, {pipeline_mode = #tpu.pipeline_mode<synchronous>, transform_indices = @transform_11, window_bounds = array<i64: 1, 128>}, {pipeline_mode = #tpu.pipeline_mode<synchronous>, transform_indices = @transform_12, window_bounds = array<i64: 1, 128>}, {pipeline_mode = #tpu.pipeline_mode<synchronous>, transform_indices = @transform_13, window_bounds = array<i64: 1, 128>}, {pipeline_mode = #tpu.pipeline_mode<synchronous>, transform_indices = @transform_14, window_bounds = array<i64: 128, 128>}, {transform_indices = @transform_15, window_bounds = array<i64: 1, 2, 128>}, {transform_indices = @transform_16, window_bounds = array<i64: 1, 1, 256>}]} {
    %c0 = arith.constant 0 : index
    %0 = memref.load %arg1[%c0] : memref<1xf32, #tpu.memory_space<smem>>
    %c0_0 = arith.constant 0 : index
    %c0_1 = arith.constant 0 : index
    %c0_2 = arith.constant 0 : index
    %1 = vector.load %arg2[%c0_0, %c0_1, %c0_2] : memref<1x256x4xbf16, #tpu.memory_space<vmem>>, vector<1x256x4xbf16>
    %2 = vector.shape_cast %1 : vector<1x256x4xbf16> to vector<256x4xbf16>
    %c0_3 = arith.constant 0 : index
    %c0_4 = arith.constant 0 : index
    %3 = vector.load %arg3[%c0_3, %c0_4] : memref<4x64xbf16, #tpu.memory_space<vmem>>, vector<4x64xbf16>
    %cst = arith.constant dense<0.000000e+00> : vector<256x64xf32>
    %4 = tpu.matmul %2, %3, %cst {dimension_numbers = #tpu.dot_dimension_numbers<[1], [0], [0], [1], [0, 0, 1, 1], [], []>} : vector<256x4xbf16>, vector<4x64xbf16>, vector<256x64xf32> -> vector<256x64xf32>
    %cst_5 = arith.constant 0.000000e+00 : f32
    %5 = vector.broadcast %cst_5 : f32 to vector<256x64xf32>
    %6 = arith.maximumf %4, %5 : vector<256x64xf32>
    %7 = arith.truncf %6 : vector<256x64xf32> to vector<256x64xbf16>
    %c0_6 = arith.constant 0 : index
    %c0_7 = arith.constant 0 : index
    %8 = vector.load %arg4[%c0_6, %c0_7] : memref<64x128xbf16, #tpu.memory_space<vmem>>, vector<64x128xbf16>
    %cst_8 = arith.constant dense<0.000000e+00> : vector<256x128xf32>
    %9 = tpu.matmul %7, %8, %cst_8 {dimension_numbers = #tpu.dot_dimension_numbers<[1], [0], [0], [1], [0, 0, 1, 1], [], []>} : vector<256x64xbf16>, vector<64x128xbf16>, vector<256x128xf32> -> vector<256x128xf32>
    %c0_9 = arith.constant 0 : index
    %c0_10 = arith.constant 0 : index
    %10 = vector.load %arg5[%c0_9, %c0_10] : memref<1x128xf32, #tpu.memory_space<vmem>>, vector<1x128xf32>
    %11 = vector.broadcast %10 : vector<1x128xf32> to vector<256x128xf32>
    %12 = arith.addf %9, %11 : vector<256x128xf32>
    %cst_11 = arith.constant dense<0.000000e+00> : vector<128xf32>
    %13 = vector.multi_reduction <add>, %12, %cst_11 [0] : vector<256x128xf32> to vector<128xf32>
    %14 = vector.shape_cast %13 : vector<128xf32> to vector<1x128xf32>
    %cst_12 = arith.constant 2.560000e+02 : f32
    %15 = vector.broadcast %cst_12 : f32 to vector<1x128xf32>
    %16 = arith.divf %14, %15 : vector<1x128xf32>
    %cst_13 = arith.constant dense<0xFF800000> : vector<1xf32>
    %17 = vector.multi_reduction <maximumf>, %16, %cst_13 [1] : vector<1x128xf32> to vector<1xf32>
    %18 = vector.shape_cast %17 : vector<1xf32> to vector<1x1xf32>
    %19 = vector.broadcast %18 : vector<1x1xf32> to vector<1x128xf32>
    %20 = arith.subf %16, %19 : vector<1x128xf32>
    %21 = math.exp %20 : vector<1x128xf32>
    %cst_14 = arith.constant dense<0.000000e+00> : vector<1xf32>
    %22 = vector.multi_reduction <add>, %21, %cst_14 [1] : vector<1x128xf32> to vector<1xf32>
    %23 = vector.shape_cast %22 : vector<1xf32> to vector<1x1xf32>
    %24 = tpu.reciprocal %23 {approx = true} : vector<1x1xf32> -> vector<1x1xf32>
    %25 = vector.broadcast %24 : vector<1x1xf32> to vector<1x128xf32>
    %26 = arith.mulf %21, %25 : vector<1x128xf32>
    %27 = vector.broadcast %0 : f32 to vector<256x128xf32>
    %28 = arith.subf %12, %27 : vector<256x128xf32>
    %29 = vector.broadcast %26 : vector<1x128xf32> to vector<256x128xf32>
    %30 = arith.mulf %29, %28 : vector<256x128xf32>
    %cst_15 = arith.constant dense<0.000000e+00> : vector<256xf32>
    %31 = vector.multi_reduction <add>, %30, %cst_15 [1] : vector<256x128xf32> to vector<256xf32>
    %32 = vector.shape_cast %31 : vector<256xf32> to vector<256x1xf32>
    %cst_16 = arith.constant 0.000000e+00 : f32
    %33 = vector.broadcast %cst_16 : f32 to vector<256x1xf32>
    %34 = arith.subf %33, %32 : vector<256x1xf32>
    %35 = math.exp %34 : vector<256x1xf32>
    %cst_17 = arith.constant 1.000000e+00 : f32
    %36 = vector.broadcast %cst_17 : f32 to vector<256x1xf32>
    %37 = arith.addf %36, %35 : vector<256x1xf32>
    %38 = tpu.reciprocal %37 {approx = true} : vector<256x1xf32> -> vector<256x1xf32>
    %c0_18 = arith.constant 0 : index
    %c0_19 = arith.constant 0 : index
    %39 = vector.load %arg11[%c0_18, %c0_19] : memref<1x128xf32, #tpu.memory_space<vmem>>, vector<1x128xf32>
    %40 = arith.mulf %16, %39 : vector<1x128xf32>
    %c0_20 = arith.constant 0 : index
    %c0_21 = arith.constant 0 : index
    %41 = vector.load %arg12[%c0_20, %c0_21] : memref<1x128xf32, #tpu.memory_space<vmem>>, vector<1x128xf32>
    %42 = arith.addf %40, %41 : vector<1x128xf32>
    %c0_22 = arith.constant 0 : index
    %c0_23 = arith.constant 0 : index
    %43 = vector.load %arg6[%c0_22, %c0_23] : memref<4x64xbf16, #tpu.memory_space<vmem>>, vector<4x64xbf16>
    %cst_24 = arith.constant dense<0.000000e+00> : vector<256x64xf32>
    %44 = tpu.matmul %2, %43, %cst_24 {dimension_numbers = #tpu.dot_dimension_numbers<[1], [0], [0], [1], [0, 0, 1, 1], [], []>} : vector<256x4xbf16>, vector<4x64xbf16>, vector<256x64xf32> -> vector<256x64xf32>
    %cst_25 = arith.constant 0.000000e+00 : f32
    %45 = vector.broadcast %cst_25 : f32 to vector<256x64xf32>
    %46 = arith.maximumf %44, %45 : vector<256x64xf32>
    %47 = arith.truncf %46 : vector<256x64xf32> to vector<256x64xbf16>
    %c0_26 = arith.constant 0 : index
    %c0_27 = arith.constant 0 : index
    %48 = vector.load %arg7[%c0_26, %c0_27] : memref<64x128xbf16, #tpu.memory_space<vmem>>, vector<64x128xbf16>
    %cst_28 = arith.constant dense<0.000000e+00> : vector<256x128xf32>
    %49 = tpu.matmul %47, %48, %cst_28 {dimension_numbers = #tpu.dot_dimension_numbers<[1], [0], [0], [1], [0, 0, 1, 1], [], []>} : vector<256x64xbf16>, vector<64x128xbf16>, vector<256x128xf32> -> vector<256x128xf32>
    %c0_29 = arith.constant 0 : index
    %c0_30 = arith.constant 0 : index
    %50 = vector.load %arg8[%c0_29, %c0_30] : memref<1x128xf32, #tpu.memory_space<vmem>>, vector<1x128xf32>
    %51 = vector.broadcast %50 : vector<1x128xf32> to vector<256x128xf32>
    %52 = arith.addf %49, %51 : vector<256x128xf32>
    %53 = vector.broadcast %38 : vector<256x1xf32> to vector<256x128xf32>
    %54 = arith.mulf %52, %53 : vector<256x128xf32>
    %55 = arith.truncf %54 : vector<256x128xf32> to vector<256x128xbf16>
    %c0_31 = arith.constant 0 : index
    %c0_32 = arith.constant 0 : index
    %56 = vector.load %arg9[%c0_31, %c0_32] : memref<128x64xbf16, #tpu.memory_space<vmem>>, vector<128x64xbf16>
    %cst_33 = arith.constant dense<0.000000e+00> : vector<256x64xf32>
    %57 = tpu.matmul %55, %56, %cst_33 {dimension_numbers = #tpu.dot_dimension_numbers<[1], [0], [0], [1], [0, 0, 1, 1], [], []>} : vector<256x128xbf16>, vector<128x64xbf16>, vector<256x64xf32> -> vector<256x64xf32>
    %cst_34 = arith.constant 0.000000e+00 : f32
    %58 = vector.broadcast %cst_34 : f32 to vector<256x64xf32>
    %59 = arith.maximumf %57, %58 : vector<256x64xf32>
    %60 = vector.extract_strided_slice %59 {offsets = [0, 0], sizes = [256, 32], strides = [1, 1]} : vector<256x64xf32> to vector<256x32xf32>
    %61 = vector.extract_strided_slice %59 {offsets = [0, 32], sizes = [256, 32], strides = [1, 1]} : vector<256x64xf32> to vector<256x32xf32>
    %62 = arith.mulf %60, %60 : vector<256x32xf32>
    %cst_35 = arith.constant dense<0.000000e+00> : vector<256xf32>
    %63 = vector.multi_reduction <add>, %62, %cst_35 [1] : vector<256x32xf32> to vector<256xf32>
    %64 = vector.shape_cast %63 : vector<256xf32> to vector<256x1xf32>
    %cst_36 = arith.constant 1.000000e-24 : f32
    %65 = vector.broadcast %cst_36 : f32 to vector<256x1xf32>
    %66 = arith.maximumf %64, %65 : vector<256x1xf32>
    %67 = math.rsqrt %66 : vector<256x1xf32>
    %68 = vector.broadcast %67 : vector<256x1xf32> to vector<256x32xf32>
    %69 = arith.mulf %60, %68 : vector<256x32xf32>
    %70 = arith.truncf %69 : vector<256x32xf32> to vector<256x32xbf16>
    %71 = arith.truncf %61 : vector<256x32xf32> to vector<256x32xbf16>
    %cst_37 = arith.constant 0xFF800000 : f32
    %72 = vector.broadcast %cst_37 : f32 to vector<256x1xf32>
    %cst_38 = arith.constant 0.000000e+00 : f32
    %73 = vector.broadcast %cst_38 : f32 to vector<256x1xf32>
    %cst_39 = arith.constant 0.000000e+00 : f32
    %74 = vector.broadcast %cst_39 : f32 to vector<256x32xf32>
    %75 = vector.extract_strided_slice %70 {offsets = [0, 0], sizes = [128, 32], strides = [1, 1]} : vector<256x32xbf16> to vector<128x32xbf16>
    %76 = vector.extract_strided_slice %71 {offsets = [0, 0], sizes = [128, 32], strides = [1, 1]} : vector<256x32xbf16> to vector<128x32xbf16>
    %cst_40 = arith.constant dense<0.000000e+00> : vector<256x128xf32>
    %77 = tpu.matmul %70, %75, %cst_40 {dimension_numbers = #tpu.dot_dimension_numbers<[1], [1], [0], [0], [0, 0, 1, 0], [], []>} : vector<256x32xbf16>, vector<128x32xbf16>, vector<256x128xf32> -> vector<256x128xf32>
    %cst_41 = arith.constant dense<0xFF800000> : vector<256xf32>
    %78 = vector.multi_reduction <maximumf>, %77, %cst_41 [1] : vector<256x128xf32> to vector<256xf32>
    %79 = vector.shape_cast %78 : vector<256xf32> to vector<256x1xf32>
    %80 = arith.maximumf %72, %79 : vector<256x1xf32>
    %81 = arith.subf %72, %80 : vector<256x1xf32>
    %82 = math.exp %81 : vector<256x1xf32>
    %83 = vector.broadcast %80 : vector<256x1xf32> to vector<256x128xf32>
    %84 = arith.subf %77, %83 : vector<256x128xf32>
    %85 = math.exp %84 : vector<256x128xf32>
    %86 = arith.mulf %82, %73 : vector<256x1xf32>
    %cst_42 = arith.constant dense<0.000000e+00> : vector<256xf32>
    %87 = vector.multi_reduction <add>, %85, %cst_42 [1] : vector<256x128xf32> to vector<256xf32>
    %88 = vector.shape_cast %87 : vector<256xf32> to vector<256x1xf32>
    %89 = arith.addf %86, %88 : vector<256x1xf32>
    %90 = vector.broadcast %82 : vector<256x1xf32> to vector<256x32xf32>
    %91 = arith.mulf %90, %74 : vector<256x32xf32>
    %92 = arith.truncf %85 : vector<256x128xf32> to vector<256x128xbf16>
    %cst_43 = arith.constant dense<0.000000e+00> : vector<256x32xf32>
    %93 = tpu.matmul %92, %76, %cst_43 {dimension_numbers = #tpu.dot_dimension_numbers<[1], [0], [0], [1], [0, 0, 1, 1], [], []>} : vector<256x128xbf16>, vector<128x32xbf16>, vector<256x32xf32> -> vector<256x32xf32>
    %94 = arith.addf %91, %93 : vector<256x32xf32>
    %95 = vector.extract_strided_slice %70 {offsets = [128, 0], sizes = [128, 32], strides = [1, 1]} : vector<256x32xbf16> to vector<128x32xbf16>
    %96 = vector.extract_strided_slice %71 {offsets = [128, 0], sizes = [128, 32], strides = [1, 1]} : vector<256x32xbf16> to vector<128x32xbf16>
    %cst_44 = arith.constant dense<0.000000e+00> : vector<256x128xf32>
    %97 = tpu.matmul %70, %95, %cst_44 {dimension_numbers = #tpu.dot_dimension_numbers<[1], [1], [0], [0], [0, 0, 1, 0], [], []>} : vector<256x32xbf16>, vector<128x32xbf16>, vector<256x128xf32> -> vector<256x128xf32>
    %cst_45 = arith.constant dense<0xFF800000> : vector<256xf32>
    %98 = vector.multi_reduction <maximumf>, %97, %cst_45 [1] : vector<256x128xf32> to vector<256xf32>
    %99 = vector.shape_cast %98 : vector<256xf32> to vector<256x1xf32>
    %100 = arith.maximumf %80, %99 : vector<256x1xf32>
    %101 = arith.subf %80, %100 : vector<256x1xf32>
    %102 = math.exp %101 : vector<256x1xf32>
    %103 = vector.broadcast %100 : vector<256x1xf32> to vector<256x128xf32>
    %104 = arith.subf %97, %103 : vector<256x128xf32>
    %105 = math.exp %104 : vector<256x128xf32>
    %106 = arith.mulf %102, %89 : vector<256x1xf32>
    %cst_46 = arith.constant dense<0.000000e+00> : vector<256xf32>
    %107 = vector.multi_reduction <add>, %105, %cst_46 [1] : vector<256x128xf32> to vector<256xf32>
    %108 = vector.shape_cast %107 : vector<256xf32> to vector<256x1xf32>
    %109 = arith.addf %106, %108 : vector<256x1xf32>
    %110 = vector.broadcast %102 : vector<256x1xf32> to vector<256x32xf32>
    %111 = arith.mulf %110, %94 : vector<256x32xf32>
    %112 = arith.truncf %105 : vector<256x128xf32> to vector<256x128xbf16>
    %cst_47 = arith.constant dense<0.000000e+00> : vector<256x32xf32>
    %113 = tpu.matmul %112, %96, %cst_47 {dimension_numbers = #tpu.dot_dimension_numbers<[1], [0], [0], [1], [0, 0, 1, 1], [], []>} : vector<256x128xbf16>, vector<128x32xbf16>, vector<256x32xf32> -> vector<256x32xf32>
    %114 = arith.addf %111, %113 : vector<256x32xf32>
    %115 = tpu.reciprocal %109 {approx = true} : vector<256x1xf32> -> vector<256x1xf32>
    %116 = vector.broadcast %115 : vector<256x1xf32> to vector<256x32xf32>
    %117 = arith.mulf %114, %116 : vector<256x32xf32>
    %118 = arith.truncf %117 : vector<256x32xf32> to vector<256x32xbf16>
    %c0_48 = arith.constant 0 : index
    %c0_49 = arith.constant 0 : index
    %119 = vector.load %arg10[%c0_48, %c0_49] : memref<32x128xbf16, #tpu.memory_space<vmem>>, vector<32x128xbf16>
    %cst_50 = arith.constant dense<0.000000e+00> : vector<256x128xf32>
    %120 = tpu.matmul %118, %119, %cst_50 {dimension_numbers = #tpu.dot_dimension_numbers<[1], [0], [0], [1], [0, 0, 1, 1], [], []>} : vector<256x32xbf16>, vector<32x128xbf16>, vector<256x128xf32> -> vector<256x128xf32>
    %121 = arith.addf %120, %54 : vector<256x128xf32>
    %cst_51 = arith.constant dense<0.000000e+00> : vector<1xf32>
    %122 = vector.multi_reduction <add>, %38, %cst_51 [0] : vector<256x1xf32> to vector<1xf32>
    %123 = vector.shape_cast %122 : vector<1xf32> to vector<1x1xf32>
    %124 = tpu.reciprocal %123 {approx = true} : vector<1x1xf32> -> vector<1x1xf32>
    %cst_52 = arith.constant dense<0.000000e+00> : vector<128xf32>
    %125 = vector.multi_reduction <add>, %121, %cst_52 [0] : vector<256x128xf32> to vector<128xf32>
    %126 = vector.shape_cast %125 : vector<128xf32> to vector<1x128xf32>
    %127 = vector.broadcast %124 : vector<1x1xf32> to vector<1x128xf32>
    %128 = arith.mulf %126, %127 : vector<1x128xf32>
    %c0_53 = arith.constant 0 : index
    %c0_54 = arith.constant 0 : index
    %129 = vector.load %arg13[%c0_53, %c0_54] : memref<1x128xf32, #tpu.memory_space<vmem>>, vector<1x128xf32>
    %130 = arith.mulf %128, %129 : vector<1x128xf32>
    %c0_55 = arith.constant 0 : index
    %c0_56 = arith.constant 0 : index
    %131 = vector.load %arg14[%c0_55, %c0_56] : memref<1x128xf32, #tpu.memory_space<vmem>>, vector<1x128xf32>
    %132 = arith.addf %130, %131 : vector<1x128xf32>
    %133 = tpu.concatenate %42, %132 in 0 : vector<1x128xf32>, vector<1x128xf32> -> vector<2x128xf32>
    %134 = arith.truncf %133 : vector<2x128xf32> to vector<2x128xbf16>
    %c0_57 = arith.constant 0 : index
    %c0_58 = arith.constant 0 : index
    %135 = vector.load %arg15[%c0_57, %c0_58] : memref<128x128xbf16, #tpu.memory_space<vmem>>, vector<128x128xbf16>
    %cst_59 = arith.constant dense<0.000000e+00> : vector<2x128xf32>
    %136 = tpu.matmul %134, %135, %cst_59 {dimension_numbers = #tpu.dot_dimension_numbers<[1], [0], [0], [1], [0, 0, 1, 1], [], []>} : vector<2x128xbf16>, vector<128x128xbf16>, vector<2x128xf32> -> vector<2x128xf32>
    %c0_60 = arith.constant 0 : index
    %c0_61 = arith.constant 0 : index
    %c0_62 = arith.constant 0 : index
    %137 = vector.load %arg16[%c0_60, %c0_61, %c0_62] : memref<1x2x128xf32, #tpu.memory_space<vmem>>, vector<1x2x128xf32>
    %138 = vector.shape_cast %137 : vector<1x2x128xf32> to vector<2x128xf32>
    %139 = vector.shape_cast %136 : vector<2x128xf32> to vector<1x2x128xf32>
    tpu.vector_store %arg16[%c0_60, %c0_61, %c0_62], %139 {strides = array<i32>} : memref<1x2x128xf32, #tpu.memory_space<vmem>>, vector<1x2x128xf32>,
    %c0_63 = arith.constant 0 : index
    %c0_64 = arith.constant 0 : index
    %c0_65 = arith.constant 0 : index
    %140 = vector.load %arg17[%c0_63, %c0_64, %c0_65] : memref<1x1x256xf32, #tpu.memory_space<vmem>>, vector<1x1x128xf32>
    %141 = vector.shape_cast %140 : vector<1x1x128xf32> to vector<1x128xf32>
    %142 = vector.shape_cast %42 : vector<1x128xf32> to vector<1x1x128xf32>
    tpu.vector_store %arg17[%c0_63, %c0_64, %c0_65], %142 {strides = array<i32>} : memref<1x1x256xf32, #tpu.memory_space<vmem>>, vector<1x1x128xf32>,
    %c0_66 = arith.constant 0 : index
    %c0_67 = arith.constant 0 : index
    %c128 = arith.constant 128 : index
    %143 = vector.load %arg17[%c0_66, %c0_67, %c128] : memref<1x1x256xf32, #tpu.memory_space<vmem>>, vector<1x1x128xf32>
    %144 = vector.shape_cast %143 : vector<1x1x128xf32> to vector<1x128xf32>
    %145 = vector.shape_cast %132 : vector<1x128xf32> to vector<1x1x128xf32>
    tpu.vector_store %arg17[%c0_66, %c0_67, %c128], %145 {strides = array<i32>} : memref<1x1x256xf32, #tpu.memory_space<vmem>>, vector<1x1x128xf32>,
    return
  }
  func.func @transform_0(%arg0: i32) -> i32 {
    %c0_i32 = arith.constant 0 : i32
    %c0_i32_0 = arith.constant 0 : i32
    return %c0_i32 : i32
  }
  func.func @transform_1(%arg0: i32) -> (i32, i32, i32) {
    %c0_i32 = arith.constant 0 : i32
    %c0_i32_0 = arith.constant 0 : i32
    %c0_i32_1 = arith.constant 0 : i32
    return %arg0, %c0_i32, %c0_i32_0 : i32, i32, i32
  }
  func.func @transform_2(%arg0: i32) -> (i32, i32) {
    %c0_i32 = arith.constant 0 : i32
    %c0_i32_0 = arith.constant 0 : i32
    %c0_i32_1 = arith.constant 0 : i32
    return %c0_i32, %c0_i32_0 : i32, i32
  }
  func.func @transform_3(%arg0: i32) -> (i32, i32) {
    %c0_i32 = arith.constant 0 : i32
    %c0_i32_0 = arith.constant 0 : i32
    %c0_i32_1 = arith.constant 0 : i32
    return %c0_i32, %c0_i32_0 : i32, i32
  }
  func.func @transform_4(%arg0: i32) -> (i32, i32) {
    %c0_i32 = arith.constant 0 : i32
    %c0_i32_0 = arith.constant 0 : i32
    %c0_i32_1 = arith.constant 0 : i32
    return %c0_i32, %c0_i32_0 : i32, i32
  }
  func.func @transform_5(%arg0: i32) -> (i32, i32) {
    %c0_i32 = arith.constant 0 : i32
    %c0_i32_0 = arith.constant 0 : i32
    %c0_i32_1 = arith.constant 0 : i32
    return %c0_i32, %c0_i32_0 : i32, i32
  }
  func.func @transform_6(%arg0: i32) -> (i32, i32) {
    %c0_i32 = arith.constant 0 : i32
    %c0_i32_0 = arith.constant 0 : i32
    %c0_i32_1 = arith.constant 0 : i32
    return %c0_i32, %c0_i32_0 : i32, i32
  }
  func.func @transform_7(%arg0: i32) -> (i32, i32) {
    %c0_i32 = arith.constant 0 : i32
    %c0_i32_0 = arith.constant 0 : i32
    %c0_i32_1 = arith.constant 0 : i32
    return %c0_i32, %c0_i32_0 : i32, i32
  }
  func.func @transform_8(%arg0: i32) -> (i32, i32) {
    %c0_i32 = arith.constant 0 : i32
    %c0_i32_0 = arith.constant 0 : i32
    %c0_i32_1 = arith.constant 0 : i32
    return %c0_i32, %c0_i32_0 : i32, i32
  }
  func.func @transform_9(%arg0: i32) -> (i32, i32) {
    %c0_i32 = arith.constant 0 : i32
    %c0_i32_0 = arith.constant 0 : i32
    %c0_i32_1 = arith.constant 0 : i32
    return %c0_i32, %c0_i32_0 : i32, i32
  }
  func.func @transform_10(%arg0: i32) -> (i32, i32) {
    %c0_i32 = arith.constant 0 : i32
    %c0_i32_0 = arith.constant 0 : i32
    %c0_i32_1 = arith.constant 0 : i32
    return %c0_i32, %c0_i32_0 : i32, i32
  }
  func.func @transform_11(%arg0: i32) -> (i32, i32) {
    %c0_i32 = arith.constant 0 : i32
    %c0_i32_0 = arith.constant 0 : i32
    %c0_i32_1 = arith.constant 0 : i32
    return %c0_i32, %c0_i32_0 : i32, i32
  }
  func.func @transform_12(%arg0: i32) -> (i32, i32) {
    %c0_i32 = arith.constant 0 : i32
    %c0_i32_0 = arith.constant 0 : i32
    %c0_i32_1 = arith.constant 0 : i32
    return %c0_i32, %c0_i32_0 : i32, i32
  }
  func.func @transform_13(%arg0: i32) -> (i32, i32) {
    %c0_i32 = arith.constant 0 : i32
    %c0_i32_0 = arith.constant 0 : i32
    %c0_i32_1 = arith.constant 0 : i32
    return %c0_i32, %c0_i32_0 : i32, i32
  }
  func.func @transform_14(%arg0: i32) -> (i32, i32) {
    %c0_i32 = arith.constant 0 : i32
    %c0_i32_0 = arith.constant 0 : i32
    %c0_i32_1 = arith.constant 0 : i32
    return %c0_i32, %c0_i32_0 : i32, i32
  }
  func.func @transform_15(%arg0: i32) -> (i32, i32, i32) {
    %c0_i32 = arith.constant 0 : i32
    %c0_i32_0 = arith.constant 0 : i32
    %c0_i32_1 = arith.constant 0 : i32
    return %arg0, %c0_i32, %c0_i32_0 : i32, i32, i32
  }
  func.func @transform_16(%arg0: i32) -> (i32, i32, i32) {
    %c0_i32 = arith.constant 0 : i32
    %c0_i32_0 = arith.constant 0 : i32
    %c0_i32_1 = arith.constant 0 : i32
    return %arg0, %c0_i32, %c0_i32_0 : i32, i32, i32
  }
}

</mosaic_0001>

<bundles_post_ra>
// kernel: resnet50ta_bt_image_forward.2
= control target key start
LH: loop header
LB: loop body
LE: loop exit
PB: predicated region body
PF: predicated region fallthrough
CT: control target
= control target key end

     0   :  { %s791_s15 = smov 0   ;;  %s793_s16 = smov 0   ;;  %s881_s0 = inlined_call_operand.vmem [shape: bf16[2,256,4], index: 0, kind: input, shape index: {}]   ;;  %s882_s1 = inlined_call_operand.vmem [shape: bf16[4,64], index: 1, kind: input, shape index: {}]   ;;  %s883_s2 = inlined_call_operand.vmem [shape: bf16[64,128], index: 2, kind: input, shape index: {}]   ;;  %s884_s3 = inlined_call_operand.vmem [shape: f32[1,128], index: 3, kind: input, shape index: {}]   ;;  %s885_s4 = inlined_call_operand.vmem [shape: f32[2,1,128], index: 4, kind: output, shape index: {}]  }
   0x1   :  { %s795_s17 = smov 0   ;;  %s797_s18 = smov 0  }
   0x2   :  { %s799_s19 = smov 0  }
   0x3 LB: > { %s23_s20 = sadd.s32 1, %s755_s17  ;;  %s26_s21 = sadd.s32 1, %s759_s18  ;;  %s763_s19 = sphi %s799_s19, %s14_s19   ;;  %s759_s18 = sphi %s797_s18, %s889_s18   ;;  %s755_s17 = sphi %s795_s17, %s888_s17   ;;  %s751_s16 = sphi %s793_s16, %s887_s16   ;;  %s747_s15 = sphi %s791_s15, %s886_s15  }
   0x4   : > { %p24_p0 = scmp.ge.s32.totalorder %s23_s20, 2  ;;  %p593_p1 = scmp.ge.s32.totalorder %s763_s19, 1 }
   0x5   : > { %p181_p2 = scmp.lt.s32.totalorder %s763_s19, 5 }
   0x6   : > { %s891_s20 = smov (%p24_p0, %s23_s20), 0  ;;  %s893_s21 = smov (!%p24_p0, %s26_s21), %s759_s18 }
   0x7   : > { %p182_p3 = pnand %p593_p1, %p181_p2  ;;  %p28_p4 = scmp.ge.s32.totalorder %s893_s21, 2 }
   0x8   : > { %s594_s22 = sshll.u32 (!%p182_p3), %s747_s15, 4  ;;  %p210_p5 = scmp.lt.s32.totalorder (!%p182_p3), %s751_s16, 1 }
   0x9   : > { %s895_s21 = smov (%p28_p4, %s893_s21), 0  ;;  %185 = sbr.rel (%p182_p3) target bundleno = 608 (0x260), region = 36 }
   0xa   : > { %p212_p6 = scmp.lt.s32.totalorder (!%p182_p3), %s594_s22, 31  ;;  %p597_p7 = scmp.ne.s32.totalorder (!%p182_p3), %s747_s15, 0 }
   0xe   : > { %s897_s16 = smov (!%p210_p5, %s751_s16), 1  ;;  %s899_s22 = smov (!%p212_p6, %s594_s22), 31 }
   0xf   : > { %s595_s23 = sshll.u32 %s897_s16, 5  ;;  %s824_s26 = scalar_lea.vmem %s885_s4, %s897_s16 }
  0x10   : > { %s215_s27 = sadd.s32 %s595_s23, %s899_s22  ;;  %226 = sbr.rel (%p597_p7) target bundleno = 23 (0x17), region = 40 }
  0x11   : > { %s596_s28 = sshll.u32 %s215_s27, 2 }
  0x12   : > { %s217_s5 = scalar_lea.vmem %s881_s0, %s596_s28 }
  0x15   : > { %v765_v0 = vmov inf  }
  0x16   : > { %227 = vst [vmem:[%s824_s26] sm:$0x1] %v765_v0 }
  0x17 PF: > { %v244_v1 = vld [vmem:[%s882_s1] sm:$0x3]  ;;  %vm310_vm0 = vcmask 1041408   ;;  %vm285_vm1 = vcmask 31744   ;;  %v665_v4 = vld [vmem:[%s217_s5 + $0x8] sm:$0xff]  ;;  %v666_v5 = vld [vmem:[%s217_s5 + $0x10] sm:$0xff] }
  0x18   : > { %v312_v2 = vsel %vm310_vm0, %v244_v1, 0  ;;  %v664_v3 = vld [vmem:[%s217_s5] sm:$0xff]  ;;  %v669_v6 = vld [vmem:[%s217_s5 + $0x28] sm:$0xff]  ;;  %v675_v7 = vld [vmem:[%s883_s2 + $0x18] sm:$0xff]  ;;  %vm423_vm2 = vcmask 523264  }
  0x19   : > { %321 = vmatpush.bf16.msra.mxu0 %v312_v2  ;;  %676 = vmatpush.bf16.msra.mxu3 %v312_v2  ;;  %v667_v8 = vld [vmem:[%s217_s5 + $0x18] sm:$0xff]  ;;  %v670_v9 = vld [vmem:[%s217_s5 + $0x30] sm:$0xff]  ;;  %v668_v10 = vld [vmem:[%s217_s5 + $0x20] sm:$0xff] }
  0x1a   : > { %452 = vmatpush.bf16.msra.mxu1 %v675_v7  ;;  %677 = vmatpush.bf16.msra.mxu2 %v675_v7  ;;  %v671_v11 = vld [vmem:[%s217_s5 + $0x38] sm:$0xff]  ;;  %v674_v12 = vld [vmem:[%s883_s2 + $0x10] sm:$0xff]  ;;  %v673_v13 = vld [vmem:[%s883_s2 + $0x8] sm:$0xff] }
  0x1b   : > { %v672_v14 = vld [vmem:[%s883_s2] sm:$0xff] }
  0x1c   : > { %630 = vmatmul.msk.bf16.vlgmr.msra.gmra.mxu0 %vm285_vm1, %v664_v3  ;;  %635 = vmatmul.msk.bf16.vlgmr.msra.gmra.mxu3 %vm285_vm1, %v669_v6 }
  0x1e   : > { %453 = vmatpush.bf16.msra.mxu1 %v674_v12  ;;  %678 = vmatpush.bf16.msra.mxu2 %v674_v12 }
  0x22   : > { %454 = vmatpush.bf16.msra.mxu1 %v673_v13  ;;  %679 = vmatpush.bf16.msra.mxu2 %v673_v13 }
  0x26   : > { %455 = vmatpush.bf16.msra.mxu1 %v672_v14  ;;  %680 = vmatpush.bf16.msra.mxu2 %v672_v14 }
  0x2c   : > { %631 = vmatmul.msk.bf16.gmra.mxu0 %vm285_vm1, %v665_v4  ;;  %636 = vmatmul.msk.bf16.gmra.mxu3 %vm285_vm1, %v670_v9  ;;  %v724_v4 = vld [vmem:[%s884_s3] ss:$0 sm:$0xff] }
  0x3c   : > { %632 = vmatmul.msk.bf16.gmra.mxu0 %vm285_vm1, %v666_v5  ;;  %637 = vmatmul.msk.bf16.gmra.mxu3 %vm285_vm1, %v671_v11 }
  0x4c   : > { %633 = vmatmul.msk.bf16.gmra.mxu0 %vm285_vm1, %v667_v8 }
  0x5c   : > { %634 = vmatmul.msk.bf16.gmra.mxu0 %vm285_vm1, %v668_v10 }
  0x99   : > { %v323_v15 = vpop.f32.mrf.mxu0 }
  0x9a   : > { %v363_v17 = vmax.f32 %v323_v15, 0.0 }
  0x9f   : > { %v348_v36 = vpop.f32.mrf.mxu3 }
  0xa0   : > { %v373_v43 = vmax.f32 %v348_v36, 0.0 }
  0xa1   : > { %v325_v16 = vpop.f32.mrf.mxu0 }
  0xa2   : > { %v364_v18 = vmax.f32 %v325_v16, 0.0 }
  0xa4   : > { %v379_v19 = vpack.c.bf16 %v364_v18, %v363_v17 }
  0xa6   : > { %654 = vmatmul.msk.bf16.vlgmr.msra.gmra.mxu1 %vm423_vm2, %v379_v19 }
  0xa7   : > { %v350_v41 = vpop.f32.mrf.mxu3 }
  0xa8   : > { %v374_v44 = vmax.f32 %v350_v41, 0.0 }
  0xa9   : > { %v328_v20 = vpop.f32.mrf.mxu0 }
  0xaa   : > { %v365_v22 = vmax.f32 %v328_v20, 0.0  ;;  %v384_v45 = vpack.c.bf16 %v374_v44, %v373_v43 }
  0xaf   : > { %v353_v42 = vpop.f32.mrf.mxu3 }
  0xb0   : > { %v375_v47 = vmax.f32 %v353_v42, 0.0 }
  0xb1   : > { %v330_v21 = vpop.f32.mrf.mxu0 }
  0xb2   : > { %v366_v23 = vmax.f32 %v330_v21, 0.0 }
  0xb4   : > { %v380_v24 = vpack.c.bf16 %v366_v23, %v365_v22 }
  0xb6   : > { %655 = vmatmul.msk.bf16.gmra.mxu1 %vm423_vm2, %v380_v24 }
  0xb7   : > { %v355_v46 = vpop.f32.mrf.mxu3 }
  0xb8   : > { %v376_v48 = vmax.f32 %v355_v46, 0.0  ;;  %v521_v46 = vld [vmem:[%s824_s26] sm:$0x1] }
  0xb9   : > { %v333_v25 = vpop.f32.mrf.mxu0 }
  0xba   : > { %v367_v27 = vmax.f32 %v333_v25, 0.0  ;;  %v385_v50 = vpack.c.bf16 %v376_v48, %v375_v47 }
  0xbf   : > { %v358_v49 = vpop.f32.mrf.mxu3 }
  0xc0   : > { %v377_v52 = vmax.f32 %v358_v49, 0.0 }
  0xc1   : > { %v335_v26 = vpop.f32.mrf.mxu0 }
  0xc2   : > { %v368_v28 = vmax.f32 %v335_v26, 0.0 }
  0xc4   : > { %v381_v29 = vpack.c.bf16 %v368_v28, %v367_v27 }
  0xc6   : > { %656 = vmatmul.msk.bf16.gmra.mxu1 %vm423_vm2, %v381_v29 }
  0xc7   : > { %v360_v51 = vpop.f32.mrf.mxu3 }
  0xc8   : > { %v378_v53 = vmax.f32 %v360_v51, 0.0 }
  0xc9   : > { %v338_v30 = vpop.f32.mrf.mxu0 }
  0xca   : > { %v369_v32 = vmax.f32 %v338_v30, 0.0  ;;  %v386_v54 = vpack.c.bf16 %v378_v53, %v377_v52 }
  0xd1   : > { %v340_v31 = vpop.f32.mrf.mxu0 }
  0xd2   : > { %v370_v33 = vmax.f32 %v340_v31, 0.0 }
  0xd4   : > { %v382_v34 = vpack.c.bf16 %v370_v33, %v369_v32 }
  0xd6   : > { %657 = vmatmul.msk.bf16.gmra.mxu1 %vm423_vm2, %v382_v34 }
  0xd9   : > { %v343_v35 = vpop.f32.mrf.mxu0 }
  0xda   : > { %v371_v38 = vmax.f32 %v343_v35, 0.0 }
  0xe1   : > { %v345_v37 = vpop.f32.mrf.mxu0 }
  0xe2   : > { %v372_v39 = vmax.f32 %v345_v37, 0.0 }
  0xe4   : > { %v383_v40 = vpack.c.bf16 %v372_v39, %v371_v38 }
  0xe6   : > { %658 = vmatmul.msk.bf16.vlgmr.msra.gmra.mxu2 %vm423_vm2, %v383_v40 }
  0xf6   : > { %659 = vmatmul.msk.bf16.gmra.mxu2 %vm423_vm2, %v384_v45 }
 0x106   : > { %660 = vmatmul.msk.bf16.gmra.mxu2 %vm423_vm2, %v385_v50 }
 0x116   : > { %661 = vmatmul.msk.bf16.gmra.mxu2 %vm423_vm2, %v386_v54 }
 0x123   : > { %v457_v55 = vpop.f32.mrf.mxu1 }
 0x124   : > { %v458_v13 = vadd.f32 %v724_v4, %v457_v55 }
 0x12b   : > { %v459_v56 = vpop.f32.mrf.mxu1 }
 0x12c   : > { %v460_v10 = vadd.f32 %v724_v4, %v459_v56 }
 0x133   : > { %v462_v57 = vpop.f32.mrf.mxu1 }
 0x134   : > { %v463_v14 = vadd.f32 %v724_v4, %v462_v57 }
 0x13b   : > { %v464_v59 = vpop.f32.mrf.mxu1 }
 0x13c   : > { %v465_v15 = vadd.f32 %v724_v4, %v464_v59 }
 0x143   : > { %v467_v62 = vpop.f32.mrf.mxu1 }
 0x144   : > { %v468_v8 = vadd.f32 %v724_v4, %v467_v62 }
 0x146   : > { %v497_v21 = vmin.f32 %v458_v13, %v468_v8 }
 0x14b   : > { %v469_v0 = vpop.f32.mrf.mxu1 }
 0x14c   : > { %v470_v7 = vadd.f32 %v724_v4, %v469_v0 }
 0x14e   : > { %v498_v17 = vmin.f32 %v460_v10, %v470_v7 }
 0x153   : > { %v472_v2 = vpop.f32.mrf.mxu1 }
 0x154   : > { %v473_v9 = vadd.f32 %v724_v4, %v472_v2 }
 0x156   : > { %v499_v22 = vmin.f32 %v463_v14, %v473_v9 }
 0x15b   : > { %v474_v5 = vpop.f32.mrf.mxu1 }
 0x15c   : > { %v475_v11 = vadd.f32 %v724_v4, %v474_v5 }
 0x15e   : > { %v500_v23 = vmin.f32 %v465_v15, %v475_v11 }
 0x169   : > { %v477_v58 = vpop.f32.mrf.mxu2 }
 0x16a   : > { %v478_v16 = vadd.f32 %v724_v4, %v477_v58 }
 0x16c   : > { %v501_v27 = vmin.f32 %v497_v21, %v478_v16 }
 0x171   : > { %v479_v60 = vpop.f32.mrf.mxu2 }
 0x172   : > { %v480_v12 = vadd.f32 %v724_v4, %v479_v60 }
 0x174   : > { %v502_v24 = vmin.f32 %v498_v17, %v480_v12 }
 0x179   : > { %v482_v61 = vpop.f32.mrf.mxu2 }
 0x17a   : > { %v483_v18 = vadd.f32 %v724_v4, %v482_v61 }
 0x17c   : > { %v503_v29 = vmin.f32 %v499_v22, %v483_v18 }
 0x181   : > { %v484_v63 = vpop.f32.mrf.mxu2 }
 0x182   : > { %v485_v19 = vadd.f32 %v724_v4, %v484_v63 }
 0x184   : > { %v504_v30 = vmin.f32 %v500_v23, %v485_v19 }
 0x189   : > { %v487_v1 = vpop.f32.mrf.mxu2 }
 0x18a   : > { %v488_v25 = vadd.f32 %v724_v4, %v487_v1 }
 0x18c   : > { %v505_v33 = vmin.f32 %v501_v27, %v488_v25 }
 0x191   : > { %v489_v3 = vpop.f32.mrf.mxu2 }
 0x192   : > { %v490_v20 = vadd.f32 %v724_v4, %v489_v3 }
 0x194   : > { %v506_v31 = vmin.f32 %v502_v24, %v490_v20 }
 0x196   : > { %v509_v36 = vmin.f32 %v505_v33, %v506_v31 }
 0x199   : > { %v492_v6 = vpop.f32.mrf.mxu2 }
 0x19a   : > { %v493_v26 = vadd.f32 %v724_v4, %v492_v6 }
 0x19c   : > { %v507_v34 = vmin.f32 %v503_v29, %v493_v26 }
 0x1a1   : > { %v494_v28 = vpop.f32.mrf.mxu2 }
 0x1a2   : > { %v495_v32 = vadd.f32 %v724_v4, %v494_v28 }
 0x1a4   : > { %v508_v35 = vmin.f32 %v504_v30, %v495_v32 }
 0x1a6   : > { %v510_v37 = vmin.f32 %v507_v34, %v508_v35 }
 0x1a8   : > { %v511_v38 = vmin.f32 %v509_v36, %v510_v37 }
 0x1aa   : > { %512 = vmin.xlane.f32.xlu0 %v511_v38 }
 0x21d   : > { %v513_v39 = vpop.xlane.xlu0 %512 }
 0x21e   : > { %v514_v40 = vrot.slane %v513_v39, 4 }
 0x220   : > { %v515_v41 = vmin.f32 %v513_v39, %v514_v40 }
 0x222   : > { %v516_v42 = vrot.slane %v515_v41, 2 }
 0x224   : > { %v517_v43 = vmin.f32 %v515_v41, %v516_v42 }
 0x226   : > { %v518_v44 = vrot.slane %v517_v43, 1 }
 0x228   : > { %v519_v45 = vmin.f32 %v517_v43, %v518_v44 }
 0x22a   : > { %681 = vpush %v519_v45 }
 0x25b   : > { %s682_s23 = spop %681 }
 0x25c   : > { %v522_v47 = vstv %s682_s23 }
 0x25d   : > { %v523_v48 = vmin.f32 %v521_v46, %v522_v47 }
 0x25f   : > { %524 = vst [vmem:[%s824_s26] sm:$0x1] %v523_v48 }
 0x260 PF: > { %s14_s19 = sadd.s32 1, %s763_s19   ;;  %s886_s15 = smov %s755_s17 }
 0x261   : > { %p11_p8 = scmp.ge.s32.totalorder %s14_s19, 6   ;;  %s887_s16 = smov %s759_s18 }
 0x262   : > { %s888_s17 = smov %s891_s20  ;;  %s889_s18 = smov %s895_s21 }
 0x263   :  { %13 = sbr.rel (!%p11_p8) target bundleno = 3 (0x3), region = 70 }

// kernel: resnet50ta_bt_image_forward.3
= control target key start
LH: loop header
LB: loop body
LE: loop exit
PB: predicated region body
PF: predicated region fallthrough
CT: control target
= control target key end

     0   :  { %s5475_s24 = smov 0   ;;  %s8566_s0 = inlined_call_operand.<no memory space> [shape: f32[1], index: 0, kind: input, shape index: {}]   ;;  %s8567_s1 = inlined_call_operand.vmem [shape: bf16[2,256,4], index: 1, kind: input, shape index: {}]   ;;  %s8568_s2 = inlined_call_operand.vmem [shape: bf16[4,64], index: 2, kind: input, shape index: {}]   ;;  %s8569_s3 = inlined_call_operand.vmem [shape: bf16[64,128], index: 3, kind: input, shape index: {}]   ;;  %s8570_s4 = inlined_call_operand.vmem [shape: f32[1,128], index: 4, kind: input, shape index: {}]   ;;  %s8571_s5 = inlined_call_operand.vmem [shape: bf16[4,64], index: 5, kind: input, shape index: {}]   ;;  %s8572_s6 = inlined_call_operand.vmem [shape: bf16[64,128], index: 6, kind: input, shape index: {}]   ;;  %s8573_s7 = inlined_call_operand.vmem [shape: f32[1,128], index: 7, kind: input, shape index: {}]   ;;  %s8574_s8 = inlined_call_operand.vmem [shape: bf16[128,64], index: 8, kind: input, shape index: {}]   ;;  %s8575_s9 = inlined_call_operand.vmem [shape: bf16[32,128], index: 9, kind: input, shape index: {}]   ;;  %s8576_s10 = inlined_call_operand.vmem [shape: f32[1,128], index: 10, kind: input, shape index: {}]   ;;  %s8577_s11 = inlined_call_operand.vmem [shape: f32[1,128], index: 11, kind: input, shape index: {}]   ;;  %s8578_s12 = inlined_call_operand.vmem [shape: f32[1,128], index: 12, kind: input, shape index: {}]   ;;  %s8579_s13 = inlined_call_operand.vmem [shape: f32[1,128], index: 13, kind: input, shape index: {}]   ;;  %s8580_s14 = inlined_call_operand.vmem [shape: bf16[128,128], index: 14, kind: input, shape index: {}]   ;;  %s8581_s15 = inlined_call_operand.vmem [shape: f32[2,2,128], index: 15, kind: output, shape index: {0}]   ;;  %s8582_s16 = inlined_call_operand.vmem [shape: f32[2,1,256], index: 16, kind: output, shape index: {1}]  }
   0x1   :  { %8685 = sst [smem:[#allocation72_spill]] %s8566_s0 }
   0x2   :  { %s8686_s23 = sld [smem:[#allocation72_spill]] }
   0x8   :  { %22 = sst [smem:[#allocation2]] %s8686_s23 }
   0x9 LB: > { %s4509_s25 = sadd.s32 4294967295, %s5383_s24   ;;  %p4513_p0 = scmp.ge.s32.totalorder %s5383_s24, 1  ;;  %s5383_s24 = sphi %s5475_s24, %s28_s24  }
   0xa   : > { %p466_p1 = scmp.lt.s32.totalorder %s5383_s24, 3 }
   0xc   : > { %p467_p2 = pnand %p4513_p0, %p466_p1 }
   0xe   : > { %470 = sbr.rel (%p467_p2) target bundleno = 2611 (0xa33), region = 80 }
  0x13   : > { %v566_v0 = vld [vmem:[%s8568_s2] sm:$0x3]  ;;  %vm696_vm0 = vcmask 1041408   ;;  %p519_p3 = scmp.lt.s32.totalorder %s4509_s25, 1  ;;  %vm647_vm1 = vcmask 31744   ;;  %v4820_v8 = vld [vmem:[%s8569_s3 + $0x18] sm:$0xff] }
  0x14   : > { %v698_v1 = vsel %vm696_vm0, %v566_v0, 0  ;;  %926 = vmatpush.bf16.msra.mxu1 %v4820_v8  ;;  %v4819_v10 = vld [vmem:[%s8569_s3 + $0x10] sm:$0xff]  ;;  %v4818_v12 = vld [vmem:[%s8569_s3 + $0x8] sm:$0xff]  ;;  %v4817_v13 = vld [vmem:[%s8569_s3] sm:$0xff]  ;;  %vm873_vm2 = vcmask 523264   ;;  %s533_s19 = sld [smem:[#allocation2]] }
  0x15   : > { %707 = vmatpush.bf16.msra.mxu0 %v698_v1  ;;  %s8935_s25 = smov (!%p519_p3, %s4509_s25), 1  ;;  %4843 = vmatpush.bf16.msra.mxu3 %v698_v1  ;;  %vm1937_vm5 = vcmask 261120   ;;  %s5386_s30 = smov 96  }
  0x16   : > { %s4800_s28 = sshll.u32 %s8935_s25, 7 }
  0x17   : > { %s5493_s0 = scalar_lea.vmem %s8567_s1, %s4800_s28  ;;  %s4516_s28 = sshll.u32 %s8935_s25, 1 }
  0x18   : > { %v5496_v2 = vld [vmem:[%s5493_s0] sm:$0xff]  ;;  %v5501_v3 = vld [vmem:[%s5493_s0 + $0x8] sm:$0xff]  ;;  %v5506_v4 = vld [vmem:[%s5493_s0 + $0x10] sm:$0xff]  ;;  %927 = vmatpush.bf16.msra.mxu1 %v4819_v10  ;;  %s5794_s18 = scalar_lea.vmem %s8582_s16, %s4516_s28  ;;  %s527_s21 = scalar_lea.vmem %s8581_s15, %s4516_s28 }
  0x19   : > { %4582 = vmatmul.msk.bf16.vlgmr.msra.gmra.mxu0 %vm647_vm1, %v5496_v2  ;;  %v5511_v5 = vld [vmem:[%s5493_s0 + $0x18] sm:$0xff]  ;;  %v5516_v6 = vld [vmem:[%s5493_s0 + $0x20] sm:$0xff]  ;;  %v5521_v7 = vld [vmem:[%s5493_s0 + $0x28] sm:$0xff] }
  0x1a   : > { %v5529_v9 = vld [vmem:[%s5493_s0 + $0x30] sm:$0xff]  ;;  %v5537_v11 = vld [vmem:[%s5493_s0 + $0x48] sm:$0xff]  ;;  %v5548_v14 = vld [vmem:[%s5493_s0 + $0x38] sm:$0xff] }
  0x1b   : > { %4591 = vmatmul.msk.bf16.vlgmr.msra.gmra.mxu3 %vm647_vm1, %v5537_v11  ;;  %v5551_v15 = vld [vmem:[%s5493_s0 + $0x50] sm:$0xff]  ;;  %v5558_v16 = vld [vmem:[%s5493_s0 + $0x40] sm:$0xff]  ;;  %v5561_v18 = vld [vmem:[%s5493_s0 + $0x58] sm:$0xff] }
  0x1c   : > { %928 = vmatpush.bf16.msra.mxu1 %v4818_v12  ;;  %v5569_v24 = vld [vmem:[%s5493_s0 + $0x60] sm:$0xff]  ;;  %v5575_v30 = vld [vmem:[%s5493_s0 + $0x68] sm:$0xff]  ;;  %v5581_v36 = vld [vmem:[%s5493_s0 + $0x70] sm:$0xff] }
  0x1d   : > { %v5587_v42 = vld [vmem:[%s5493_s0 + $0x78] sm:$0xff] }
  0x20   : > { %929 = vmatpush.bf16.msra.mxu1 %v4817_v13 }
  0x29   : > { %4583 = vmatmul.msk.bf16.gmra.mxu0 %vm647_vm1, %v5501_v3 }
  0x2b   : > { %4592 = vmatmul.msk.bf16.gmra.mxu3 %vm647_vm1, %v5551_v15 }
  0x39   : > { %4584 = vmatmul.msk.bf16.gmra.mxu0 %vm647_vm1, %v5506_v4 }
  0x3b   : > { %4593 = vmatmul.msk.bf16.gmra.mxu3 %vm647_vm1, %v5561_v18 }
  0x49   : > { %4585 = vmatmul.msk.bf16.gmra.mxu0 %vm647_vm1, %v5511_v5 }
  0x4b   : > { %4594 = vmatmul.msk.bf16.gmra.mxu3 %vm647_vm1, %v5569_v24 }
  0x59   : > { %4586 = vmatmul.msk.bf16.gmra.mxu0 %vm647_vm1, %v5516_v6 }
  0x5b   : > { %4595 = vmatmul.msk.bf16.gmra.mxu3 %vm647_vm1, %v5575_v30 }
  0x69   : > { %4587 = vmatmul.msk.bf16.gmra.mxu0 %vm647_vm1, %v5521_v7 }
  0x6b   : > { %4596 = vmatmul.msk.bf16.gmra.mxu3 %vm647_vm1, %v5581_v36 }
  0x79   : > { %4588 = vmatmul.msk.bf16.gmra.mxu0 %vm647_vm1, %v5529_v9 }
  0x7b   : > { %4597 = vmatmul.msk.bf16.gmra.mxu3 %vm647_vm1, %v5587_v42 }
  0x89   : > { %4589 = vmatmul.msk.bf16.gmra.mxu0 %vm647_vm1, %v5548_v14 }
  0x96   : > { %v709_v17 = vpop.f32.mrf.mxu0 }
  0x97   : > { %v789_v20 = vmax.f32 %v709_v17, 0.0 }
  0x99   : > { %4590 = vmatmul.msk.bf16.gmra.mxu0 %vm647_vm1, %v5558_v16 }
  0x9e   : > { %v711_v19 = vpop.f32.mrf.mxu0  ;;  %v754_v58 = vpop.f32.mrf.mxu3 }
  0x9f   : > { %v790_v21 = vmax.f32 %v711_v19, 0.0  ;;  %v5599_v19 = vld [vmem:[%s8570_s4] ss:$0 sm:$0xff] }
  0xa1   : > { %v821_v22 = vpack.c.bf16 %v790_v21, %v789_v20 }
  0xa3   : > { %4614 = vmatmul.msk.bf16.vlgmr.msra.gmra.mxu1 %vm873_vm2, %v821_v22 }
  0xa6   : > { %v714_v23 = vpop.f32.mrf.mxu0  ;;  %v756_v63 = vpop.f32.mrf.mxu3 }
  0xa7   : > { %v791_v26 = vmax.f32 %v714_v23, 0.0 }
  0xae   : > { %v716_v25 = vpop.f32.mrf.mxu0  ;;  %v759_v1 = vpop.f32.mrf.mxu3 }
  0xaf   : > { %v792_v27 = vmax.f32 %v716_v25, 0.0 }
  0xb1   : > { %v822_v28 = vpack.c.bf16 %v792_v27, %v791_v26  ;;  %v807_v26 = vmax.f32 %v754_v58, 0.0  ;;  %v808_v27 = vmax.f32 %v756_v63, 0.0 }
  0xb3   : > { %4615 = vmatmul.msk.bf16.gmra.mxu1 %vm873_vm2, %v822_v28 }
  0xb6   : > { %v719_v29 = vpop.f32.mrf.mxu0  ;;  %v761_v20 = vpop.f32.mrf.mxu3 }
  0xb7   : > { %v793_v32 = vmax.f32 %v719_v29, 0.0 }
  0xbe   : > { %v721_v31 = vpop.f32.mrf.mxu0  ;;  %v764_v29 = vpop.f32.mrf.mxu3 }
  0xbf   : > { %v794_v33 = vmax.f32 %v721_v31, 0.0  ;;  %v830_v31 = vpack.c.bf16 %v808_v27, %v807_v26 }
  0xc1   : > { %v823_v34 = vpack.c.bf16 %v794_v33, %v793_v32 }
  0xc3   : > { %4616 = vmatmul.msk.bf16.gmra.mxu1 %vm873_vm2, %v823_v34 }
  0xc6   : > { %v724_v35 = vpop.f32.mrf.mxu0 }
  0xc7   : > { %v795_v38 = vmax.f32 %v724_v35, 0.0 }
  0xce   : > { %v726_v37 = vpop.f32.mrf.mxu0 }
  0xcf   : > { %v796_v39 = vmax.f32 %v726_v37, 0.0  ;;  %v766_v37 = vpop.f32.mrf.mxu3 }
  0xd1   : > { %v824_v40 = vpack.c.bf16 %v796_v39, %v795_v38  ;;  %v809_v39 = vmax.f32 %v759_v1, 0.0 }
  0xd3   : > { %4617 = vmatmul.msk.bf16.gmra.mxu1 %vm873_vm2, %v824_v40  ;;  %v810_v40 = vmax.f32 %v761_v20, 0.0 }
  0xd6   : > { %v729_v41 = vpop.f32.mrf.mxu0 }
  0xd7   : > { %v797_v44 = vmax.f32 %v729_v41, 0.0 }
  0xde   : > { %v731_v43 = vpop.f32.mrf.mxu0 }
  0xdf   : > { %v798_v45 = vmax.f32 %v731_v43, 0.0  ;;  %v831_v43 = vpack.c.bf16 %v810_v40, %v809_v39 }
  0xe1   : > { %v825_v46 = vpack.c.bf16 %v798_v45, %v797_v44 }
  0xe3   : > { %4618 = vmatmul.msk.bf16.gmra.mxu1 %vm873_vm2, %v825_v46  ;;  %v769_v46 = vpop.f32.mrf.mxu3 }
  0xe6   : > { %v734_v47 = vpop.f32.mrf.mxu0 }
  0xe7   : > { %v799_v49 = vmax.f32 %v734_v47, 0.0 }
  0xee   : > { %v736_v48 = vpop.f32.mrf.mxu0 }
  0xef   : > { %v800_v50 = vmax.f32 %v736_v48, 0.0 }
  0xf1   : > { %v826_v51 = vpack.c.bf16 %v800_v50, %v799_v49  ;;  %v811_v50 = vmax.f32 %v764_v29, 0.0 }
  0xf3   : > { %4619 = vmatmul.msk.bf16.gmra.mxu1 %vm873_vm2, %v826_v51  ;;  %v812_v51 = vmax.f32 %v766_v37, 0.0 }
  0xf6   : > { %v739_v52 = vpop.f32.mrf.mxu0 }
  0xf7   : > { %v801_v54 = vmax.f32 %v739_v52, 0.0  ;;  %v771_v52 = vpop.f32.mrf.mxu3 }
  0xfe   : > { %v741_v53 = vpop.f32.mrf.mxu0 }
  0xff   : > { %v802_v55 = vmax.f32 %v741_v53, 0.0  ;;  %v774_v58 = vpop.f32.mrf.mxu3 }
 0x101   : > { %v827_v56 = vpack.c.bf16 %v802_v55, %v801_v54  ;;  %v832_v54 = vpack.c.bf16 %v812_v51, %v811_v50 }
 0x103   : > { %4620 = vmatmul.msk.bf16.gmra.mxu1 %vm873_vm2, %v827_v56 }
 0x106   : > { %v744_v57 = vpop.f32.mrf.mxu0 }
 0x107   : > { %v803_v60 = vmax.f32 %v744_v57, 0.0 }
 0x10e   : > { %v746_v59 = vpop.f32.mrf.mxu0 }
 0x10f   : > { %v804_v61 = vmax.f32 %v746_v59, 0.0 }
 0x111   : > { %v828_v62 = vpack.c.bf16 %v804_v61, %v803_v60  ;;  %v813_v61 = vmax.f32 %v769_v46, 0.0 }
 0x113   : > { %4621 = vmatmul.msk.bf16.gmra.mxu1 %vm873_vm2, %v828_v62  ;;  %v814_v62 = vmax.f32 %v771_v52, 0.0 }
 0x116   : > { %v749_v0 = vpop.f32.mrf.mxu0 }
 0x117   : > { %v805_v10 = vmax.f32 %v749_v0, 0.0  ;;  %v833_v0 = vpack.c.bf16 %v814_v62, %v813_v61 }
 0x11e   : > { %v751_v8 = vpop.f32.mrf.mxu0 }
 0x11f   : > { %v806_v12 = vmax.f32 %v751_v8, 0.0  ;;  %v776_v8 = vpop.f32.mrf.mxu3 }
 0x120   : > { %v931_v13 = vpop.f32.mrf.mxu1  ;;  %v816_v20 = vmax.f32 %v776_v8, 0.0 }
 0x121   : > { %v829_v17 = vpack.c.bf16 %v806_v12, %v805_v10  ;;  %v5602_v22 = vadd.f32 %v5599_v19, %v931_v13 }
 0x123   : > { %4622 = vmatmul.msk.bf16.gmra.mxu1 %vm873_vm2, %v829_v17  ;;  %v815_v17 = vmax.f32 %v774_v58, 0.0 }
 0x125   : > { %v834_v26 = vpack.c.bf16 %v816_v20, %v815_v17 }
 0x127   : > { %v779_v13 = vpop.f32.mrf.mxu3 }
 0x128   : > { %v933_v21 = vpop.f32.mrf.mxu1 }
 0x129   : > { %v5605_v23 = vadd.f32 %v5599_v19, %v933_v21 }
 0x12b   : > { %v1011_v25 = vadd.f32 %v5605_v23, %v5602_v22 }
 0x130   : > { %v936_v28 = vpop.f32.mrf.mxu1 }
 0x131   : > { %v5610_v32 = vadd.f32 %v5599_v19, %v936_v28 }
 0x133   : > { %v1012_v33 = vadd.f32 %v1011_v25, %v5610_v32  ;;  %4623 = vmatmul.msk.bf16.gmra.mxu1 %vm873_vm2, %v830_v31  ;;  %v781_v31 = vpop.f32.mrf.mxu3 }
 0x134   : > { %v818_v37 = vmax.f32 %v781_v31, 0.0 }
 0x138   : > { %v938_v34 = vpop.f32.mrf.mxu1 }
 0x139   : > { %v5615_v35 = vadd.f32 %v5599_v19, %v938_v34  ;;  %v817_v34 = vmax.f32 %v779_v13, 0.0 }
 0x13b   : > { %v1013_v38 = vadd.f32 %v1012_v33, %v5615_v35  ;;  %v784_v39 = vpop.f32.mrf.mxu3 }
 0x13c   : > { %v819_v50 = vmax.f32 %v784_v39, 0.0  ;;  %v1358_v39 = vld [vmem:[%s8571_s5] sm:$0x3] }
 0x140   : > { %v941_v41 = vpop.f32.mrf.mxu1 }
 0x141   : > { %v5619_v44 = vadd.f32 %v5599_v19, %v941_v41  ;;  %v835_v41 = vpack.c.bf16 %v818_v37, %v817_v34 }
 0x143   : > { %v1014_v45 = vadd.f32 %v1013_v38, %v5619_v44  ;;  %4624 = vmatmul.msk.bf16.gmra.mxu1 %vm873_vm2, %v831_v43 }
 0x148   : > { %v943_v47 = vpop.f32.mrf.mxu1 }
 0x149   : > { %v5624_v48 = vadd.f32 %v5599_v19, %v943_v47 }
 0x14b   : > { %v1015_v49 = vadd.f32 %v1014_v45, %v5624_v48 }
 0x150   : > { %v946_v53 = vpop.f32.mrf.mxu1 }
 0x151   : > { %v5628_v55 = vadd.f32 %v5599_v19, %v946_v53 }
 0x153   : > { %v1016_v56 = vadd.f32 %v1015_v49, %v5628_v55  ;;  %4625 = vmatmul.msk.bf16.gmra.mxu1 %vm873_vm2, %v832_v54  ;;  %v786_v49 = vpop.f32.mrf.mxu3 }
 0x154   : > { %v820_v51 = vmax.f32 %v786_v49, 0.0 }
 0x156   : > { %v836_v54 = vpack.c.bf16 %v820_v51, %v819_v50 }
 0x158   : > { %v948_v57 = vpop.f32.mrf.mxu1 }
 0x159   : > { %v5633_v59 = vadd.f32 %v5599_v19, %v948_v57 }
 0x15b   : > { %v1017_v60 = vadd.f32 %v1016_v56, %v5633_v59 }
 0x160   : > { %v951_v63 = vpop.f32.mrf.mxu1 }
 0x161   : > { %v5637_v1 = vadd.f32 %v5599_v19, %v951_v63 }
 0x163   : > { %v1018_v10 = vadd.f32 %v1017_v60, %v5637_v1  ;;  %4626 = vmatmul.msk.bf16.gmra.mxu1 %vm873_vm2, %v833_v0 }
 0x168   : > { %v953_v12 = vpop.f32.mrf.mxu1 }
 0x169   : > { %v5642_v21 = vadd.f32 %v5599_v19, %v953_v12 }
 0x16b   : > { %v1019_v27 = vadd.f32 %v1018_v10, %v5642_v21 }
 0x170   : > { %v956_v25 = vpop.f32.mrf.mxu1 }
 0x171   : > { %v5646_v28 = vadd.f32 %v5599_v19, %v956_v25 }
 0x173   : > { %v1020_v29 = vadd.f32 %v1019_v27, %v5646_v28  ;;  %4627 = vmatmul.msk.bf16.gmra.mxu1 %vm873_vm2, %v834_v26 }
 0x178   : > { %v958_v33 = vpop.f32.mrf.mxu1 }
 0x179   : > { %v5651_v38 = vadd.f32 %v5599_v19, %v958_v33 }
 0x17b   : > { %v1021_v43 = vadd.f32 %v1020_v29, %v5651_v38 }
 0x180   : > { %v961_v40 = vpop.f32.mrf.mxu1 }
 0x181   : > { %v5655_v45 = vadd.f32 %v5599_v19, %v961_v40  ;;  %v1360_v40 = vsel %vm696_vm0, %v1358_v39, 0 }
 0x182   : > { %1369 = vmatpush.bf16.msrb.mxu1 %v1360_v40  ;;  %4844 = vmatpush.bf16.msra.mxu2 %v1360_v40 }
 0x183   : > { %v1022_v46 = vadd.f32 %v1021_v43, %v5655_v45  ;;  %4628 = vmatmul.msk.bf16.gmra.mxu1 %vm873_vm2, %v835_v41 }
 0x185   : > { %4637 = vmatmul.msk.bf16.vlgmr.msra.gmra.mxu2 %vm647_vm1, %v5548_v14 }
 0x188   : > { %v963_v47 = vpop.f32.mrf.mxu1 }
 0x189   : > { %v5660_v52 = vadd.f32 %v5599_v19, %v963_v47 }
 0x18b   : > { %v1023_v56 = vadd.f32 %v1022_v46, %v5660_v52 }
 0x190   : > { %v966_v53 = vpop.f32.mrf.mxu1 }
 0x191   : > { %v5664_v57 = vadd.f32 %v5599_v19, %v966_v53 }
 0x193   : > { %v1024_v58 = vadd.f32 %v1023_v56, %v5664_v57  ;;  %4629 = vmatmul.msk.bf16.gmra.mxu1 %vm873_vm2, %v836_v54 }
 0x195   : > { %4638 = vmatmul.msk.bf16.gmra.mxu2 %vm647_vm1, %v5558_v16 }
 0x198   : > { %v968_v60 = vpop.f32.mrf.mxu1 }
 0x199   : > { %v5669_v61 = vadd.f32 %v5599_v19, %v968_v60 }
 0x19b   : > { %v1025_v63 = vadd.f32 %v1024_v58, %v5669_v61  ;;  %v5385_v58 = vmov 256.0  }
 0x19c   : > { %4857 = vrcp.f32 %v5385_v58  ;;  %v1356_v58 = vld [vmem:[%s8577_s11] sm:$0x1] }
 0x1a0   : > { %v971_v62 = vpop.f32.mrf.mxu1 }
 0x1a1   : > { %v5673_v0 = vadd.f32 %v5599_v19, %v971_v62 }
 0x1a3   : > { %v1026_v8 = vadd.f32 %v1025_v63, %v5673_v0  ;;  %4630 = vmatmul.msk.bf16.vlgmr.msrb.gmra.mxu1 %vm647_vm1, %v5496_v2 }
 0x1a5   : > { %4639 = vmatmul.msk.bf16.gmra.mxu2 %vm647_vm1, %v5537_v11 }
 0x1a8   : > { %v973_v10 = vpop.f32.mrf.mxu1 }
 0x1a9   : > { %v5677_v12 = vadd.f32 %v5599_v19, %v973_v10 }
 0x1ab   : > { %v1027_v17 = vadd.f32 %v1026_v8, %v5677_v12  ;;  %v4824_v8 = vld [vmem:[%s8572_s6 + $0x18] sm:$0xff] }
 0x1ac   : > { %1587 = vmatpush.bf16.msrb.mxu3 %v4824_v8 }
 0x1b0   : > { %v976_v13 = vpop.f32.mrf.mxu1 }
 0x1b1   : > { %v5681_v20 = vadd.f32 %v5599_v19, %v976_v13 }
 0x1b3   : > { %v1028_v25 = vadd.f32 %v1027_v17, %v5681_v20  ;;  %4631 = vmatmul.msk.bf16.gmra.mxu1 %vm647_vm1, %v5501_v3  ;;  %v4858_v17 = vpop.eup %4857 }
 0x1b4   : > { %vm1053_vm3 = vweird.f32 %v4858_v17 }
 0x1b5   : > { %4640 = vmatmul.msk.bf16.gmra.mxu2 %vm647_vm1, %v5551_v15 }
 0x1b8   : > { %v978_v26 = vpop.f32.mrf.mxu1 }
 0x1b9   : > { %v5685_v27 = vadd.f32 %v5599_v19, %v978_v26 }
 0x1bb   : > { %v1029_v31 = vadd.f32 %v1028_v25, %v5685_v27 }
 0x1c0   : > { %v981_v29 = vpop.f32.mrf.mxu1 }
 0x1c1   : > { %v5689_v33 = vadd.f32 %v5599_v19, %v981_v29 }
 0x1c3   : > { %v1030_v34 = vadd.f32 %v1029_v31, %v5689_v33  ;;  %4632 = vmatmul.msk.bf16.gmra.mxu1 %vm647_vm1, %v5506_v4  ;;  %v1049_v31 = vmul.f32 256.0, %v4858_v17 }
 0x1c5   : > { %4641 = vmatmul.msk.bf16.gmra.mxu2 %vm647_vm1, %v5561_v18  ;;  %v1050_v40 = vsub.f32 1.0, %v1049_v31 }
 0x1c8   : > { %v983_v37 = vpop.f32.mrf.mxu1 }
 0x1c9   : > { %v5713_v3 = vadd.f32 %v5599_v19, %v983_v37 }
 0x1cb   : > { %v1031_v16 = vadd.f32 %v1030_v34, %v5713_v3 }
 0x1d0   : > { %v986_v41 = vpop.f32.mrf.mxu1 }
 0x1d1   : > { %v5716_v14 = vadd.f32 %v5599_v19, %v986_v41 }
 0x1d3   : > { %4633 = vmatmul.msk.bf16.gmra.mxu1 %vm647_vm1, %v5511_v5  ;;  %v1032_v51 = vadd.f32 %v1031_v16, %v5716_v14 }
 0x1d5   : > { %4642 = vmatmul.msk.bf16.gmra.mxu2 %vm647_vm1, %v5569_v24  ;;  %v4822_v24 = vld [vmem:[%s8572_s6 + $0x8] sm:$0xff] }
 0x1d8   : > { %v988_v43 = vpop.f32.mrf.mxu1 }
 0x1d9   : > { %v5720_v4 = vadd.f32 %v5599_v19, %v988_v43 }
 0x1db   : > { %v1033_v5 = vadd.f32 %v1032_v51, %v5720_v4 }
 0x1e0   : > { %v991_v46 = vpop.f32.mrf.mxu1 }
 0x1e1   : > { %v5724_v53 = vadd.f32 %v5599_v19, %v991_v46  ;;  %v1051_v46 = vmul.f32 %v4858_v17, %v1050_v40 }
 0x1e3   : > { %v1034_v54 = vadd.f32 %v1033_v5, %v5724_v53  ;;  %4634 = vmatmul.msk.bf16.gmra.mxu1 %vm647_vm1, %v5516_v6  ;;  %v4823_v5 = vld [vmem:[%s8572_s6 + $0x10] sm:$0xff] }
 0x1e4   : > { %1588 = vmatpush.bf16.msrb.mxu3 %v4823_v5 }
 0x1e5   : > { %4643 = vmatmul.msk.bf16.gmra.mxu2 %vm647_vm1, %v5575_v30  ;;  %v4419_v30 = vlaneseq }
 0x1e7   : > { %vm5796_vm4 = vcmp.lt.s32.totalorder %v4419_v30, 128 }
 0x1e8   : > { %v993_v47 = vpop.f32.mrf.mxu1  ;;  %1589 = vmatpush.bf16.msrb.mxu3 %v4822_v24 }
 0x1e9   : > { %v5728_v15 = vadd.f32 %v5599_v19, %v993_v47 }
 0x1eb   : > { %v1035_v60 = vadd.f32 %v1034_v54, %v5728_v15 }
 0x1f0   : > { %v996_v49 = vpop.f32.mrf.mxu1 }
 0x1f1   : > { %v5732_v56 = vadd.f32 %v5599_v19, %v996_v49 }
 0x1f3   : > { %v1036_v10 = vadd.f32 %v1035_v60, %v5732_v56  ;;  %4635 = vmatmul.msk.bf16.gmra.mxu1 %vm647_vm1, %v5521_v7  ;;  %v1354_v7 = vld [vmem:[%s8576_s10] sm:$0x1] }
 0x1f5   : > { %4644 = vmatmul.msk.bf16.gmra.mxu2 %vm647_vm1, %v5581_v36 }
 0x1f8   : > { %v998_v2 = vpop.f32.mrf.mxu1 }
 0x1f9   : > { %v5736_v62 = vadd.f32 %v5599_v19, %v998_v2  ;;  %v1052_v2 = vadd.f32 %v4858_v17, %v1051_v46 }
 0x1fb   : > { %v1037_v25 = vadd.f32 %v1036_v10, %v5736_v62 }
 0x200   : > { %v1001_v50 = vpop.f32.mrf.mxu1 }
 0x201   : > { %v5747_v13 = vadd.f32 %v5599_v19, %v1001_v50 }
 0x203   : > { %v1038_v6 = vadd.f32 %v1037_v25, %v5747_v13  ;;  %4636 = vmatmul.msk.bf16.gmra.mxu1 %vm647_vm1, %v5529_v9  ;;  %v4821_v9 = vld [vmem:[%s8572_s6] sm:$0xff] }
 0x204   : > { %1590 = vmatpush.bf16.msrb.mxu3 %v4821_v9 }
 0x205   : > { %4645 = vmatmul.msk.bf16.gmra.mxu2 %vm647_vm1, %v5587_v42 }
 0x208   : > { %v1003_v11 = vpop.f32.mrf.mxu1 }
 0x209   : > { %v5751_v26 = vadd.f32 %v5599_v19, %v1003_v11 }
 0x20b   : > { %v1039_v18 = vadd.f32 %v1038_v6, %v5751_v26 }
 0x210   : > { %v1006_v63 = vpop.f32.mrf.mxu1 }
 0x211   : > { %v5755_v29 = vadd.f32 %v5599_v19, %v1006_v63  ;;  %v8688_v63 = vmov 0 }
 0x212   : > { %v8689_v63 = vsel %vm5796_vm4, 4294967295, %v8688_v63 }
 0x213   : > { %v1040_v37 = vadd.f32 %v1039_v18, %v5755_v29  ;;  %8690 = vst [vmem:[#allocation4_spill] sm:$0xff] %v8689_v63 }
 0x218   : > { %v1008_v34 = vpop.f32.mrf.mxu1 }
 0x219   : > { %v5760_v39 = vadd.f32 %v5599_v19, %v1008_v34  ;;  %v1054_v19 = vsel %vm1053_vm3, %v4858_v17, %v1052_v2 }
 0x21b   : > { %v1041_v41 = vadd.f32 %v1040_v37, %v5760_v39 }
 0x21d   : > { %v1042_v43 = vrot.slane %v1041_v41, 4 }
 0x21f   : > { %v1043_v47 = vadd.f32 %v1042_v43, %v1041_v41 }
 0x220   : > { %v1371_v8 = vpop.f32.mrf.mxu1 }
 0x221   : > { %v1044_v49 = vrot.slane %v1043_v47, 2  ;;  %v1451_v10 = vmax.f32 %v1371_v8, 0.0 }
 0x223   : > { %v1045_v50 = vadd.f32 %v1044_v49, %v1043_v47 }
 0x225   : > { %v1046_v16 = vrot.slane %v1045_v50, 1 }
 0x227   : > { %v1047_v11 = vadd.f32 %v1046_v16, %v1045_v50 }
 0x228   : > { %v1373_v17 = vpop.f32.mrf.mxu1 }
 0x229   : > { %v1055_v51 = vmul.f32 %v1054_v19, %v1047_v11  ;;  %v1452_v25 = vmax.f32 %v1373_v17, 0.0 }
 0x22b   : > { %1056 = vmax.xlane.f32.xlu0 %v1055_v51  ;;  %v1355_v54 = vmul.f32 %v1354_v7, %v1055_v51  ;;  %v1483_v6 = vpack.c.bf16 %v1452_v25, %v1451_v10 }
 0x22d   : > { %v5784_v60 = vadd.f32 %v1356_v58, %v1355_v54  ;;  %4662 = vmatmul.msk.bf16.vlgmr.msrb.gmra.mxu3 %vm873_vm2, %v1483_v6 }
 0x22f   : > { %8687 = vst [vmem:[#allocation3_spill] sm:$0xff] %v5784_v60 }
 0x230   : > { %4423 = vst.msk [vmem:[%s5794_s18] sm:$0x1] %vm5796_vm4, %v5784_v60  ;;  %v1376_v31 = vpop.f32.mrf.mxu1 }
 0x231   : > { %v1453_v18 = vmax.f32 %v1376_v31, 0.0  ;;  %v1406_v31 = vpop.f32.mrf.mxu2 }
 0x238   : > { %v1378_v34 = vpop.f32.mrf.mxu1 }
 0x239   : > { %v1454_v37 = vmax.f32 %v1378_v34, 0.0  ;;  %v1408_v34 = vpop.f32.mrf.mxu2 }
 0x23b   : > { %v1484_v40 = vpack.c.bf16 %v1454_v37, %v1453_v18 }
 0x23d   : > { %4663 = vmatmul.msk.bf16.gmra.mxu3 %vm873_vm2, %v1484_v40 }
 0x240   : > { %v1381_v41 = vpop.f32.mrf.mxu1 }
 0x241   : > { %v1455_v43 = vmax.f32 %v1381_v41, 0.0 }
 0x248   : > { %v1383_v36 = vpop.f32.mrf.mxu1 }
 0x249   : > { %v1456_v46 = vmax.f32 %v1383_v36, 0.0  ;;  %v1465_v36 = vmax.f32 %v1406_v31, 0.0 }
 0x24b   : > { %v1485_v47 = vpack.c.bf16 %v1456_v46, %v1455_v43  ;;  %v1466_v46 = vmax.f32 %v1408_v34, 0.0 }
 0x24d   : > { %4664 = vmatmul.msk.bf16.gmra.mxu3 %vm873_vm2, %v1485_v47  ;;  %v1490_v47 = vpack.c.bf16 %v1466_v46, %v1465_v36 }
 0x250   : > { %v1386_v42 = vpop.f32.mrf.mxu1 }
 0x251   : > { %v1457_v49 = vmax.f32 %v1386_v42, 0.0 }
 0x258   : > { %v1388_v2 = vpop.f32.mrf.mxu1 }
 0x259   : > { %v1458_v50 = vmax.f32 %v1388_v2, 0.0 }
 0x25b   : > { %v1486_v16 = vpack.c.bf16 %v1458_v50, %v1457_v49 }
 0x25d   : > { %4665 = vmatmul.msk.bf16.gmra.mxu3 %vm873_vm2, %v1486_v16 }
 0x260   : > { %v1391_v19 = vpop.f32.mrf.mxu1 }
 0x261   : > { %v1459_v11 = vmax.f32 %v1391_v19, 0.0 }
 0x268   : > { %v1393_v5 = vpop.f32.mrf.mxu1 }
 0x269   : > { %v1460_v7 = vmax.f32 %v1393_v5, 0.0 }
 0x26b   : > { %v1487_v24 = vpack.c.bf16 %v1460_v7, %v1459_v11 }
 0x26d   : > { %4666 = vmatmul.msk.bf16.gmra.mxu3 %vm873_vm2, %v1487_v24 }
 0x270   : > { %v1396_v54 = vpop.f32.mrf.mxu1 }
 0x271   : > { %v1461_v8 = vmax.f32 %v1396_v54, 0.0 }
 0x278   : > { %v1398_v10 = vpop.f32.mrf.mxu1 }
 0x279   : > { %v1462_v17 = vmax.f32 %v1398_v10, 0.0 }
 0x27b   : > { %v1488_v25 = vpack.c.bf16 %v1462_v17, %v1461_v8 }
 0x27d   : > { %4667 = vmatmul.msk.bf16.gmra.mxu3 %vm873_vm2, %v1488_v25 }
 0x280   : > { %v1401_v18 = vpop.f32.mrf.mxu1 }
 0x281   : > { %v1463_v37 = vmax.f32 %v1401_v18, 0.0 }
 0x288   : > { %v1403_v40 = vpop.f32.mrf.mxu1 }
 0x289   : > { %v1464_v41 = vmax.f32 %v1403_v40, 0.0 }
 0x28b   : > { %v1489_v43 = vpack.c.bf16 %v1464_v41, %v1463_v37 }
 0x28d   : > { %4668 = vmatmul.msk.bf16.gmra.mxu3 %vm873_vm2, %v1489_v43 }
 0x29d   : > { %4669 = vmatmul.msk.bf16.gmra.mxu3 %vm873_vm2, %v1490_v47 }
 0x29e   : > { %v1057_v58 = vpop.xlane.xlu0 %1056 }
 0x29f   : > { %v1058_v9 = vsub.f32 %v1055_v51, %v1057_v58  ;;  %v1411_v51 = vpop.f32.mrf.mxu2 }
 0x2a0   : > { %v1467_v2 = vmax.f32 %v1411_v51, 0.0 }
 0x2a1   : > { %v1059_v30 = vmul.f32 1.442695, %v1058_v9 }
 0x2a3   : > { %4859 = vpow2.f32 %v1059_v30 }
 0x2a7   : > { %v1413_v42 = vpop.f32.mrf.mxu2 }
 0x2a8   : > { %v1468_v50 = vmax.f32 %v1413_v42, 0.0  ;;  %v5827_v42 = vstv %s533_s19 }
 0x2a9   : > { %v4860_v6 = vpop.eup %4859 }
 0x2aa   : > { %1061 = vadd.xlane.f32.xlu0 %v4860_v6  ;;  %v1491_v16 = vpack.c.bf16 %v1468_v50, %v1467_v2  ;;  %v1070_v2 = vsub.f32 %v5619_v44, %v5827_v42 }
 0x2ad   : > { %4670 = vmatmul.msk.bf16.gmra.mxu3 %vm873_vm2, %v1491_v16 }
 0x2af   : > { %v1416_v49 = vpop.f32.mrf.mxu2 }
 0x2b0   : > { %v1469_v11 = vmax.f32 %v1416_v49, 0.0  ;;  %v5819_v25 = vpop.f32.mrf.mxu3 }
 0x2b7   : > { %v1418_v19 = vpop.f32.mrf.mxu2 }
 0x2b8   : > { %v1470_v5 = vmax.f32 %v1418_v19, 0.0  ;;  %v5822_v37 = vpop.f32.mrf.mxu3  ;;  %v1068_v19 = vsub.f32 %v5610_v32, %v5827_v42  ;;  %v1094_v32 = vsub.f32 %v5747_v13, %v5827_v42  ;;  %v1092_v13 = vsub.f32 %v5732_v56, %v5827_v42 }
 0x2ba   : > { %v1492_v24 = vpack.c.bf16 %v1470_v5, %v1469_v11  ;;  %v1066_v11 = vsub.f32 %v5602_v22, %v5827_v42  ;;  %v1073_v22 = vsub.f32 %v5633_v59, %v5827_v42  ;;  %v1096_v59 = vsub.f32 %v5755_v29, %v5827_v42 }
 0x2bd   : > { %4671 = vmatmul.msk.bf16.gmra.mxu3 %vm873_vm2, %v1492_v24 }
 0x2bf   : > { %v1421_v7 = vpop.f32.mrf.mxu2 }
 0x2c0   : > { %v1471_v58 = vmax.f32 %v1421_v7, 0.0  ;;  %v5824_v36 = vpop.f32.mrf.mxu3 }
 0x2c7   : > { %v1423_v54 = vpop.f32.mrf.mxu2 }
 0x2c8   : > { %v1472_v9 = vmax.f32 %v1423_v54, 0.0  ;;  %v5831_v50 = vpop.f32.mrf.mxu3 }
 0x2ca   : > { %v1493_v30 = vpack.c.bf16 %v1472_v9, %v1471_v58  ;;  %v1069_v9 = vsub.f32 %v5615_v35, %v5827_v42 }
 0x2cd   : > { %4672 = vmatmul.msk.bf16.gmra.mxu3 %vm873_vm2, %v1493_v30 }
 0x2cf   : > { %v1426_v8 = vpop.f32.mrf.mxu2 }
 0x2d0   : > { %v1473_v10 = vmax.f32 %v1426_v8, 0.0  ;;  %v1090_v8 = vsub.f32 %v5724_v53, %v5827_v42 }
 0x2d7   : > { %v1428_v17 = vpop.f32.mrf.mxu2 }
 0x2d8   : > { %v1474_v31 = vmax.f32 %v1428_v17, 0.0  ;;  %v1097_v17 = vsub.f32 %v5760_v39, %v5827_v42 }
 0x2da   : > { %v1494_v18 = vpack.c.bf16 %v1474_v31, %v1473_v10  ;;  %v1089_v10 = vsub.f32 %v5720_v4, %v5827_v42  ;;  %v1095_v4 = vsub.f32 %v5751_v26, %v5827_v42  ;;  %v5880_v31 = vpop.f32.mrf.mxu3 }
 0x2dd   : > { %4673 = vmatmul.msk.bf16.gmra.mxu3 %vm873_vm2, %v1494_v18 }
 0x2df   : > { %v1431_v34 = vpop.f32.mrf.mxu2 }
 0x2e0   : > { %v1475_v40 = vmax.f32 %v1431_v34, 0.0 }
 0x2e7   : > { %v1433_v41 = vpop.f32.mrf.mxu2 }
 0x2e8   : > { %v1476_v43 = vmax.f32 %v1433_v41, 0.0 }
 0x2ea   : > { %v1495_v51 = vpack.c.bf16 %v1476_v43, %v1475_v40 }
 0x2ed   : > { %4674 = vmatmul.msk.bf16.gmra.mxu3 %vm873_vm2, %v1495_v51  ;;  %v1072_v51 = vsub.f32 %v5628_v55, %v5827_v42 }
 0x2ef   : > { %v1436_v47 = vpop.f32.mrf.mxu2 }
 0x2f0   : > { %v1477_v58 = vmax.f32 %v1436_v47, 0.0 }
 0x2f7   : > { %v1438_v5 = vpop.f32.mrf.mxu2 }
 0x2f8   : > { %v1478_v44 = vmax.f32 %v1438_v5, 0.0 }
 0x2fa   : > { %v1496_v30 = vpack.c.bf16 %v1478_v44, %v1477_v58 }
 0x2fd   : > { %4675 = vmatmul.msk.bf16.gmra.mxu3 %vm873_vm2, %v1496_v30 }
 0x2ff   : > { %v1441_v53 = vpop.f32.mrf.mxu2 }
 0x300   : > { %v1479_v47 = vmax.f32 %v1441_v53, 0.0 }
 0x31d   : > { %v1062_v46 = vpop.xlane.xlu0 %1061 }
 0x31e   : > { %4861 = vrcp.f32 %v1062_v46  ;;  %v1076_v46 = vsub.f32 %v5646_v28, %v5827_v42  ;;  %v1079_v28 = vsub.f32 %v5660_v52, %v5827_v42  ;;  %v1082_v52 = vsub.f32 %v5673_v0, %v5827_v42 }
 0x31f   : > { %v1085_v0 = vsub.f32 %v5685_v27, %v5827_v42  ;;  %v1084_v27 = vsub.f32 %v5681_v20, %v5827_v42  ;;  %v1087_v20 = vsub.f32 %v5713_v3, %v5827_v42  ;;  %v4831_v3 = vld [vmem:[%s8574_s8 + $0x30] sm:$0xff] }
 0x324   : > { %v4862_v49 = vpop.eup %4861 }
 0x325   : > { %v5833_v16 = vmul.f32 %v4862_v49, %v4860_v6  ;;  %v1067_v6 = vsub.f32 %v5605_v23, %v5827_v42  ;;  %v1093_v23 = vsub.f32 %v5736_v62, %v5827_v42  ;;  %v1071_v49 = vsub.f32 %v5624_v48, %v5827_v42 }
 0x326   : > { %v1075_v48 = vsub.f32 %v5642_v21, %v5827_v42  ;;  %v1078_v21 = vsub.f32 %v5655_v45, %v5827_v42 }
 0x327   : > { %v1102_v7 = vmul.f32 %v1070_v2, %v5833_v16  ;;  %v1100_v24 = vmul.f32 %v1068_v19, %v5833_v16  ;;  %v1098_v54 = vmul.f32 %v1066_v11, %v5833_v16  ;;  %v5864_v35 = vmul.f32 %v1094_v32, %v5833_v16  ;;  %v1443_v2 = vpop.f32.mrf.mxu2 }
 0x328   : > { %v5869_v39 = vmul.f32 %v1090_v8, %v5833_v16  ;;  %v5872_v62 = vmul.f32 %v1089_v10, %v5833_v16  ;;  %v5875_v56 = vmul.f32 %v1097_v17, %v5833_v16  ;;  %v5878_v29 = vmul.f32 %v1093_v23, %v5833_v16 }
 0x329   : > { %1138 = vadd.xlane.f32.xlu0 %v1102_v7  ;;  %1134 = vadd.xlane.f32.xlu2 %v1100_v24  ;;  %v1105_v18 = vmul.f32 %v1073_v22, %v5833_v16  ;;  %v1101_v34 = vmul.f32 %v1069_v9, %v5833_v16  ;;  %v5885_v26 = vmul.f32 %v1092_v13, %v5833_v16  ;;  %v1480_v5 = vmax.f32 %v1443_v2, 0.0  ;;  %v5903_v24 = vpop.f32.mrf.mxu3 }
 0x32a   : > { %1130 = vadd.xlane.f32.xlu1 %v1098_v54  ;;  %v5888_v40 = vmul.f32 %v1096_v59, %v5833_v16  ;;  %v1099_v41 = vmul.f32 %v1067_v6, %v5833_v16  ;;  %v5892_v43 = vmul.f32 %v1095_v4, %v5833_v16  ;;  %v1108_v19 = vmul.f32 %v1076_v46, %v5833_v16 }
 0x32b   : > { %v1104_v11 = vmul.f32 %v1072_v51, %v5833_v16  ;;  %v1103_v7 = vmul.f32 %v1071_v49, %v5833_v16  ;;  %v1497_v55 = vpack.c.bf16 %v1480_v5, %v1479_v47  ;;  %v1074_v54 = vsub.f32 %v5637_v1, %v5827_v42 }
 0x32c   : > { %v1111_v44 = vmul.f32 %v1079_v28, %v5833_v16  ;;  %v1107_v6 = vmul.f32 %v1075_v48, %v5833_v16  ;;  %v1077_v1 = vsub.f32 %v5651_v38, %v5827_v42  ;;  %v1114_v8 = vmul.f32 %v1082_v52, %v5833_v16 }
 0x32d   : > { %4676 = vmatmul.msk.bf16.gmra.mxu3 %vm873_vm2, %v1497_v55  ;;  %v1106_v32 = vmul.f32 %v1074_v54, %v5833_v16  ;;  %v1110_v10 = vmul.f32 %v1078_v21, %v5833_v16  ;;  %v1081_v38 = vsub.f32 %v5669_v61, %v5827_v42  ;;  %v1080_v59 = vsub.f32 %v5664_v57, %v5827_v42 }
 0x32e   : > { %v1109_v23 = vmul.f32 %v1077_v1, %v5833_v16  ;;  %v1117_v4 = vmul.f32 %v1085_v0, %v5833_v16  ;;  %v1088_v61 = vsub.f32 %v5716_v14, %v5827_v42  ;;  %v1091_v46 = vsub.f32 %v5728_v15, %v5827_v42  ;;  %v4830_v15 = vld [vmem:[%s8574_s8 + $0x28] sm:$0xff] }
 0x32f   : > { %v1446_v58 = vpop.f32.mrf.mxu2  ;;  %v1113_v53 = vmul.f32 %v1081_v38, %v5833_v16  ;;  %v1086_v14 = vsub.f32 %v5689_v33, %v5827_v42  ;;  %v1119_v47 = vmul.f32 %v1087_v20, %v5833_v16  ;;  %v4832_v33 = vld [vmem:[%s8574_s8 + $0x38] sm:$0xff] }
 0x330   : > { %v1481_v9 = vmax.f32 %v1446_v58, 0.0  ;;  %v1120_v57 = vmul.f32 %v1088_v61, %v5833_v16  ;;  %1784 = vmatpush.bf16.msrb.mxu0 %v4832_v33 }
 0x331   : > { %1144 = vadd.xlane.f32.xlu0 %v1105_v18  ;;  %1136 = vadd.xlane.f32.xlu2 %v1101_v34  ;;  %v5915_v22 = vpop.f32.mrf.mxu3  ;;  %v1112_v18 = vmul.f32 %v1080_v59, %v5833_v16  ;;  %v1083_v34 = vsub.f32 %v5677_v12, %v5827_v42  ;;  %v1123_v12 = vmul.f32 %v1091_v46, %v5833_v16  ;;  %v4829_v42 = vld [vmem:[%s8574_s8 + $0x20] sm:$0xff] }
 0x332   : > { %1132 = vadd.xlane.f32.xlu1 %v1099_v41  ;;  %v1116_v41 = vmul.f32 %v1084_v27, %v5833_v16  ;;  %v1118_v49 = vmul.f32 %v1086_v14, %v5833_v16  ;;  %v5991_v14 = vld [vmem:[%s8573_s7] ss:$0 sm:$0xff] }
 0x333   : > { %v1115_v51 = vmul.f32 %v1083_v34, %v5833_v16  ;;  %v4828_v16 = vld [vmem:[%s8574_s8 + $0x18] sm:$0xff] }
 0x334   : > { %1785 = vmatpush.bf16.msrb.mxu0 %v4831_v3 }
 0x337   : > { %v1448_v30 = vpop.f32.mrf.mxu2 }
 0x338   : > { %v1482_v17 = vmax.f32 %v1448_v30, 0.0  ;;  %1786 = vmatpush.bf16.msrb.mxu0 %v4830_v15 }
 0x339   : > { %1150 = vadd.xlane.f32.xlu0 %v1108_v19  ;;  %1142 = vadd.xlane.f32.xlu2 %v1104_v11  ;;  %v5926_v45 = vpop.f32.mrf.mxu3 }
 0x33a   : > { %1140 = vadd.xlane.f32.xlu1 %v1103_v7  ;;  %v1498_v13 = vpack.c.bf16 %v1482_v17, %v1481_v9 }
 0x33c   : > { %1787 = vmatpush.bf16.msrb.mxu0 %v4829_v42  ;;  %v1593_v42 = vadd.f32 %v5991_v14, %v5819_v25 }
 0x33d   : > { %4677 = vmatmul.msk.bf16.gmra.mxu3 %vm873_vm2, %v1498_v13 }
 0x340   : > { %1788 = vmatpush.bf16.msrb.mxu0 %v4828_v16 }
 0x341   : > { %1156 = vadd.xlane.f32.xlu0 %v1111_v44  ;;  %1148 = vadd.xlane.f32.xlu2 %v1107_v6 }
 0x342   : > { %1146 = vadd.xlane.f32.xlu1 %v1106_v32 }
 0x349   : > { %1162 = vadd.xlane.f32.xlu0 %v1114_v8  ;;  %1154 = vadd.xlane.f32.xlu2 %v1110_v10 }
 0x34a   : > { %1152 = vadd.xlane.f32.xlu1 %v1109_v23 }
 0x351   : > { %1168 = vadd.xlane.f32.xlu0 %v1117_v4  ;;  %1160 = vadd.xlane.f32.xlu2 %v1113_v53 }
 0x352   : > { %1158 = vadd.xlane.f32.xlu1 %v1112_v18 }
 0x359   : > { %1174 = vadd.xlane.f32.xlu0 %v1120_v57  ;;  %1166 = vadd.xlane.f32.xlu2 %v1116_v41 }
 0x35a   : > { %1164 = vadd.xlane.f32.xlu1 %v1115_v51 }
 0x361   : > { %1180 = vadd.xlane.f32.xlu0 %v1123_v12  ;;  %1172 = vadd.xlane.f32.xlu2 %v1119_v47 }
 0x362   : > { %1170 = vadd.xlane.f32.xlu1 %v1118_v49 }
 0x369   : > { %1186 = vadd.xlane.f32.xlu0 %v5864_v35  ;;  %1178 = vadd.xlane.f32.xlu2 %v5869_v39  ;;  %v4827_v35 = vld [vmem:[%s8574_s8 + $0x10] sm:$0xff] }
 0x36a   : > { %1176 = vadd.xlane.f32.xlu1 %v5872_v62  ;;  %1789 = vmatpush.bf16.msrb.mxu0 %v4827_v35  ;;  %v1595_v35 = vadd.f32 %v5991_v14, %v5822_v37 }
 0x371   : > { %1192 = vadd.xlane.f32.xlu0 %v5875_v56  ;;  %1184 = vadd.xlane.f32.xlu2 %v5878_v29  ;;  %v4826_v29 = vld [vmem:[%s8574_s8 + $0x8] sm:$0xff] }
 0x372   : > { %1182 = vadd.xlane.f32.xlu1 %v5885_v26  ;;  %1790 = vmatpush.bf16.msrb.mxu0 %v4826_v29 }
 0x379   : > { %1190 = vadd.xlane.f32.xlu2 %v5888_v40 }
 0x37a   : > { %1188 = vadd.xlane.f32.xlu1 %v5892_v43  ;;  %v4825_v43 = vld [vmem:[%s8574_s8] sm:$0xff] }
 0x37b   : > { %1791 = vmatpush.bf16.msrb.mxu0 %v4825_v43 }
 0x39c   : > { %v1139_v39 = vpop.xlane.xlu0 %1138  ;;  %v1135_v62 = vpop.xlane.xlu2 %1134 }
 0x39d   : > { %v1131_v56 = vpop.xlane.xlu1 %1130  ;;  %v1198_v2 = vsub.f32 0.0, %v1139_v39  ;;  %v1196_v19 = vsub.f32 0.0, %v1135_v62 }
 0x39e   : > { %v1194_v26 = vsub.f32 0.0, %v1131_v56 }
 0x39f   : > { %v1234_v48 = vmul.f32 1.442695, %v1198_v2  ;;  %v1230_v54 = vmul.f32 1.442695, %v1196_v19 }
 0x3a0   : > { %v1226_v40 = vmul.f32 1.442695, %v1194_v26 }
 0x3a2   : > { %4863 = vpow2.f32 %v1226_v40 }
 0x3a3   : > { %4865 = vpow2.f32 %v1234_v48 }
 0x3a4   : > { %v1145_v11 = vpop.xlane.xlu0 %1144  ;;  %v1137_v5 = vpop.xlane.xlu2 %1136  ;;  %4867 = vpow2.f32 %v1230_v54 }
 0x3a5   : > { %v1197_v7 = vsub.f32 0.0, %v1137_v5  ;;  %v1133_v55 = vpop.xlane.xlu1 %1132  ;;  %v1201_v58 = vsub.f32 0.0, %v1145_v11 }
 0x3a6   : > { %v1195_v28 = vsub.f32 0.0, %v1133_v55 }
 0x3a7   : > { %v1232_v44 = vmul.f32 1.442695, %v1197_v7  ;;  %v1240_v9 = vmul.f32 1.442695, %v1201_v58 }
 0x3a8   : > { %v1228_v6 = vmul.f32 1.442695, %v1195_v28  ;;  %v4864_v32 = vpop.eup %4863 }
 0x3a9   : > { %4869 = vpow2.f32 %v1232_v44  ;;  %v1290_v8 = vadd.f32 1.0, %v4864_v32  ;;  %v4866_v13 = vpop.eup %4865 }
 0x3aa   : > { %4871 = vpow2.f32 %v1228_v6  ;;  %v4868_v0 = vpop.eup %4867  ;;  %v1294_v53 = vadd.f32 1.0, %v4866_v13  ;;  %v6005_v6 = vpop.f32.mrf.mxu3 }
 0x3ab   : > { %4873 = vpow2.f32 %v1240_v9  ;;  %v1292_v61 = vadd.f32 1.0, %v4868_v0 }
 0x3ac   : > { %v1151_v21 = vpop.xlane.xlu0 %1150  ;;  %v1143_v52 = vpop.xlane.xlu2 %1142  ;;  %4875 = vrcp.f32 %v1290_v8 }
 0x3ad   : > { %v1200_v1 = vsub.f32 0.0, %v1143_v52  ;;  %v1141_v30 = vpop.xlane.xlu1 %1140  ;;  %v1204_v38 = vsub.f32 0.0, %v1151_v21 }
 0x3ae   : > { %v1199_v10 = vsub.f32 0.0, %v1141_v30 }
 0x3af   : > { %v1238_v17 = vmul.f32 1.442695, %v1200_v1  ;;  %v4870_v59 = vpop.eup %4869  ;;  %v1246_v51 = vmul.f32 1.442695, %v1204_v38 }
 0x3b0   : > { %v1236_v23 = vmul.f32 1.442695, %v1199_v10  ;;  %v4872_v4 = vpop.eup %4871  ;;  %v1293_v12 = vadd.f32 1.0, %v4870_v59 }
 0x3b1   : > { %4877 = vpow2.f32 %v1238_v17  ;;  %v1291_v34 = vadd.f32 1.0, %v4872_v4  ;;  %v4874_v20 = vpop.eup %4873 }
 0x3b2   : > { %4879 = vpow2.f32 %v1236_v23  ;;  %v4876_v47 = vpop.eup %4875  ;;  %v1297_v39 = vadd.f32 1.0, %v4874_v20 }
 0x3b3   : > { %4881 = vrcp.f32 %v1291_v34  ;;  %v5997_v19 = vmul.f32 %v4876_v47, %v1593_v42 }
 0x3b4   : > { %v1157_v18 = vpop.xlane.xlu0 %1156  ;;  %v1149_v27 = vpop.xlane.xlu2 %1148  ;;  %4883 = vrcp.f32 %v1294_v53 }
 0x3b5   : > { %v1203_v57 = vsub.f32 0.0, %v1149_v27  ;;  %v1147_v41 = vpop.xlane.xlu1 %1146  ;;  %4885 = vrcp.f32 %v1292_v61  ;;  %v1207_v62 = vsub.f32 0.0, %v1157_v18  ;;  %8691 = vst [vmem:[#allocation5_spill] sm:$0xff] %v5997_v19  ;;  %v1600_v27 = vadd.f32 %v5991_v14, %v5831_v50 }
 0x3b6   : > { %v1202_v46 = vsub.f32 0.0, %v1147_v41  ;;  %4887 = vpow2.f32 %v1246_v51 }
 0x3b7   : > { %v1244_v49 = vmul.f32 1.442695, %v1203_v57  ;;  %v4878_v33 = vpop.eup %4877  ;;  %4889 = vrcp.f32 %v1293_v12  ;;  %v1252_v54 = vmul.f32 1.442695, %v1207_v62 }
 0x3b8   : > { %v4880_v3 = vpop.eup %4879  ;;  %v1242_v15 = vmul.f32 1.442695, %v1202_v46  ;;  %v1296_v40 = vadd.f32 1.0, %v4878_v33  ;;  %v1598_v46 = vadd.f32 %v5991_v14, %v5824_v36  ;;  %v6021_v33 = vpop.f32.mrf.mxu3 }
 0x3b9   : > { %v1295_v16 = vadd.f32 1.0, %v4880_v3  ;;  %4891 = vpow2.f32 %v1244_v49  ;;  %v4882_v26 = vpop.eup %4881 }
 0x3ba   : > { %v5999_v11 = vpop.eup %4883  ;;  %v4255_v25 = vadd.f32 %v4882_v26, %v4876_v47  ;;  %v6001_v7 = vmul.f32 %v4882_v26, %v1595_v35 }
 0x3bb   : > { %4893 = vrcp.f32 %v1295_v16  ;;  %v4886_v37 = vpop.eup %4885 }
 0x3bc   : > { %v1163_v56 = vpop.xlane.xlu0 %1162  ;;  %v1155_v29 = vpop.xlane.xlu2 %1154  ;;  %4895 = vpow2.f32 %v1242_v15  ;;  %8692 = vst [vmem:[#allocation6_spill] sm:$0xff] %v6001_v7  ;;  %v4256_v48 = vadd.f32 %v4886_v37, %v4255_v25  ;;  %v1704_v58 = vpack.c.bf16 %v6001_v7, %v5997_v19 }
 0x3bd   : > { %v1206_v43 = vsub.f32 0.0, %v1155_v29  ;;  %v1153_v2 = vpop.xlane.xlu1 %1152  ;;  %v4888_v28 = vpop.eup %4887  ;;  %4897 = vrcp.f32 %v1296_v40  ;;  %v1210_v8 = vsub.f32 0.0, %v1163_v56  ;;  %v6027_v56 = vmul.f32 %v4886_v37, %v1598_v46 }
 0x3be   : > { %v1205_v5 = vsub.f32 0.0, %v1153_v2  ;;  %v4890_v44 = vpop.eup %4889  ;;  %4899 = vrcp.f32 %v1297_v39  ;;  %1792 = vmatmul.bf16.vlgmr.msrb.gmra.mxu0 %v1704_v58  ;;  %v1300_v59 = vadd.f32 1.0, %v4888_v28 }
 0x3bf   : > { %v1250_v55 = vmul.f32 1.442695, %v1206_v43  ;;  %v4892_v21 = vpop.eup %4891  ;;  %v4257_v52 = vadd.f32 %v4890_v44, %v4256_v48  ;;  %v1258_v41 = vmul.f32 1.442695, %v1210_v8  ;;  %v6023_v50 = vmul.f32 %v4890_v44, %v1600_v27  ;;  %8694 = vst [vmem:[#allocation8_spill] sm:$0xff] %v6027_v56 }
 0x3c0   : > { %v1248_v32 = vmul.f32 1.442695, %v1205_v5  ;;  %v1299_v23 = vadd.f32 1.0, %v4892_v21 }
 0x3c1   : > { %v6007_v9 = vpop.eup %4893  ;;  %4901 = vpow2.f32 %v1250_v55  ;;  %v4258_v30 = vadd.f32 %v5999_v11, %v4257_v52  ;;  %8693 = vst [vmem:[#allocation7_spill] sm:$0xff] %v6023_v50  ;;  %v1705_v28 = vpack.c.bf16 %v6023_v50, %v6027_v56 }
 0x3c2   : > { %v4896_v1 = vpop.eup %4895  ;;  %4903 = vpow2.f32 %v1252_v54 }
 0x3c3   : > { %v1298_v13 = vadd.f32 1.0, %v4896_v1  ;;  %4905 = vpow2.f32 %v1248_v32  ;;  %v4259_v4 = vadd.f32 %v6007_v9, %v4258_v30  ;;  %v6011_v18 = vpop.eup %4897 }
 0x3c4   : > { %v1169_v10 = vpop.xlane.xlu0 %1168  ;;  %v1161_v17 = vpop.xlane.xlu2 %1160 }
 0x3c5   : > { %v1209_v0 = vsub.f32 0.0, %v1161_v17  ;;  %v1159_v38 = vpop.xlane.xlu1 %1158  ;;  %4907 = vrcp.f32 %v1298_v13  ;;  %v6015_v34 = vpop.eup %4899  ;;  %v4260_v57 = vadd.f32 %v6011_v18, %v4259_v4  ;;  %v1213_v42 = vsub.f32 0.0, %v1169_v10 }
 0x3c6   : > { %v1208_v53 = vsub.f32 0.0, %v1159_v38  ;;  %4909 = vrcp.f32 %v1299_v23  ;;  %v6040_v10 = vpop.f32.mrf.mxu3 }
 0x3c7   : > { %v1256_v61 = vmul.f32 1.442695, %v1209_v0  ;;  %v4902_v51 = vpop.eup %4901  ;;  %4911 = vrcp.f32 %v1300_v59  ;;  %v4261_v47 = vadd.f32 %v6015_v34, %v4260_v57  ;;  %v1264_v55 = vmul.f32 1.442695, %v1213_v42 }
 0x3c8   : > { %v1254_v20 = vmul.f32 1.442695, %v1208_v53  ;;  %v4904_v12 = vpop.eup %4903  ;;  %v1302_v3 = vadd.f32 1.0, %v4902_v51 }
 0x3c9   : > { %v4906_v49 = vpop.eup %4905  ;;  %4913 = vpow2.f32 %v1256_v61  ;;  %v1303_v29 = vadd.f32 1.0, %v4904_v12  ;;  %v1605_v61 = vadd.f32 %v5991_v14, %v5903_v24  ;;  %v1603_v12 = vadd.f32 %v5991_v14, %v5880_v31 }
 0x3ca   : > { %4915 = vpow2.f32 %v1258_v41  ;;  %v1301_v15 = vadd.f32 1.0, %v4906_v49 }
 0x3cb   : > { %v6025_v39 = vpop.eup %4907  ;;  %4917 = vpow2.f32 %v1254_v20 }
 0x3cc   : > { %v1175_v16 = vpop.xlane.xlu0 %1174  ;;  %v1167_v35 = vpop.xlane.xlu2 %1166  ;;  %v4262_v26 = vadd.f32 %v6025_v39, %v4261_v47  ;;  %4919 = vrcp.f32 %v1301_v15 }
 0x3cd   : > { %v1212_v36 = vsub.f32 0.0, %v1167_v35  ;;  %v1165_v62 = vpop.xlane.xlu1 %1164  ;;  %v6030_v43 = vpop.eup %4909  ;;  %4921 = vrcp.f32 %v1302_v3  ;;  %v1216_v1 = vsub.f32 0.0, %v1175_v16  ;;  %v6056_v16 = vmul.f32 %v6007_v9, %v1605_v61 }
 0x3ce   : > { %v1211_v40 = vsub.f32 0.0, %v1165_v62  ;;  %v6032_v25 = vpop.eup %4911  ;;  %v4263_v5 = vadd.f32 %v6030_v43, %v4262_v26  ;;  %4923 = vrcp.f32 %v1303_v29  ;;  %1797 = vmatmul.bf16.gmra.mxu0 %v1705_v28 }
 0x3cf   : > { %v1262_v2 = vmul.f32 1.442695, %v1212_v36  ;;  %v4914_v48 = vpop.eup %4913  ;;  %v1270_v57 = vmul.f32 1.442695, %v1216_v1  ;;  %8695 = vst [vmem:[#allocation9_spill] sm:$0xff] %v6056_v16 }
 0x3d0   : > { %v1260_v37 = vmul.f32 1.442695, %v1211_v40  ;;  %v4916_v54 = vpop.eup %4915  ;;  %v4264_v58 = vadd.f32 %v6032_v25, %v4263_v5  ;;  %v1305_v21 = vadd.f32 1.0, %v4914_v48  ;;  %v6062_v5 = vmul.f32 %v5999_v11, %v1603_v12 }
 0x3d1   : > { %v4918_v44 = vpop.eup %4917  ;;  %4925 = vpow2.f32 %v1262_v2  ;;  %v1306_v38 = vadd.f32 1.0, %v4916_v54 }
 0x3d2   : > { %v6038_v32 = vpop.eup %4919  ;;  %4927 = vpow2.f32 %v1264_v55  ;;  %v1304_v52 = vadd.f32 1.0, %v4918_v44  ;;  %8696 = vst [vmem:[#allocation10_spill] sm:$0xff] %v6062_v5  ;;  %v6064_v55 = vpop.f32.mrf.mxu3 }
 0x3d3   : > { %v4265_v17 = vadd.f32 %v6038_v32, %v4264_v58  ;;  %4929 = vpow2.f32 %v1260_v37  ;;  %v6043_v0 = vpop.eup %4921  ;;  %v1706_v37 = vpack.c.bf16 %v6056_v16, %v6062_v5 }
 0x3d4   : > { %v1181_v30 = vpop.xlane.xlu0 %1180  ;;  %v1173_v8 = vpop.xlane.xlu2 %1172  ;;  %4931 = vrcp.f32 %v1304_v52 }
 0x3d5   : > { %v1215_v23 = vsub.f32 0.0, %v1173_v8  ;;  %v1171_v13 = vpop.xlane.xlu1 %1170  ;;  %v4266_v4 = vadd.f32 %v6043_v0, %v4265_v17  ;;  %v6046_v27 = vpop.eup %4923  ;;  %4933 = vrcp.f32 %v1305_v21  ;;  %v1219_v47 = vsub.f32 0.0, %v1181_v30 }
 0x3d6   : > { %v1214_v59 = vsub.f32 0.0, %v1171_v13  ;;  %4935 = vrcp.f32 %v1306_v38 }
 0x3d7   : > { %v1268_v53 = vmul.f32 1.442695, %v1215_v23  ;;  %v4926_v41 = vpop.eup %4925  ;;  %v4267_v51 = vadd.f32 %v6046_v27, %v4266_v4  ;;  %v1276_v40 = vmul.f32 1.442695, %v1219_v47 }
 0x3d8   : > { %v1266_v46 = vmul.f32 1.442695, %v1214_v59  ;;  %v4928_v20 = vpop.eup %4927  ;;  %v1308_v15 = vadd.f32 1.0, %v4926_v41 }
 0x3d9   : > { %v4930_v49 = vpop.eup %4929  ;;  %4937 = vpow2.f32 %v1268_v53  ;;  %v1309_v35 = vadd.f32 1.0, %v4928_v20  ;;  %v1608_v20 = vadd.f32 %v5991_v14, %v5915_v22 }
 0x3da   : > { %v6053_v3 = vpop.eup %4931  ;;  %4939 = vpow2.f32 %v1270_v57  ;;  %v1307_v42 = vadd.f32 1.0, %v4930_v49  ;;  %v6082_v49 = vpop.f32.mrf.mxu3 }
 0x3db   : > { %v4268_v36 = vadd.f32 %v6053_v3, %v4267_v51  ;;  %4941 = vpow2.f32 %v1266_v46  ;;  %v6059_v26 = vpop.eup %4933 }
 0x3dc   : > { %v1179_v24 = vpop.xlane.xlu2 %1178  ;;  %v1187_v62 = vpop.xlane.xlu0 %1186  ;;  %4943 = vrcp.f32 %v1307_v42 }
 0x3dd   : > { %v1218_v29 = vsub.f32 0.0, %v1179_v24  ;;  %v1177_v31 = vpop.xlane.xlu1 %1176  ;;  %v4269_v9 = vadd.f32 %v6059_v26, %v4268_v36  ;;  %v6067_v48 = vpop.eup %4935  ;;  %4945 = vrcp.f32 %v1308_v15  ;;  %v1222_v8 = vsub.f32 0.0, %v1187_v62 }
 0x3de   : > { %v1217_v2 = vsub.f32 0.0, %v1177_v31  ;;  %4947 = vrcp.f32 %v1309_v35  ;;  %1802 = vmatmul.bf16.gmra.mxu0 %v1706_v37  ;;  %v1610_v24 = vadd.f32 %v5991_v14, %v5926_v45 }
 0x3df   : > { %v1274_v28 = vmul.f32 1.442695, %v1218_v29  ;;  %v4938_v54 = vpop.eup %4937  ;;  %v4270_v58 = vadd.f32 %v6067_v48, %v4269_v9  ;;  %4949 = vpow2.f32 %v1276_v40  ;;  %v1282_v12 = vmul.f32 1.442695, %v1222_v8 }
 0x3e0   : > { %v1272_v44 = vmul.f32 1.442695, %v1217_v2  ;;  %v4940_v21 = vpop.eup %4939  ;;  %v1311_v1 = vadd.f32 1.0, %v4938_v54  ;;  %v6090_v2 = vmul.f32 %v6011_v18, %v1608_v20 }
 0x3e1   : > { %v4942_v11 = vpop.eup %4941  ;;  %4951 = vpow2.f32 %v1274_v28  ;;  %v1312_v4 = vadd.f32 1.0, %v4940_v21 }
 0x3e2   : > { %v6072_v52 = vpop.eup %4943  ;;  %v1310_v30 = vadd.f32 1.0, %v4942_v11  ;;  %4953 = vpow2.f32 %v1272_v44  ;;  %8697 = vst [vmem:[#allocation11_spill] sm:$0xff] %v6090_v2  ;;  %v6096_v44 = vmul.f32 %v6015_v34, %v1610_v24 }
 0x3e3   : > { %v4271_v23 = vadd.f32 %v6072_v52, %v4270_v58  ;;  %v6075_v59 = vpop.eup %4945 }
 0x3e4   : > { %v1185_v17 = vpop.xlane.xlu2 %1184  ;;  %4955 = vrcp.f32 %v1310_v30  ;;  %v6077_v61 = vpop.eup %4947  ;;  %8698 = vst [vmem:[#allocation12_spill] sm:$0xff] %v6096_v44  ;;  %v1707_v30 = vpack.c.bf16 %v6096_v44, %v6090_v2 }
 0x3e5   : > { %v1221_v13 = vsub.f32 0.0, %v1185_v17  ;;  %v1183_v38 = vpop.xlane.xlu1 %1182  ;;  %v4272_v57 = vadd.f32 %v6075_v59, %v4271_v23  ;;  %v1193_v41 = vpop.xlane.xlu0 %1192  ;;  %4957 = vrcp.f32 %v1311_v1 }
 0x3e6   : > { %v1220_v53 = vsub.f32 0.0, %v1183_v38  ;;  %v4950_v46 = vpop.eup %4949  ;;  %4959 = vrcp.f32 %v1312_v4  ;;  %v1225_v35 = vsub.f32 0.0, %v1193_v41 }
 0x3e7   : > { %v1280_v51 = vmul.f32 1.442695, %v1221_v13  ;;  %v4952_v47 = vpop.eup %4951  ;;  %v4273_v15 = vadd.f32 %v6077_v61, %v4272_v57  ;;  %v1315_v62 = vadd.f32 1.0, %v4950_v46  ;;  %v1624_v13 = vpop.f32.mrf.mxu3 }
 0x3e8   : > { %v1278_v42 = vmul.f32 1.442695, %v1220_v53  ;;  %v4954_v36 = vpop.eup %4953  ;;  %v1314_v22 = vadd.f32 1.0, %v4952_v47  ;;  %v1288_v54 = vmul.f32 1.442695, %v1225_v35 }
 0x3e9   : > { %4961 = vpow2.f32 %v1280_v51  ;;  %v1313_v31 = vadd.f32 1.0, %v4954_v36 }
 0x3ea   : > { %v6087_v29 = vpop.eup %4955  ;;  %4963 = vpow2.f32 %v1282_v12 }
 0x3eb   : > { %v4274_v9 = vadd.f32 %v6087_v29, %v4273_v15  ;;  %4965 = vpow2.f32 %v1278_v42  ;;  %v6093_v45 = vpop.eup %4957  ;;  %v1613_v15 = vadd.f32 %v5991_v14, %v6005_v6  ;;  %v1615_v42 = vadd.f32 %v5991_v14, %v6021_v33 }
 0x3ec   : > { %v1191_v40 = vpop.xlane.xlu2 %1190  ;;  %4967 = vrcp.f32 %v1313_v31  ;;  %v6099_v1 = vpop.eup %4959 }
 0x3ed   : > { %v1224_v28 = vsub.f32 0.0, %v1191_v40  ;;  %v1189_v37 = vpop.xlane.xlu1 %1188  ;;  %4969 = vrcp.f32 %v1315_v62  ;;  %v4275_v21 = vadd.f32 %v6093_v45, %v4274_v9  ;;  %v6120_v40 = vmul.f32 %v6025_v39, %v1613_v15 }
 0x3ee   : > { %v1223_v58 = vsub.f32 0.0, %v1189_v37  ;;  %4971 = vrcp.f32 %v1314_v22  ;;  %1807 = vmatmul.bf16.gmra.mxu0 %v1707_v30  ;;  %v6123_v9 = vmul.f32 %v6030_v43, %v1615_v42 }
 0x3ef   : > { %v1286_v11 = vmul.f32 1.442695, %v1224_v28  ;;  %v4962_v8 = vpop.eup %4961  ;;  %v4276_v17 = vadd.f32 %v6099_v1, %v4275_v21  ;;  %8699 = vst [vmem:[#allocation13_spill] sm:$0xff] %v6120_v40  ;;  %v1627_v6 = vpop.f32.mrf.mxu3 }
 0x3f0   : > { %v1284_v18 = vmul.f32 1.442695, %v1223_v58  ;;  %v4964_v23 = vpop.eup %4963  ;;  %v1317_v4 = vadd.f32 1.0, %v4962_v8  ;;  %8700 = vst [vmem:[#allocation14_spill] sm:$0xff] %v6123_v9  ;;  %v1708_v58 = vpack.c.bf16 %v6123_v9, %v6120_v40  ;;  %v1628_v15 = vadd.f32 %v5991_v14, %v1627_v6 }
 0x3f1   : > { %4973 = vpow2.f32 %v1286_v11  ;;  %v4966_v34 = vpop.eup %4965  ;;  %v1318_v46 = vadd.f32 1.0, %v4964_v23  ;;  %v1620_v23 = vadd.f32 %v5991_v14, %v6064_v55 }
 0x3f2   : > { %4975 = vpow2.f32 %v1288_v54  ;;  %v6104_v38 = vpop.eup %4967  ;;  %v1316_v53 = vadd.f32 1.0, %v4966_v34  ;;  %v1618_v34 = vadd.f32 %v5991_v14, %v6040_v10 }
 0x3f3   : > { %4977 = vpow2.f32 %v1284_v18  ;;  %v6106_v57 = vpop.eup %4969  ;;  %v4277_v41 = vadd.f32 %v6104_v38, %v4276_v17 }
 0x3f4   : > { %v6109_v51 = vpop.eup %4971  ;;  %4979 = vrcp.f32 %v1316_v53  ;;  %v6153_v53 = vmul.f32 %v6032_v25, %v1618_v34 }
 0x3f5   : > { %v4278_v12 = vadd.f32 %v6109_v51, %v4277_v41  ;;  %4981 = vrcp.f32 %v1317_v4  ;;  %v6150_v4 = vmul.f32 %v6038_v32, %v1620_v23 }
 0x3f6   : > { %4983 = vrcp.f32 %v1318_v46  ;;  %8703 = vst [vmem:[#allocation17_spill] sm:$0xff] %v6153_v53 }
 0x3f7   : > { %v4974_v20 = vpop.eup %4973  ;;  %v4279_v35 = vadd.f32 %v6106_v57, %v4278_v12  ;;  %v1629_v8 = vpop.f32.mrf.mxu3  ;;  %8702 = vst [vmem:[#allocation16_spill] sm:$0xff] %v6150_v4  ;;  %v1709_v41 = vpack.c.bf16 %v6150_v4, %v6153_v53  ;;  %v1625_v12 = vadd.f32 %v5991_v14, %v1624_v13 }
 0x3f8   : > { %v4976_v47 = vpop.eup %4975  ;;  %v1320_v36 = vadd.f32 1.0, %v4974_v20  ;;  %v1623_v20 = vadd.f32 %v5991_v14, %v6082_v49  ;;  %v1630_v42 = vadd.f32 %v5991_v14, %v1629_v8  ;;  %v6171_v49 = vmul.f32 %v6053_v3, %v1628_v15 }
 0x3f9   : > { %v4978_v24 = vpop.eup %4977  ;;  %v1321_v31 = vadd.f32 1.0, %v4976_v47  ;;  %v6164_v32 = vmul.f32 %v6046_v27, %v1625_v12 }
 0x3fa   : > { %v1319_v62 = vadd.f32 1.0, %v4978_v24  ;;  %v6117_v22 = vpop.eup %4979  ;;  %v6161_v47 = vmul.f32 %v6043_v0, %v1623_v20  ;;  %8706 = vst [vmem:[#allocation20_spill] sm:$0xff] %v6171_v49  ;;  %v6174_v13 = vmul.f32 %v6059_v26, %v1630_v42 }
 0x3fb   : > { %v4280_v33 = vadd.f32 %v6117_v22, %v4279_v35  ;;  %v6126_v28 = vpop.eup %4981  ;;  %8705 = vst [vmem:[#allocation19_spill] sm:$0xff] %v6164_v32 }
 0x3fc   : > { %4985 = vrcp.f32 %v1319_v62  ;;  %v6129_v54 = vpop.eup %4983  ;;  %8704 = vst [vmem:[#allocation18_spill] sm:$0xff] %v6161_v47  ;;  %v1710_v25 = vpack.c.bf16 %v6164_v32, %v6161_v47  ;;  %v1711_v27 = vpack.c.bf16 %v6174_v13, %v6171_v49 }
 0x3fd   : > { %4987 = vrcp.f32 %v1320_v36  ;;  %v4281_v37 = vadd.f32 %v6126_v28, %v4280_v33  ;;  %8707 = vst [vmem:[#allocation21_spill] sm:$0xff] %v6174_v13 }
 0x3fe   : > { %4989 = vrcp.f32 %v1321_v31  ;;  %1812 = vmatmul.bf16.gmra.mxu0 %v1708_v58 }
 0x3ff   : > { %v4282_v39 = vadd.f32 %v6129_v54, %v4281_v37  ;;  %v1632_v46 = vpop.f32.mrf.mxu3 }
 0x400   : > { %v1633_v36 = vadd.f32 %v5991_v14, %v1632_v46 }
 0x402   : > { %v6134_v21 = vpop.eup %4985  ;;  %v6184_v31 = vmul.f32 %v6067_v48, %v1633_v36 }
 0x403   : > { %v4283_v43 = vadd.f32 %v6134_v21, %v4282_v39  ;;  %v6137_v11 = vpop.eup %4987 }
 0x404   : > { %v6140_v30 = vpop.eup %4989  ;;  %8709 = vst [vmem:[#allocation23_spill] sm:$0xff] %v6184_v31 }
 0x405   : > { %v4284_v18 = vadd.f32 %v6137_v11, %v4283_v43 }
 0x407   : > { %v6143_v17 = vadd.f32 %v6140_v30, %v4284_v18  ;;  %v1634_v55 = vpop.f32.mrf.mxu3 }
 0x408   : > { %v1635_v24 = vadd.f32 %v5991_v14, %v1634_v55 }
 0x409   : > { %8701 = vst [vmem:[#allocation15_spill] sm:$0xff] %v6143_v17 }
 0x40a   : > { %v6181_v62 = vmul.f32 %v6072_v52, %v1635_v24 }
 0x40c   : > { %8708 = vst [vmem:[#allocation22_spill] sm:$0xff] %v6181_v62  ;;  %v1712_v26 = vpack.c.bf16 %v6181_v62, %v6184_v31 }
 0x40e   : > { %1817 = vmatmul.bf16.gmra.mxu0 %v1709_v41 }
 0x40f   : > { %v1637_v10 = vpop.f32.mrf.mxu3 }
 0x410   : > { %v1638_v37 = vadd.f32 %v5991_v14, %v1637_v10 }
 0x412   : > { %v6195_v39 = vmul.f32 %v6075_v59, %v1638_v37 }
 0x414   : > { %8710 = vst [vmem:[#allocation24_spill] sm:$0xff] %v6195_v39 }
 0x417   : > { %v1639_v0 = vpop.f32.mrf.mxu3 }
 0x418   : > { %v1640_v58 = vadd.f32 %v5991_v14, %v1639_v0 }
 0x41a   : > { %v6198_v48 = vmul.f32 %v6077_v61, %v1640_v58 }
 0x41c   : > { %8711 = vst [vmem:[#allocation25_spill] sm:$0xff] %v6198_v48  ;;  %v1713_v18 = vpack.c.bf16 %v6198_v48, %v6195_v39 }
 0x41e   : > { %1822 = vmatmul.bf16.gmra.mxu0 %v1710_v25 }
 0x41f   : > { %v1642_v35 = vpop.f32.mrf.mxu3 }
 0x420   : > { %v1643_v34 = vadd.f32 %v5991_v14, %v1642_v35 }
 0x422   : > { %v6209_v59 = vmul.f32 %v6087_v29, %v1643_v34 }
 0x424   : > { %8712 = vst [vmem:[#allocation26_spill] sm:$0xff] %v6209_v59 }
 0x427   : > { %v1644_v6 = vpop.f32.mrf.mxu3 }
 0x428   : > { %v1645_v41 = vadd.f32 %v5991_v14, %v1644_v6 }
 0x42a   : > { %v6212_v46 = vmul.f32 %v6093_v45, %v1645_v41 }
 0x42c   : > { %8713 = vst [vmem:[#allocation27_spill] sm:$0xff] %v6212_v46  ;;  %v1714_v20 = vpack.c.bf16 %v6212_v46, %v6209_v59 }
 0x42e   : > { %1827 = vmatmul.bf16.gmra.mxu0 %v1711_v27 }
 0x42f   : > { %v1647_v52 = vpop.f32.mrf.mxu3 }
 0x430   : > { %v1648_v10 = vadd.f32 %v5991_v14, %v1647_v52 }
 0x432   : > { %v6226_v45 = vmul.f32 %v6099_v1, %v1648_v10 }
 0x434   : > { %8715 = vst [vmem:[#allocation29_spill] sm:$0xff] %v6226_v45 }
 0x437   : > { %v1649_v8 = vpop.f32.mrf.mxu3 }
 0x438   : > { %v1650_v25 = vadd.f32 %v5991_v14, %v1649_v8 }
 0x43a   : > { %v6223_v29 = vmul.f32 %v6104_v38, %v1650_v25 }
 0x43b   : > { %v6186_v3 = vpop.f32.mrf.mxu0 }
 0x43c   : > { %8714 = vst [vmem:[#allocation28_spill] sm:$0xff] %v6223_v29  ;;  %v1715_v0 = vpack.c.bf16 %v6223_v29, %v6226_v45 }
 0x43e   : > { %1832 = vmatmul.bf16.gmra.mxu0 %v1712_v26 }
 0x43f   : > { %v1652_v12 = vpop.f32.mrf.mxu3 }
 0x440   : > { %v1653_v35 = vadd.f32 %v5991_v14, %v1652_v12 }
 0x442   : > { %v6237_v26 = vmul.f32 %v6109_v51, %v1653_v35 }
 0x443   : > { %v6190_v33 = vpop.f32.mrf.mxu0 }
 0x444   : > { %8716 = vst [vmem:[#allocation30_spill] sm:$0xff] %v6237_v26 }
 0x447   : > { %v1654_v15 = vpop.f32.mrf.mxu3 }
 0x448   : > { %v1655_v36 = vadd.f32 %v5991_v14, %v1654_v15 }
 0x44a   : > { %v6240_v38 = vmul.f32 %v6106_v57, %v1655_v36 }
 0x44b   : > { %v6200_v43 = vpop.f32.mrf.mxu0 }
 0x44c   : > { %8717 = vst [vmem:[#allocation31_spill] sm:$0xff] %v6240_v38  ;;  %v1716_v37 = vpack.c.bf16 %v6240_v38, %v6237_v26 }
 0x44e   : > { %1837 = vmatmul.bf16.gmra.mxu0 %v1713_v18 }
 0x44f   : > { %v1657_v27 = vpop.f32.mrf.mxu3 }
 0x450   : > { %v1658_v52 = vadd.f32 %v5991_v14, %v1657_v27 }
 0x452   : > { %v6251_v51 = vmul.f32 %v6117_v22, %v1658_v52 }
 0x453   : > { %v6204_v23 = vpop.f32.mrf.mxu0 }
 0x454   : > { %8718 = vst [vmem:[#allocation32_spill] sm:$0xff] %v6251_v51 }
 0x457   : > { %v1659_v1 = vpop.f32.mrf.mxu3 }
 0x458   : > { %v1660_v18 = vadd.f32 %v5991_v14, %v1659_v1 }
 0x45a   : > { %v6254_v57 = vmul.f32 %v6126_v28, %v1660_v18 }
 0x45b   : > { %v6214_v61 = vpop.f32.mrf.mxu0 }
 0x45c   : > { %8719 = vst [vmem:[#allocation33_spill] sm:$0xff] %v6254_v57 }
 0x45e   : > { %1842 = vmatmul.bf16.gmra.mxu0 %v1714_v20  ;;  %v1717_v20 = vpack.c.bf16 %v6254_v57, %v6251_v51 }
 0x45f   : > { %v1662_v8 = vpop.f32.mrf.mxu3 }
 0x463   : > { %v6218_v55 = vpop.f32.mrf.mxu0 }
 0x467   : > { %v1664_v25 = vpop.f32.mrf.mxu3 }
 0x468   : > { %v1665_v15 = vadd.f32 %v5991_v14, %v1664_v25 }
 0x46a   : > { %v6271_v36 = vmul.f32 %v6134_v21, %v1665_v15 }
 0x46b   : > { %v6228_v42 = vpop.f32.mrf.mxu0 }
 0x46c   : > { %8720 = vst [vmem:[#allocation34_spill] sm:$0xff] %v6271_v36  ;;  %v6382_v13 = vmax.f32 %v6228_v42, 0.0 }
 0x46e   : > { %1847 = vmatmul.bf16.gmra.mxu0 %v1715_v0  ;;  %v1663_v0 = vadd.f32 %v5991_v14, %v1662_v8 }
 0x46f   : > { %v1667_v1 = vpop.f32.mrf.mxu3 }
 0x470   : > { %v1668_v25 = vadd.f32 %v5991_v14, %v1667_v1 }
 0x472   : > { %v6290_v15 = vmul.f32 %v6137_v11, %v1668_v25 }
 0x473   : > { %v6232_v24 = vpop.f32.mrf.mxu0 }
 0x474   : > { %8722 = vst [vmem:[#allocation36_spill] sm:$0xff] %v6290_v15 }
 0x477   : > { %v1669_v21 = vpop.f32.mrf.mxu3 }
 0x47b   : > { %v6242_v6 = vpop.f32.mrf.mxu0 }
 0x47c   : > { %v6423_v56 = vmax.f32 %v6242_v6, 0.0 }
 0x47e   : > { %1852 = vmatmul.bf16.gmra.mxu0 %v1716_v37  ;;  %v6274_v37 = vmul.f32 %v6129_v54, %v1663_v0  ;;  %v1670_v54 = vadd.f32 %v5991_v14, %v1669_v21 }
 0x480   : > { %8721 = vst [vmem:[#allocation35_spill] sm:$0xff] %v6274_v37 }
 0x483   : > { %v6246_v58 = vpop.f32.mrf.mxu0 }
 0x48b   : > { %v1818_v34 = vpop.f32.mrf.mxu0 }
 0x48c   : > { %v6256_v41 = vmax.f32 %v1818_v34, 0.0  ;;  %v1718_v34 = vpack.c.bf16 %v6271_v36, %v6274_v37 }
 0x48e   : > { %1857 = vmatmul.bf16.gmra.mxu0 %v1717_v20  ;;  %v1915_v12 = vmul.f32 %v6256_v41, %v6256_v41 }
 0x490   : > { %v1968_v10 = vsel %vm1937_vm5, %v1915_v12, 0.0 }
 0x491   : > { %1969 = vadd.xlane.f32.xlu0 %v1968_v10 }
 0x493   : > { %v1820_v22 = vpop.f32.mrf.mxu0 }
 0x494   : > { %v6264_v28 = vmax.f32 %v1820_v22, 0.0 }
 0x496   : > { %v1916_v27 = vmul.f32 %v6264_v28, %v6264_v28 }
 0x498   : > { %v1971_v35 = vsel %vm1937_vm5, %v1916_v27, 0.0  ;;  %v6294_v27 = vmul.f32 %v6140_v30, %v1670_v54 }
 0x499   : > { %1972 = vadd.xlane.f32.xlu1 %v1971_v35 }
 0x49a   : > { %8723 = vst [vmem:[#allocation37_spill] sm:$0xff] %v6294_v27  ;;  %v1719_v1 = vpack.c.bf16 %v6294_v27, %v6290_v15 }
 0x49b   : > { %v1823_v52 = vpop.f32.mrf.mxu0 }
 0x49c   : > { %v6276_v18 = vmax.f32 %v1823_v52, 0.0 }
 0x49e   : > { %1862 = vmatmul.bf16.gmra.mxu0 %v1718_v34  ;;  %v1917_v8 = vmul.f32 %v6276_v18, %v6276_v18 }
 0x4a0   : > { %v1974_v20 = vsel %vm1937_vm5, %v1917_v8, 0.0 }
 0x4a1   : > { %1975 = vadd.xlane.f32.xlu2 %v1974_v20 }
 0x4a3   : > { %v1825_v12 = vpop.f32.mrf.mxu0 }
 0x4a4   : > { %v6284_v10 = vmax.f32 %v1825_v12, 0.0 }
 0x4a6   : > { %v1918_v22 = vmul.f32 %v6284_v10, %v6284_v10 }
 0x4a8   : > { %v1977_v0 = vsel %vm1937_vm5, %v1918_v22, 0.0 }
 0x4a9   : > { %1978 = vadd.xlane.f32.xlu0 %v1977_v0 }
 0x4ab   : > { %v1828_v35 = vpop.f32.mrf.mxu0 }
 0x4ac   : > { %v6296_v52 = vmax.f32 %v1828_v35, 0.0 }
 0x4ae   : > { %1867 = vmatmul.bf16.gmra.mxu0 %v1719_v1  ;;  %v1919_v14 = vmul.f32 %v6296_v52, %v6296_v52 }
 0x4b0   : > { %v1980_v34 = vsel %vm1937_vm5, %v1919_v14, 0.0 }
 0x4b1   : > { %1981 = vadd.xlane.f32.xlu1 %v1980_v34 }
 0x4b3   : > { %v1830_v11 = vpop.f32.mrf.mxu0 }
 0x4b4   : > { %v6303_v8 = vmax.f32 %v1830_v11, 0.0 }
 0x4b6   : > { %v1920_v30 = vmul.f32 %v6303_v8, %v6303_v8 }
 0x4b8   : > { %v1983_v20 = vsel %vm1937_vm5, %v1920_v30, 0.0 }
 0x4b9   : > { %1984 = vadd.xlane.f32.xlu2 %v1983_v20 }
 0x4bb   : > { %v6308_v21 = vpop.f32.mrf.mxu0 }
 0x4c3   : > { %v6310_v12 = vpop.f32.mrf.mxu0 }
 0x4cb   : > { %v6312_v25 = vpop.f32.mrf.mxu0 }
 0x4d3   : > { %v6314_v54 = vpop.f32.mrf.mxu0 }
 0x4db   : > { %v6316_v22 = vpop.f32.mrf.mxu0 }
 0x4e3   : > { %v6318_v0 = vpop.f32.mrf.mxu0 }
 0x4eb   : > { %v6320_v35 = vpop.f32.mrf.mxu0 }
 0x4f3   : > { %v6322_v1 = vpop.f32.mrf.mxu0 }
 0x4fb   : > { %v6324_v14 = vpop.f32.mrf.mxu0 }
 0x503   : > { %v6326_v34 = vpop.f32.mrf.mxu0 }
 0x504   : > { %v1970_v27 = vpop.xlane.xlu0 %1969 }
 0x50b   : > { %v1858_v11 = vpop.f32.mrf.mxu0 }
 0x50c   : > { %v6328_v30 = vmax.f32 %v1858_v11, 0.0  ;;  %v1973_v36 = vpop.xlane.xlu1 %1972 }
 0x50d   : > { %v6346_v45 = vmax.f32 %v1973_v36, 1e-24 }
 0x50e   : > { %v1931_v20 = vmul.f32 %v6328_v30, %v6328_v30 }
 0x510   : > { %v2016_v60 = vsel %vm1937_vm5, %v1931_v20, 0.0 }
 0x511   : > { %2017 = vadd.xlane.f32.xlu2 %v2016_v60 }
 0x513   : > { %v1860_v63 = vpop.f32.mrf.mxu0 }
 0x514   : > { %v1976_v51 = vpop.xlane.xlu2 %1975  ;;  %v6387_v32 = vmax.f32 %v1860_v63, 0.0 }
 0x515   : > { %v6339_v17 = vmax.f32 %v1976_v51, 1e-24 }
 0x517   : > { %vm2192_vm15 = vweird.f32 %v6339_v17 }
 0x51b   : > { %v1863_v15 = vpop.f32.mrf.mxu0 }
 0x51c   : > { %v6333_v37 = vmax.f32 %v1863_v15, 0.0  ;;  %v1979_v57 = vpop.xlane.xlu0 %1978 }
 0x51d   : > { %v6335_v38 = vmax.f32 %v1979_v57, 1e-24  ;;  %v6348_v57 = vmax.f32 %v1970_v27, 1e-24 }
 0x51e   : > { %v1933_v11 = vmul.f32 %v6333_v37, %v6333_v37 }
 0x51f   : > { %4991 = vrsqrt.f32 %v6335_v38  ;;  %vm2202_vm12 = vweird.f32 %v6335_v38 }
 0x520   : > { %v2022_v26 = vsel %vm1937_vm5, %v1933_v11, 0.0  ;;  %4993 = vrsqrt.f32 %v6339_v17  ;;  %v6355_v11 = vmax.f32 %v6246_v58, 0.0 }
 0x521   : > { %2023 = vadd.xlane.f32.xlu1 %v2022_v26 }
 0x522   : > { %v1914_v39 = vmul.f32 %v6355_v11, %v6355_v11 }
 0x523   : > { %v1865_v60 = vpop.f32.mrf.mxu0 }
 0x524   : > { %v6344_v20 = vmax.f32 %v1865_v60, 0.0  ;;  %v1982_v15 = vpop.xlane.xlu1 %1981 }
 0x525   : > { %v2048_v29 = vmax.f32 %v1982_v15, 1e-24  ;;  %v6352_v46 = vpop.eup %4991 }
 0x526   : > { %v1934_v51 = vmul.f32 %v6344_v20, %v6344_v20  ;;  %v6358_v59 = vpop.eup %4993  ;;  %v2197_v36 = vmul.f32 %v6352_v46, %v6335_v38  ;;  %vm2203_vm9 = vweird.f32 %v6352_v46 }
 0x527   : > { %4995 = vrsqrt.f32 %v2048_v29  ;;  %v2187_v58 = vmul.f32 %v6358_v59, %v6339_v17  ;;  %vm2212_vm7 = vweird.f32 %v2048_v29  ;;  %vm2193_vm11 = vweird.f32 %v6358_v59  ;;  %vm6438_vm13 = vmor %vm2202_vm12, %vm2203_vm9 }
 0x528   : > { %v2025_v26 = vsel %vm1937_vm5, %v1934_v51, 0.0  ;;  %4997 = vrsqrt.f32 %v6346_v45  ;;  %v2198_v62 = vmul.f32 %v6352_v46, %v2197_v36  ;;  %v1965_v36 = vsel %vm1937_vm5, %v1914_v39, 0.0  ;;  %vm6455_vm1 = vmor %vm2192_vm15, %vm2193_vm11 }
 0x529   : > { %2026 = vadd.xlane.f32.xlu2 %v2025_v26  ;;  %4999 = vrsqrt.f32 %v6348_v57  ;;  %v2188_v47 = vmul.f32 %v6358_v59, %v2187_v58  ;;  %v1911_v39 = vmul.f32 %v6382_v13, %v6382_v13 }
 0x52a   : > { %v2199_v42 = vmul.f32 0.5, %v2198_v62 }
 0x52b   : > { %v1868_v27 = vpop.f32.mrf.mxu0  ;;  %v2189_v58 = vmul.f32 0.5, %v2188_v47 }
 0x52c   : > { %v6364_v60 = vmax.f32 %v1868_v27, 0.0  ;;  %v1985_v15 = vpop.xlane.xlu2 %1984 }
 0x52d   : > { %v6366_v48 = vpop.eup %4995  ;;  %v6370_v51 = vmax.f32 %v1985_v15, 1e-24  ;;  %v2190_v5 = vsub.f32 1.5, %v2189_v58 }
 0x52e   : > { %v2207_v26 = vmul.f32 %v6366_v48, %v2048_v29  ;;  %v1935_v27 = vmul.f32 %v6364_v60, %v6364_v60  ;;  %v6379_v31 = vpop.eup %4997  ;;  %vm2213_vm6 = vweird.f32 %v6366_v48 }
 0x52f   : > { %5001 = vrsqrt.f32 %v6370_v51  ;;  %v6385_v49 = vpop.eup %4999  ;;  %v2177_v9 = vmul.f32 %v6379_v31, %v6346_v45  ;;  %vm6415_vm8 = vmor %vm2212_vm7, %vm2213_vm6  ;;  %vm2222_vm14 = vweird.f32 %v6370_v51  ;;  %vm2183_vm2 = vweird.f32 %v6379_v31 }
 0x530   : > { %v2208_v15 = vmul.f32 %v6366_v48, %v2207_v26  ;;  %v2028_v4 = vsel %vm1937_vm5, %v1935_v27, 0.0  ;;  %v2167_v26 = vmul.f32 %v6385_v49, %v6348_v57  ;;  %v1932_v27 = vmul.f32 %v6387_v32, %v6387_v32 }
 0x531   : > { %1966 = vadd.xlane.f32.xlu2 %v1965_v36  ;;  %2029 = vadd.xlane.f32.xlu0 %v2028_v4  ;;  %v6412_v36 = vmax.f32 %v6324_v14, 0.0  ;;  %vm2173_vm3 = vweird.f32 %v6385_v49  ;;  %vm2182_vm6 = vweird.f32 %v6346_v45  ;;  %v6493_v45 = vmax.f32 %v6204_v23, 0.0 }
 0x532   : > { %v2209_v53 = vmul.f32 0.5, %v2208_v15  ;;  %v6406_v15 = vmax.f32 %v6322_v1, 0.0  ;;  %v2168_v16 = vmul.f32 %v6385_v49, %v2167_v26  ;;  %v1956_v1 = vsel %vm1937_vm5, %v1911_v39, 0.0  ;;  %vm6480_vm7 = vmor %vm2182_vm6, %vm2183_vm2 }
 0x533   : > { %v1870_v40 = vpop.f32.mrf.mxu0  ;;  %v1929_v6 = vmul.f32 %v6412_v36, %v6412_v36 }
 0x534   : > { %v2210_v44 = vsub.f32 1.5, %v2209_v53  ;;  %v6396_v63 = vmax.f32 %v1870_v40, 0.0  ;;  %v2178_v40 = vmul.f32 %v6379_v31, %v2177_v9  ;;  %v2200_v53 = vsub.f32 1.5, %v2199_v42 }
 0x535   : > { %v5002_v2 = vpop.eup %5001  ;;  %v2019_v9 = vsel %vm1937_vm5, %v1932_v27, 0.0  ;;  %v1928_v39 = vmul.f32 %v6406_v15, %v6406_v15  ;;  %v2169_v27 = vmul.f32 0.5, %v2168_v16  ;;  %v1913_v16 = vmul.f32 %v6423_v56, %v6423_v56 }
 0x536   : > { %v2211_v4 = vmul.f32 %v6366_v48, %v2210_v44  ;;  %v2217_v62 = vmul.f32 %v5002_v2, %v6370_v51  ;;  %v1936_v47 = vmul.f32 %v6396_v63, %v6396_v63  ;;  %v2179_v26 = vmul.f32 0.5, %v2178_v40 }
 0x537   : > { %v2201_v58 = vmul.f32 %v6352_v46, %v2200_v53  ;;  %vm2223_vm10 = vweird.f32 %v5002_v2  ;;  %v6446_v40 = vmax.f32 %v6232_v24, 0.0  ;;  %v6453_v53 = vmax.f32 %v6316_v22, 0.0 }
 0x538   : > { %v2218_v44 = vmul.f32 %v5002_v2, %v2217_v62  ;;  %v2031_v42 = vsel %vm1937_vm5, %v1936_v47, 0.0  ;;  %v2215_v29 = vsel %vm6415_vm8, %v6366_v48, %v2211_v4  ;;  %v2191_v47 = vmul.f32 %v6358_v59, %v2190_v5  ;;  %vm2224_vm0 = vmor %vm2222_vm14, %vm2223_vm10 }
 0x539   : > { %1957 = vadd.xlane.f32.xlu2 %v1956_v1  ;;  %2020 = vadd.xlane.f32.xlu0 %v2019_v9  ;;  %v2400_v50 = vmul.f32 %v2215_v29, %v6296_v52  ;;  %v2180_v5 = vsub.f32 1.5, %v2179_v26  ;;  %v2205_v38 = vsel %vm6438_vm13, %v6352_v46, %v2201_v58  ;;  %v2007_v51 = vsel %vm1937_vm5, %v1928_v39, 0.0 }
 0x53a   : > { %v2219_v14 = vmul.f32 0.5, %v2218_v44  ;;  %2032 = vadd.xlane.f32.xlu1 %v2031_v42  ;;  %v2010_v24 = vsel %vm1937_vm5, %v1929_v6, 0.0  ;;  %v2170_v9 = vsub.f32 1.5, %v2169_v27  ;;  %v2195_v46 = vsel %vm6455_vm1, %v6358_v59, %v2191_v47 }
 0x53b   : > { %v2432_v42 = vpack.c.bf16 %v2400_v50, %v2400_v50  ;;  %v6466_v22 = vmax.f32 %v6326_v34, 0.0  ;;  %v2399_v29 = vmul.f32 %v2205_v38, %v6284_v10  ;;  %v2181_v26 = vmul.f32 %v6379_v31, %v2180_v5 }
 0x53c   : > { %v2220_v62 = vsub.f32 1.5, %v2219_v14  ;;  %v1962_v14 = vsel %vm1937_vm5, %v1913_v16, 0.0  ;;  %v1925_v59 = vmul.f32 %v6453_v53, %v6453_v53  ;;  %v1912_v34 = vmul.f32 %v6446_v40, %v6446_v40 }
 0x53d   : > { %v2398_v58 = vmul.f32 %v2195_v46, %v6276_v18  ;;  %v2171_v39 = vmul.f32 %v6385_v49, %v2170_v9  ;;  %v2528_v27 = vunpack.c.l.b16 %v2432_v42  ;;  %v1930_v47 = vmul.f32 %v6466_v22, %v6466_v22 }
 0x53e   : > { %v2221_v4 = vmul.f32 %v5002_v2, %v2220_v62  ;;  %v2431_v50 = vpack.c.bf16 %v2399_v29, %v2399_v29  ;;  %vm2172_vm8 = vweird.f32 %v6348_v57  ;;  %v6496_v16 = vmax.f32 %v6214_v61, 0.0 }
 0x53f   : > { %vm2174_vm9 = vmor %vm2172_vm8, %vm2173_vm3  ;;  %v2430_v5 = vpack.c.bf16 %v2398_v58, %v2398_v58  ;;  %v1998_v38 = vsel %vm1937_vm5, %v1925_v59, 0.0  ;;  %v1959_v57 = vsel %vm1937_vm5, %v1912_v34, 0.0  ;;  %v2013_v23 = vsel %vm1937_vm5, %v1930_v47, 0.0 }
 0x540   : > { %v2225_v1 = vsel %vm2224_vm0, %v5002_v2, %v2221_v4  ;;  %v2185_v4 = vsel %vm6480_vm7, %v6379_v31, %v2181_v26  ;;  %v6506_v31 = vmax.f32 %v6320_v35, 0.0  ;;  %v2527_v61 = vunpack.c.l.b16 %v2431_v50 }
 0x541   : > { %v2401_v17 = vmul.f32 %v2225_v1, %v6303_v8  ;;  %2008 = vadd.xlane.f32.xlu2 %v2007_v51  ;;  %2011 = vadd.xlane.f32.xlu0 %v2010_v24  ;;  %v2175_v51 = vsel %vm2174_vm9, %v6385_v49, %v2171_v39  ;;  %v2397_v24 = vmul.f32 %v2185_v4, %v6264_v28  ;;  %v2526_v1 = vunpack.c.l.b16 %v2430_v5 }
 0x542   : > { %1963 = vadd.xlane.f32.xlu1 %v1962_v14  ;;  %v2396_v9 = vmul.f32 %v2175_v51, %v6256_v41  ;;  %v1909_v49 = vmul.f32 %v6496_v16, %v6496_v16  ;;  %v1927_v35 = vmul.f32 %v6506_v31, %v6506_v31  ;;  %v6520_v29 = vmax.f32 %v6186_v3, 0.0 }
 0x543   : > { %v2433_v2 = vpack.c.bf16 %v2401_v17, %v2401_v17  ;;  %v1908_v17 = vmul.f32 %v6493_v45, %v6493_v45  ;;  %v6517_v42 = vpack.c.b16 %v2527_v61, %v2526_v1  ;;  %v2429_v46 = vpack.c.bf16 %v2397_v24, %v2397_v24 }
 0x544   : > { %v2428_v14 = vpack.c.bf16 %v2396_v9, %v2396_v9  ;;  %8734 = vst [vmem:[#allocation40_spill] sm:$0xff] %v6520_v29  ;;  %v6523_v26 = vmax.f32 %v6318_v0, 0.0  ;;  %v1950_v59 = vsel %vm1937_vm5, %v1909_v49, 0.0  ;;  %v6528_v34 = vmax.f32 %v6218_v55, 0.0 }
 0x545   : > { %v2529_v62 = vunpack.c.l.b16 %v2433_v2  ;;  %8733 = vst [vmem:[#allocation39_spill] sm:$0xff] %v6517_v42  ;;  %v1947_v2 = vsel %vm1937_vm5, %v1908_v17, 0.0  ;;  %v2004_v58 = vsel %vm1937_vm5, %v1927_v35, 0.0  ;;  %v2581_v39 = vsel %vm1937_vm5, %v6517_v42, 0 }
 0x546   : > { %v2524_v3 = vunpack.c.l.b16 %v2428_v14  ;;  %v1905_v0 = vmul.f32 %v6520_v29, %v6520_v29  ;;  %v1910_v55 = vmul.f32 %v6528_v34, %v6528_v34  ;;  %v6542_v47 = vmax.f32 %v6310_v12, 0.0 }
 0x547   : > { %v6487_v48 = vpack.c.b16 %v2529_v62, %v2528_v27  ;;  %v2525_v27 = vunpack.c.l.b16 %v2429_v46  ;;  %v1926_v62 = vmul.f32 %v6523_v26, %v6523_v26  ;;  %v6545_v50 = vmax.f32 %v6312_v25, 0.0 }
 0x548   : > { %8736 = vst [vmem:[#allocation42_spill] sm:$0xff] %v6542_v47  ;;  %v1938_v4 = vsel %vm1937_vm5, %v1905_v0, 0.0  ;;  %v1922_v12 = vmul.f32 %v6542_v47, %v6542_v47  ;;  %v6567_v24 = vmax.f32 %v6314_v54, 0.0  ;;  %v6576_v49 = vmax.f32 %v6308_v21, 0.0 }
 0x549   : > { %8732 = vst [vmem:[#allocation38_spill] sm:$0xff] %v6487_v48  ;;  %v2584_v44 = vsel %vm1937_vm5, %v6487_v48, 0  ;;  %1999 = vadd.xlane.f32.xlu2 %v1998_v38  ;;  %1960 = vadd.xlane.f32.xlu0 %v1959_v57  ;;  %v6539_v6 = vpack.c.b16 %v2525_v27, %v2524_v3  ;;  %v2001_v5 = vsel %vm1937_vm5, %v1926_v62, 0.0  ;;  %v6550_v38 = vmax.f32 %v6200_v43, 0.0 }
 0x54a   : > { %2014 = vadd.xlane.f32.xlu1 %v2013_v23  ;;  %2610 = vmatpush.bf16.xpose.msrb.mxu2 %v2584_v44  ;;  %8737 = vst [vmem:[#allocation43_spill] sm:$0xff] %v6545_v50  ;;  %v1953_v57 = vsel %vm1937_vm5, %v1910_v55, 0.0  ;;  %v1923_v25 = vmul.f32 %v6545_v50, %v6545_v50  ;;  %v6562_v43 = vmax.f32 %v6190_v33, 0.0  ;;  %v1989_v23 = vsel %vm1937_vm5, %v1922_v12, 0.0 }
 0x54b   : > { %8735 = vst [vmem:[#allocation41_spill] sm:$0xff] %v6539_v6  ;;  %v2578_v44 = vsel %vm1937_vm5, %v6539_v6, 0  ;;  %v1907_v51 = vmul.f32 %v6550_v38, %v6550_v38  ;;  %v1924_v17 = vmul.f32 %v6567_v24, %v6567_v24  ;;  %v1921_v35 = vmul.f32 %v6576_v49, %v6576_v49 }
 0x54c   : > { %8738 = vst [vmem:[#allocation44_spill] sm:$0xff] %v6562_v43  ;;  %v1992_v61 = vsel %vm1937_vm5, %v1923_v25, 0.0  ;;  %v1906_v9 = vmul.f32 %v6562_v43, %v6562_v43  ;;  %v2479_v46 = vpack.c.bf16 %v6344_v20, %v6344_v20  ;;  %v2478_v14 = vpack.c.bf16 %v6333_v37, %v6333_v37 }
 0x54d   : > { %8739 = vst [vmem:[#allocation45_spill] sm:$0xff] %v6567_v24  ;;  %v1944_v1 = vsel %vm1937_vm5, %v1907_v51, 0.0  ;;  %v1995_v54 = vsel %vm1937_vm5, %v1924_v17, 0.0  ;;  %v2465_v21 = vpack.c.bf16 %v6303_v8, %v6303_v8  ;;  %v2457_v27 = vpack.c.bf16 %v6446_v40, %v6446_v40 }
 0x54e   : > { %v1941_v33 = vsel %vm1937_vm5, %v1906_v9, 0.0  ;;  %8740 = vst [vmem:[#allocation46_spill] sm:$0xff] %v6576_v49  ;;  %v2456_v62 = vpack.c.bf16 %v6382_v13, %v6382_v13  ;;  %v2461_v8 = vpack.c.bf16 %v6264_v28, %v6264_v28  ;;  %v2454_v51 = vpack.c.bf16 %v6496_v16, %v6496_v16 }
 0x54f   : > { %v3130_v0 = vunpack.c.l.b16 %v2465_v21  ;;  %v2463_v28 = vpack.c.bf16 %v6284_v10, %v6284_v10  ;;  %v2471_v10 = vpack.c.bf16 %v6523_v26, %v6523_v26 }
 0x550   : > { %v3126_v25 = vunpack.c.l.b16 %v2461_v8  ;;  %v3119_v17 = vunpack.c.l.b16 %v2454_v51  ;;  %v2480_v51 = vpack.c.bf16 %v6364_v60, %v6364_v60 }
 0x551   : > { %1948 = vadd.xlane.f32.xlu2 %v1947_v2  ;;  %1951 = vadd.xlane.f32.xlu0 %v1950_v59  ;;  %v1986_v2 = vsel %vm1937_vm5, %v1921_v35, 0.0  ;;  %v3866_v59 = vunpack.c.l.b16 %v2479_v46 }
 0x552   : > { %2005 = vadd.xlane.f32.xlu1 %v2004_v58  ;;  %2611 = vmatpush.bf16.xpose.msrb.mxu2 %v2581_v39  ;;  %v2464_v58 = vpack.c.bf16 %v6296_v52, %v6296_v52  ;;  %v3865_v39 = vunpack.c.l.b16 %v2478_v14  ;;  %v2460_v52 = vpack.c.bf16 %v6256_v41, %v6256_v41  ;;  %v2477_v41 = vpack.c.bf16 %v6387_v32, %v6387_v32 }
 0x554   : > { %v3875_v3 = vpack.c.b16 %v3866_v59, %v3865_v39  ;;  %v3129_v55 = vunpack.c.l.b16 %v2464_v58  ;;  %v3864_v14 = vunpack.c.l.b16 %v2477_v41  ;;  %v2453_v58 = vpack.c.bf16 %v6493_v45, %v6493_v45 }
 0x555   : > { %v2458_v39 = vpack.c.bf16 %v6423_v56, %v6423_v56 }
 0x559   : > { %1939 = vadd.xlane.f32.xlu2 %v1938_v4  ;;  %2002 = vadd.xlane.f32.xlu0 %v2001_v5  ;;  %v3138_v4 = vpack.c.b16 %v3130_v0, %v3129_v55  ;;  %v3122_v5 = vunpack.c.l.b16 %v2457_v27 }
 0x55a   : > { %1954 = vadd.xlane.f32.xlu1 %v1953_v57  ;;  %2612 = vmatpush.bf16.xpose.msrb.mxu2 %v2578_v44  ;;  %v3121_v57 = vunpack.c.l.b16 %v2456_v62  ;;  %v2455_v44 = vpack.c.bf16 %v6528_v34, %v6528_v34  ;;  %v2452_v62 = vpack.c.bf16 %v6550_v38, %v6550_v38 }
 0x55c   : > { %v3134_v12 = vpack.c.b16 %v3122_v5, %v3121_v57  ;;  %v3120_v9 = vunpack.c.l.b16 %v2455_v44  ;;  %v3123_v5 = vunpack.c.l.b16 %v2458_v39  ;;  %v2481_v57 = vpack.c.bf16 %v6396_v63, %v6396_v63 }
 0x55e   : > { %v3133_v46 = vpack.c.b16 %v3120_v9, %v3119_v17  ;;  %v2450_v17 = vpack.c.bf16 %v6520_v29, %v6520_v29 }
 0x561   : > { %1990 = vadd.xlane.f32.xlu2 %v1989_v23  ;;  %1993 = vadd.xlane.f32.xlu0 %v1992_v61  ;;  %v3125_v23 = vunpack.c.l.b16 %v2460_v52  ;;  %v2462_v61 = vpack.c.bf16 %v6276_v18, %v6276_v18  ;;  %v2459_v18 = vpack.c.bf16 %v6355_v11, %v6355_v11 }
 0x562   : > { %1945 = vadd.xlane.f32.xlu1 %v1944_v1 }
 0x563   : > { %v3136_v1 = vpack.c.b16 %v3126_v25, %v3125_v23  ;;  %v3127_v35 = vunpack.c.l.b16 %v2462_v61  ;;  %v3124_v8 = vunpack.c.l.b16 %v2459_v18  ;;  %v2475_v25 = vpack.c.bf16 %v6466_v22, %v6466_v22 }
 0x564   : > { %v2474_v61 = vpack.c.bf16 %v6412_v36, %v6412_v36 }
 0x565   : > { %v3135_v23 = vpack.c.b16 %v3124_v8, %v3123_v5 }
 0x569   : > { %1942 = vadd.xlane.f32.xlu0 %v1941_v33  ;;  %v2476_v33 = vpack.c.bf16 %v6328_v30, %v6328_v30 }
 0x56a   : > { %1996 = vadd.xlane.f32.xlu1 %v1995_v54  ;;  %v3128_v54 = vunpack.c.l.b16 %v2463_v28  ;;  %v2451_v28 = vpack.c.bf16 %v6562_v43, %v6562_v43 }
 0x56b   : > { %v3863_v21 = vunpack.c.l.b16 %v2476_v33  ;;  %v3867_v33 = vunpack.c.l.b16 %v2480_v51 }
 0x56c   : > { %v3137_v59 = vpack.c.b16 %v3128_v54, %v3127_v35  ;;  %v3862_v35 = vunpack.c.l.b16 %v2475_v25 }
 0x56d   : > { %v3874_v27 = vpack.c.b16 %v3864_v14, %v3863_v21  ;;  %v3116_v14 = vunpack.c.l.b16 %v2451_v28  ;;  %v2473_v21 = vpack.c.bf16 %v6406_v15, %v6406_v15 }
 0x572   : > { %1987 = vadd.xlane.f32.xlu1 %v1986_v2  ;;  %v2470_v2 = vpack.c.bf16 %v6453_v53, %v6453_v53 }
 0x574   : > { %v3857_v55 = vunpack.c.l.b16 %v2470_v2  ;;  %v3115_v2 = vunpack.c.l.b16 %v2450_v17 }
 0x576   : > { %v3131_v39 = vpack.c.b16 %v3116_v14, %v3115_v2 }
 0x579   : > { %3889 = vrot.lane.b32.xlu2 %v3875_v3, %s5386_s30  ;;  %v3858_v3 = vunpack.c.l.b16 %v2471_v10  ;;  %v3861_v10 = vunpack.c.l.b16 %v2474_v61 }
 0x57b   : > { %v3871_v44 = vpack.c.b16 %v3858_v3, %v3857_v55 }
 0x57d   : > { %3153 = vrot.lane.b32.xlu0 %v3138_v4, %s5386_s30  ;;  %v3118_v4 = vunpack.c.l.b16 %v2453_v58  ;;  %v2472_v58 = vpack.c.bf16 %v6506_v31, %v6506_v31 }
 0x57f   : > { %v3859_v8 = vunpack.c.l.b16 %v2472_v58 }
 0x581   : > { %3145 = vrot.lane.b32.xlu2 %v3134_v12, %s5386_s30  ;;  %v3117_v12 = vunpack.c.l.b16 %v2452_v62  ;;  %v3860_v62 = vunpack.c.l.b16 %v2473_v21 }
 0x583   : > { %v3132_v41 = vpack.c.b16 %v3118_v4, %v3117_v12  ;;  %v3872_v5 = vpack.c.b16 %v3860_v62, %v3859_v8 }
 0x584   : > { %v2018_v0 = vpop.xlane.xlu2 %2017 }
 0x585   : > { %3149 = vrot.lane.b32.xlu0 %v3136_v1, %s5386_s30  ;;  %v6631_v52 = vmax.f32 %v2018_v0, 1e-24  ;;  %v3868_v1 = vunpack.c.l.b16 %v2481_v57 }
 0x587   : > { %5003 = vrsqrt.f32 %v6631_v52  ;;  %vm2332_vm11 = vweird.f32 %v6631_v52 }
 0x589   : > { %3143 = vrot.lane.b32.xlu2 %v3133_v46, %s5386_s30  ;;  %v3876_v46 = vpack.c.b16 %v3868_v1, %v3867_v33 }
 0x58b   : > { %3151 = vrot.lane.b32.xlu1 %v3137_v59, %s5386_s30  ;;  %v3873_v59 = vpack.c.b16 %v3862_v35, %v3861_v10 }
 0x58d   : > { %3887 = vrot.lane.b32.xlu0 %v3874_v27, %s5386_s30  ;;  %v6649_v18 = vpop.eup %5003 }
 0x58e   : > { %v2327_v27 = vmul.f32 %v6649_v18, %v6631_v52  ;;  %vm2333_vm10 = vweird.f32 %v6649_v18 }
 0x58f   : > { %vm2334_vm12 = vmor %vm2332_vm11, %vm2333_vm10 }
 0x590   : > { %v2328_v4 = vmul.f32 %v6649_v18, %v2327_v27 }
 0x591   : > { %3881 = vrot.lane.b32.xlu2 %v3871_v44, %s5386_s30 }
 0x592   : > { %v2329_v44 = vmul.f32 0.5, %v2328_v4 }
 0x593   : > { %3147 = vrot.lane.b32.xlu1 %v3135_v23, %s5386_s30 }
 0x594   : > { %v2024_v9 = vpop.xlane.xlu1 %2023  ;;  %v2330_v1 = vsub.f32 1.5, %v2329_v44 }
 0x595   : > { %v6646_v54 = vmax.f32 %v2024_v9, 1e-24  ;;  %3141 = vrot.lane.b32.xlu0 %v3132_v41, %s5386_s30 }
 0x596   : > { %v2331_v35 = vmul.f32 %v6649_v18, %v2330_v1 }
 0x597   : > { %5005 = vrsqrt.f32 %v6646_v54  ;;  %vm2352_vm15 = vweird.f32 %v6646_v54 }
 0x598   : > { %v2335_v8 = vsel %vm2334_vm12, %v6649_v18, %v2331_v35 }
 0x599   : > { %3891 = vrot.lane.b32.xlu2 %v3876_v46, %s5386_s30  ;;  %v2412_v18 = vmul.f32 %v2335_v8, %v6328_v30 }
 0x59b   : > { %3885 = vrot.lane.b32.xlu1 %v3873_v59, %s5386_s30 }
 0x59c   : > { %v2027_v3 = vpop.xlane.xlu2 %2026 }
 0x59d   : > { %v2063_v0 = vmax.f32 %v2027_v3, 1e-24  ;;  %3139 = vrot.lane.b32.xlu0 %v3131_v39, %s5386_s30  ;;  %v6661_v55 = vpop.eup %5005 }
 0x59e   : > { %v2347_v57 = vmul.f32 %v6661_v55, %v6646_v54  ;;  %vm2353_vm13 = vweird.f32 %v6661_v55 }
 0x59f   : > { %5007 = vrsqrt.f32 %v2063_v0  ;;  %vm6700_vm0 = vmor %vm2352_vm15, %vm2353_vm13  ;;  %vm2362_vm1 = vweird.f32 %v2063_v0 }
 0x5a0   : > { %v2348_v61 = vmul.f32 %v6661_v55, %v2347_v57 }
 0x5a2   : > { %v2349_v17 = vmul.f32 0.5, %v2348_v61 }
 0x5a3   : > { %3883 = vrot.lane.b32.xlu1 %v3872_v5, %s5386_s30 }
 0x5a4   : > { %v1967_v12 = vpop.xlane.xlu2 %1966  ;;  %v2030_v25 = vpop.xlane.xlu0 %2029  ;;  %v2350_v58 = vsub.f32 1.5, %v2349_v17 }
 0x5a5   : > { %v5008_v51 = vpop.eup %5007  ;;  %v6667_v23 = vmax.f32 %v1967_v12, 1e-24  ;;  %v6669_v28 = vmax.f32 %v2030_v25, 1e-24 }
 0x5a6   : > { %v2357_v41 = vmul.f32 %v5008_v51, %v2063_v0  ;;  %v2351_v5 = vmul.f32 %v6661_v55, %v2350_v58  ;;  %vm2363_vm14 = vweird.f32 %v5008_v51 }
 0x5a7   : > { %5009 = vrsqrt.f32 %v6667_v23  ;;  %vm6705_vm2 = vmor %vm2362_vm1, %vm2363_vm14  ;;  %vm2372_vm6 = vweird.f32 %v6669_v28  ;;  %vm2162_vm11 = vweird.f32 %v6667_v23 }
 0x5a8   : > { %v2358_v9 = vmul.f32 %v5008_v51, %v2357_v41  ;;  %5011 = vrsqrt.f32 %v6669_v28  ;;  %v2355_v30 = vsel %vm6700_vm0, %v6661_v55, %v2351_v5 }
 0x5a9   : > { %v2414_v8 = vmul.f32 %v2355_v30, %v6333_v37 }
 0x5aa   : > { %v2359_v33 = vmul.f32 0.5, %v2358_v9 }
 0x5ab   : > { %v2446_v1 = vpack.c.bf16 %v2414_v8, %v2414_v8 }
 0x5ac   : > { %v1958_v10 = vpop.xlane.xlu2 %1957  ;;  %v2021_v46 = vpop.xlane.xlu0 %2020  ;;  %v2360_v39 = vsub.f32 1.5, %v2359_v33 }
 0x5ad   : > { %v6676_v14 = vpop.eup %5009  ;;  %v6678_v2 = vmax.f32 %v1958_v10, 1e-24  ;;  %v2033_v21 = vpop.xlane.xlu1 %2032  ;;  %v6687_v62 = vmax.f32 %v2021_v46, 1e-24 }
 0x5ae   : > { %v6680_v59 = vpop.eup %5011  ;;  %v6683_v27 = vmax.f32 %v2033_v21, 1e-24  ;;  %v2157_v4 = vmul.f32 %v6676_v14, %v6667_v23  ;;  %v2361_v57 = vmul.f32 %v5008_v51, %v2360_v39  ;;  %v2444_v21 = vpack.c.bf16 %v2412_v18, %v2412_v18 }
 0x5af   : > { %v2367_v3 = vmul.f32 %v6680_v59, %v6669_v28  ;;  %5013 = vrsqrt.f32 %v6678_v2  ;;  %vm2373_vm3 = vweird.f32 %v6680_v59  ;;  %vm2163_vm7 = vweird.f32 %v6676_v14 }
 0x5b0   : > { %5015 = vrsqrt.f32 %v6683_v27  ;;  %v2158_v25 = vmul.f32 %v6676_v14, %v2157_v4  ;;  %v2365_v0 = vsel %vm6705_vm2, %v5008_v51, %v2361_v57  ;;  %v6734_v5 = vunpack.c.l.b16 %v2444_v21  ;;  %vm6748_vm8 = vmor %vm2372_vm6, %vm2373_vm3 }
 0x5b1   : > { %v2368_v52 = vmul.f32 %v6680_v59, %v2367_v3  ;;  %5017 = vrsqrt.f32 %v6687_v62  ;;  %v2415_v55 = vmul.f32 %v2365_v0, %v6344_v20  ;;  %vm2382_vm10 = vweird.f32 %v6683_v27  ;;  %vm6777_vm13 = vmor %vm2162_vm11, %vm2163_vm7 }
 0x5b2   : > { %v2159_v58 = vmul.f32 0.5, %v2158_v25  ;;  %vm2342_vm0 = vweird.f32 %v6687_v62 }
 0x5b3   : > { %v2369_v44 = vmul.f32 0.5, %v2368_v52 }
 0x5b4   : > { %v2009_v61 = vpop.xlane.xlu2 %2008  ;;  %v2012_v41 = vpop.xlane.xlu0 %2011  ;;  %v2160_v57 = vsub.f32 1.5, %v2159_v58 }
 0x5b5   : > { %v6709_v9 = vmax.f32 %v2009_v61, 1e-24  ;;  %v6711_v54 = vmax.f32 %v2012_v41, 1e-24  ;;  %v1964_v17 = vpop.xlane.xlu1 %1963  ;;  %v6713_v33 = vpop.eup %5013  ;;  %v2370_v46 = vsub.f32 1.5, %v2369_v44 }
 0x5b6   : > { %v6720_v35 = vmax.f32 %v1964_v17, 1e-24  ;;  %v5016_v10 = vpop.eup %5015  ;;  %v2127_v51 = vmul.f32 %v6713_v33, %v6678_v2  ;;  %v2447_v17 = vpack.c.bf16 %v2415_v55, %v2415_v55  ;;  %v2161_v8 = vmul.f32 %v6676_v14, %v2160_v57 }
 0x5b7   : > { %5019 = vrsqrt.f32 %v6709_v9  ;;  %v2377_v39 = vmul.f32 %v5016_v10, %v6683_v27  ;;  %v6724_v3 = vpop.eup %5017  ;;  %v2371_v52 = vmul.f32 %v6680_v59, %v2370_v46  ;;  %vm2383_vm9 = vweird.f32 %v5016_v10 }
 0x5b8   : > { %5021 = vrsqrt.f32 %v6711_v54  ;;  %v2337_v37 = vmul.f32 %v6724_v3, %v6687_v62  ;;  %v2128_v30 = vmul.f32 %v6713_v33, %v2127_v51  ;;  %vm2384_vm12 = vmor %vm2382_vm10, %vm2383_vm9  ;;  %v2543_v27 = vunpack.c.l.b16 %v2447_v17 }
 0x5b9   : > { %v2378_v4 = vmul.f32 %v5016_v10, %v2377_v39  ;;  %5023 = vrsqrt.f32 %v6720_v35  ;;  %v2375_v21 = vsel %vm6748_vm8, %v6680_v59, %v2371_v52  ;;  %vm2343_vm14 = vweird.f32 %v6724_v3 }
 0x5ba   : > { %v2338_v55 = vmul.f32 %v6724_v3, %v2337_v37  ;;  %v2416_v52 = vmul.f32 %v2375_v21, %v6364_v60  ;;  %vm2152_vm15 = vweird.f32 %v6720_v35  ;;  %vm2302_vm2 = vweird.f32 %v6709_v9  ;;  %vm6873_vm11 = vmor %vm2342_vm0, %vm2343_vm14 }
 0x5bb   : > { %v2379_v44 = vmul.f32 0.5, %v2378_v4  ;;  %vm2312_vm3 = vweird.f32 %v6711_v54  ;;  %vm2133_vm7 = vweird.f32 %v6713_v33  ;;  %vm2132_vm8 = vweird.f32 %v6678_v2 }
 0x5bc   : > { %v2000_v20 = vpop.xlane.xlu2 %1999  ;;  %v1961_v18 = vpop.xlane.xlu0 %1960  ;;  %v2339_v17 = vmul.f32 0.5, %v2338_v55 }
 0x5bd   : > { %v6739_v12 = vpop.eup %5019  ;;  %v6741_v25 = vmax.f32 %v2000_v20, 1e-24  ;;  %v6743_v61 = vmax.f32 %v1961_v18, 1e-24  ;;  %v2015_v41 = vpop.xlane.xlu1 %2014  ;;  %v2380_v0 = vsub.f32 1.5, %v2379_v44  ;;  %v2129_v44 = vmul.f32 0.5, %v2128_v30 }
 0x5be   : > { %v6753_v46 = vpop.eup %5021  ;;  %v2297_v58 = vmul.f32 %v6739_v12, %v6709_v9  ;;  %v6773_v57 = vmax.f32 %v2015_v41, 1e-24  ;;  %v2165_v30 = vsel %vm6777_vm13, %v6676_v14, %v2161_v8  ;;  %vm2303_vm9 = vweird.f32 %v6739_v12 }
 0x5bf   : > { %5025 = vrsqrt.f32 %v6741_v25  ;;  %v6762_v39 = vpop.eup %5023  ;;  %v2381_v51 = vmul.f32 %v5016_v10, %v2380_v0  ;;  %v2307_v4 = vmul.f32 %v6753_v46, %v6711_v54  ;;  %v2542_v0 = vunpack.c.l.b16 %v2446_v1  ;;  %vm6897_vm13 = vmor %vm2302_vm2, %vm2303_vm9 }
 0x5c0   : > { %v2147_v59 = vmul.f32 %v6762_v39, %v6720_v35  ;;  %5027 = vrsqrt.f32 %v6743_v61  ;;  %v2298_v18 = vmul.f32 %v6739_v12, %v2297_v58  ;;  %v6804_v37 = vmul.f32 %v2165_v30, %v6355_v11 }
 0x5c1   : > { %v2385_v20 = vsel %vm2384_vm12, %v5016_v10, %v2381_v51  ;;  %v2308_v60 = vmul.f32 %v6753_v46, %v2307_v4  ;;  %5029 = vrsqrt.f32 %v6773_v57  ;;  %v2130_v51 = vsub.f32 1.5, %v2129_v44 }
 0x5c2   : > { %v2417_v23 = vmul.f32 %v2385_v20, %v6396_v63  ;;  %v2148_v28 = vmul.f32 %v6762_v39, %v2147_v59  ;;  %v2448_v4 = vpack.c.bf16 %v2416_v52, %v2416_v52  ;;  %v6797_v20 = vpack.c.b16 %v2543_v27, %v2542_v0 }
 0x5c3   : > { %v2299_v14 = vmul.f32 0.5, %v2298_v18  ;;  %vm2153_vm1 = vweird.f32 %v6762_v39  ;;  %v2340_v44 = vsub.f32 1.5, %v2339_v17  ;;  %v6825_v17 = vmul.f32 %v6713_v33, %v2130_v51 }
 0x5c4   : > { %v1949_v10 = vpop.xlane.xlu2 %1948  ;;  %v1952_v41 = vpop.xlane.xlu0 %1951  ;;  %v2149_v63 = vmul.f32 0.5, %v2148_v28  ;;  %v2449_v59 = vpack.c.bf16 %v2417_v23, %v2417_v23  ;;  %8749 = vst [vmem:[#allocation47_spill] sm:$0xff] %v6797_v20  ;;  %v2309_v28 = vmul.f32 0.5, %v2308_v60  ;;  %v2544_v60 = vunpack.c.l.b16 %v2448_v4  ;;  %vm6831_vm6 = vmor %vm2152_vm15, %vm2153_vm1 }
 0x5c5   : > { %v6789_v21 = vpop.eup %5025  ;;  %v6793_v58 = vmax.f32 %v1949_v10, 1e-24  ;;  %v6795_v1 = vmax.f32 %v1952_v41, 1e-24  ;;  %v2006_v55 = vpop.xlane.xlu1 %2005  ;;  %v6822_v41 = vsel %vm1937_vm5, %v6797_v20, 0  ;;  %v2300_v30 = vsub.f32 1.5, %v2299_v14 }
 0x5c6   : > { %v6799_v7 = vpop.eup %5027  ;;  %v2150_v8 = vsub.f32 1.5, %v2149_v63  ;;  %v2267_v52 = vmul.f32 %v6789_v21, %v6741_v25  ;;  %v6814_v18 = vmax.f32 %v2006_v55, 1e-24  ;;  %v2545_v10 = vunpack.c.l.b16 %v2449_v59 }
 0x5c7   : > { %5031 = vrsqrt.f32 %v6793_v58  ;;  %v2137_v27 = vmul.f32 %v6799_v7, %v6743_v61  ;;  %v6816_v11 = vpop.eup %5029  ;;  %v2310_v4 = vsub.f32 1.5, %v2309_v28  ;;  %v6848_v19 = vmul.f32 %v6724_v3, %v2340_v44 }
 0x5c8   : > { %v2151_v23 = vmul.f32 %v6762_v39, %v2150_v8  ;;  %5033 = vrsqrt.f32 %v6795_v1  ;;  %v2317_v55 = vmul.f32 %v6816_v11, %v6773_v57  ;;  %v2268_v51 = vmul.f32 %v6789_v21, %v2267_v52 }
 0x5c9   : > { %v2138_v0 = vmul.f32 %v6799_v7, %v2137_v27  ;;  %5035 = vrsqrt.f32 %v6814_v18  ;;  %v6840_v59 = vpack.c.b16 %v2545_v10, %v2544_v60  ;;  %vm2313_vm10 = vweird.f32 %v6753_v46 }
 0x5ca   : > { %v2155_v35 = vsel %vm6831_vm6, %v6762_v39, %v2151_v23  ;;  %v2318_v20 = vmul.f32 %v6816_v11, %v2317_v55  ;;  %v6863_v44 = vmul.f32 %v6739_v12, %v2300_v30  ;;  %v6878_v55 = vmul.f32 %v6753_v46, %v2310_v4  ;;  %vm6914_vm0 = vmor %vm2312_vm3, %vm2313_vm10 }
 0x5cb   : > { %8752 = vst [vmem:[#allocation48_spill] sm:$0xff] %v6840_v59  ;;  %v2139_v60 = vmul.f32 0.5, %v2138_v0  ;;  %v2608_v10 = vsel %vm1937_vm5, %v6840_v59, 0  ;;  %v2394_v63 = vmul.f32 %v2155_v35, %v6423_v56  ;;  %v2269_v30 = vmul.f32 0.5, %v2268_v51  ;;  %vm6940_vm6 = vmor %vm2132_vm8, %vm2133_vm7 }
 0x5cc   : > { %v1940_v14 = vpop.xlane.xlu2 %1939  ;;  %v2003_v8 = vpop.xlane.xlu0 %2002  ;;  %3284 = vmatpush.bf16.xpose.msra.mxu3 %v2608_v10  ;;  %vm2142_vm12 = vweird.f32 %v6743_v61  ;;  %vm2272_vm14 = vweird.f32 %v6741_v25  ;;  %vm2273_vm15 = vweird.f32 %v6789_v21  ;;  %vm2143_vm1 = vweird.f32 %v6799_v7 }
 0x5cd   : > { %v6845_v27 = vpop.eup %5031  ;;  %v6851_v48 = vmax.f32 %v1940_v14, 1e-24  ;;  %v6853_v28 = vmax.f32 %v2003_v8, 1e-24  ;;  %v1955_v52 = vpop.xlane.xlu1 %1954  ;;  %v2319_v14 = vmul.f32 0.5, %v2318_v20  ;;  %v2427_v20 = vpack.c.bf16 %v6804_v37, %v6804_v37  ;;  %vm6971_vm7 = vmor %vm2142_vm12, %vm2143_vm1 }
 0x5ce   : > { %v2097_v39 = vmul.f32 %v6845_v27, %v6793_v58  ;;  %v6860_v23 = vpop.eup %5033  ;;  %v2140_v51 = vsub.f32 1.5, %v2139_v60  ;;  %vm2322_vm2 = vweird.f32 %v6773_v57  ;;  %v6920_v60 = vmax.f32 %v1955_v52, 1e-24  ;;  %vm6984_vm9 = vmor %vm2272_vm14, %vm2273_vm15 }
 0x5cf   : > { %5037 = vrsqrt.f32 %v6851_v48  ;;  %v2107_v8 = vmul.f32 %v6860_v23, %v6795_v1  ;;  %v6882_v59 = vpop.eup %5035  ;;  %v2426_v10 = vpack.c.bf16 %v2394_v63, %v2394_v63  ;;  %v2270_v37 = vsub.f32 1.5, %v2269_v30 }
 0x5d0   : > { %v2098_v62 = vmul.f32 %v6845_v27, %v2097_v39  ;;  %5039 = vrsqrt.f32 %v6853_v28  ;;  %v2287_v39 = vmul.f32 %v6882_v59, %v6814_v18  ;;  %v2320_v56 = vsub.f32 1.5, %v2319_v14 }
 0x5d1   : > { %v2108_v35 = vmul.f32 %v6860_v23, %v2107_v8  ;;  %5041 = vrsqrt.f32 %v6920_v60  ;;  %v2522_v24 = vunpack.c.l.b16 %v2426_v10  ;;  %v2523_v52 = vunpack.c.l.b16 %v2427_v20 }
 0x5d2   : > { %v2288_v54 = vmul.f32 %v6882_v59, %v2287_v39  ;;  %v2099_v49 = vmul.f32 0.5, %v2098_v62  ;;  %v2141_v63 = vmul.f32 %v6799_v7, %v2140_v51  ;;  %vm2323_vm3 = vweird.f32 %v6816_v11 }
 0x5d3   : > { %v2109_v50 = vmul.f32 0.5, %v2108_v35  ;;  %v6944_v39 = vpack.c.b16 %v2523_v52, %v2522_v24  ;;  %v6951_v35 = vmul.f32 %v6789_v21, %v2270_v37  ;;  %v2135_v24 = vsel %vm6940_vm6, %v6713_v33, %v6825_v17  ;;  %vm7002_vm10 = vmor %vm2322_vm2, %vm2323_vm3 }
 0x5d4   : > { %v1991_v42 = vpop.xlane.xlu2 %1990  ;;  %v1994_v6 = vpop.xlane.xlu0 %1993  ;;  %v2289_v20 = vmul.f32 0.5, %v2288_v54  ;;  %3285 = vmatpush.bf16.xpose.msra.mxu3 %v6822_v41  ;;  %vm2292_vm8 = vweird.f32 %v6814_v18  ;;  %vm2293_vm12 = vweird.f32 %v6882_v59  ;;  %vm2113_vm14 = vweird.f32 %v6860_v23 }
 0x5d5   : > { %v6927_v47 = vpop.eup %5037  ;;  %v1946_v43 = vpop.xlane.xlu1 %1945  ;;  %v6946_v51 = vmax.f32 %v1991_v42, 1e-24  ;;  %v6948_v10 = vmax.f32 %v1994_v6, 1e-24  ;;  %v6962_v42 = vmul.f32 %v6816_v11, %v2320_v56  ;;  %v2100_v6 = vsub.f32 1.5, %v2099_v49 }
 0x5d6   : > { %v2067_v30 = vmul.f32 %v6927_v47, %v6851_v48  ;;  %v6934_v14 = vpop.eup %5039  ;;  %v2575_v2 = vsel %vm1937_vm5, %v6944_v39, 0  ;;  %v2110_v37 = vsub.f32 1.5, %v2109_v50  ;;  %v2290_v17 = vsub.f32 1.5, %v2289_v20 }
 0x5d7   : > { %v2277_v29 = vmul.f32 %v6934_v14, %v6853_v28  ;;  %5043 = vrsqrt.f32 %v6946_v51  ;;  %2613 = vmatpush.bf16.xpose.msrb.mxu2 %v2575_v2  ;;  %v6978_v49 = vpop.eup %5041  ;;  %v6988_v56 = vmax.f32 %v1946_v43, 1e-24  ;;  %v2392_v50 = vmul.f32 %v2135_v24, %v6382_v13 }
 0x5d8   : > { %v2068_v8 = vmul.f32 %v6927_v47, %v2067_v30  ;;  %5045 = vrsqrt.f32 %v6948_v10  ;;  %v2275_v54 = vsel %vm6984_vm9, %v6789_v21, %v6951_v35  ;;  %v7016_v57 = vmul.f32 %v6845_v27, %v2100_v6 }
 0x5d9   : > { %v2278_v33 = vmul.f32 %v6934_v14, %v2277_v29  ;;  %v2145_v29 = vsel %vm6971_vm7, %v6799_v7, %v2141_v63  ;;  %v2117_v7 = vmul.f32 %v6978_v49, %v6920_v60  ;;  %v2325_v63 = vsel %vm7002_vm10, %v6816_v11, %v6962_v42 }
 0x5da   : > { %v2069_v43 = vmul.f32 0.5, %v2068_v8  ;;  %5047 = vrsqrt.f32 %v6988_v56  ;;  %v2393_v8 = vmul.f32 %v2145_v29, %v6446_v40  ;;  %v7022_v62 = vmul.f32 %v6860_v23, %v2110_v37 }
 0x5db   : > { %v2279_v20 = vmul.f32 0.5, %v2278_v33  ;;  %v2118_v24 = vmul.f32 %v6978_v49, %v2117_v7  ;;  %v2424_v2 = vpack.c.bf16 %v2392_v50, %v2392_v50  ;;  %vm2112_vm15 = vweird.f32 %v6795_v1 }
 0x5dc   : > { %v7009_v13 = vpop.permute.xlu2 %3889  ;;  %v1943_v52 = vpop.xlane.xlu0 %1942  ;;  %v7029_v11 = vmul.f32 %v6882_v59, %v2290_v17  ;;  %v2425_v42 = vpack.c.bf16 %v2393_v8, %v2393_v8  ;;  %v8767_v40 = vsel %vm6873_vm11, %v6724_v3, %v6848_v19  ;;  %v2070_v29 = vsub.f32 1.5, %v2069_v43  ;;  %vm7053_vm11 = vmor %vm2292_vm8, %vm2293_vm12 }
 0x5dd   : > { %v1997_v30 = vpop.xlane.xlu1 %1996  ;;  %v7025_v41 = vpop.eup %5043  ;;  %v2413_v6 = vmul.f32 %v8767_v40, %v6387_v32  ;;  %v7037_v37 = vmax.f32 %v1943_v52, 1e-24  ;;  %vm2282_vm1 = vweird.f32 %v6853_v28  ;;  %vm2283_vm2 = vweird.f32 %v6934_v14 }
 0x5de   : > { %v7039_v33 = vpop.eup %5045  ;;  %v2119_v50 = vmul.f32 0.5, %v2118_v24  ;;  %v2237_v17 = vmul.f32 %v7025_v41, %v6946_v51  ;;  %v2520_v25 = vunpack.c.l.b16 %v2424_v2  ;;  %v2521_v7 = vunpack.c.l.b16 %v2425_v42  ;;  %vm7118_vm12 = vmor %vm2282_vm1, %vm2283_vm2 }
 0x5df   : > { %v2247_v0 = vmul.f32 %v7039_v33, %v6948_v10  ;;  %v7047_v19 = vmax.f32 %v1997_v30, 1e-24  ;;  %v2280_v3 = vsub.f32 1.5, %v2279_v20  ;;  %vm2252_vm3 = vweird.f32 %v6948_v10 }
 0x5e0   : > { %v2238_v43 = vmul.f32 %v7025_v41, %v2237_v17  ;;  %v2445_v52 = vpack.c.bf16 %v2413_v6, %v2413_v6  ;;  %v7059_v8 = vpop.eup %5047  ;;  %v2295_v30 = vsel %vm7053_vm11, %v6882_v59, %v7029_v11  ;;  %vm2122_vm6 = vweird.f32 %v6920_v60  ;;  %vm7106_vm11 = vmor %vm2112_vm15, %vm2113_vm14 }
 0x5e1   : > { %v2248_v18 = vmul.f32 %v7039_v33, %v2247_v0  ;;  %v7067_v24 = vpack.c.b16 %v2521_v7, %v2520_v25  ;;  %5049 = vrsqrt.f32 %v7037_v37  ;;  %v7071_v20 = vmul.f32 %v6927_v47, %v2070_v29 }
 0x5e2   : > { %v2120_v2 = vsub.f32 1.5, %v2119_v50  ;;  %vm2123_vm7 = vweird.f32 %v6978_v49  ;;  %v2087_v42 = vmul.f32 %v7059_v8, %v6988_v56  ;;  %v2541_v6 = vunpack.c.l.b16 %v2445_v52 }
 0x5e3   : > { %v2249_v59 = vmul.f32 0.5, %v2248_v18  ;;  %v2572_v11 = vsel %vm1937_vm5, %v7067_v24, 0  ;;  %5051 = vrsqrt.f32 %v7047_v19  ;;  %vm2103_vm8 = vweird.f32 %v6845_v27  ;;  %vm2124_vm2 = vmor %vm2122_vm6, %vm2123_vm7 }
 0x5e4   : > { %v7076_v40 = vpop.permute.xlu2 %3145  ;;  %v7083_v29 = vmul.f32 %v6934_v14, %v2280_v3  ;;  %v7085_v50 = vmul.f32 0.5, %v2238_v43  ;;  %v2088_v0 = vmul.f32 %v7059_v8, %v2087_v42  ;;  %vm2092_vm10 = vweird.f32 %v6988_v56  ;;  %2614 = vmatpush.bf16.xpose.msrb.mxu2 %v2572_v11 }
 0x5e5   : > { %v1988_v17 = vpop.xlane.xlu1 %1987  ;;  %v8770_v25 = vsel %vm6914_vm0, %v6753_v46, %v6878_v55  ;;  %v2250_v32 = vsub.f32 1.5, %v2249_v59  ;;  %v7096_v52 = vpack.c.b16 %v2541_v6, %v6734_v5  ;;  %v2411_v3 = vmul.f32 %v2325_v63, %v6466_v22 }
 0x5e6   : > { %v2410_v7 = vmul.f32 %v8770_v25, %v6412_v36  ;;  %v7099_v43 = vmax.f32 %v1988_v17, 1e-24  ;;  %v2121_v36 = vmul.f32 %v6978_v49, %v2120_v2  ;;  %vm2253_vm0 = vweird.f32 %v7039_v33 }
 0x5e7   : > { %v2089_v5 = vmul.f32 0.5, %v2088_v0  ;;  %v7112_v55 = vpop.eup %5049  ;;  %v7123_v1 = vmul.f32 %v7039_v33, %v2250_v32  ;;  %v2602_v63 = vsel %vm1937_vm5, %v7096_v52, 0  ;;  %v2443_v18 = vpack.c.bf16 %v2411_v3, %v2411_v3  ;;  %vm7145_vm14 = vmor %vm2252_vm3, %vm2253_vm0 }
 0x5e8   : > { %v2442_v46 = vpack.c.bf16 %v2410_v7, %v2410_v7  ;;  %5053 = vrsqrt.f32 %v7099_v43  ;;  %v2285_v2 = vsel %vm7118_vm12, %v6934_v14, %v7083_v29  ;;  %3286 = vmatpush.bf16.xpose.msra.mxu3 %v2602_v63  ;;  %v2077_v28 = vmul.f32 %v7112_v55, %v7037_v37 }
 0x5e9   : > { %v2090_v42 = vsub.f32 1.5, %v2089_v5  ;;  %v2115_v59 = vsel %vm7106_vm11, %v6860_v23, %v7022_v62  ;;  %v7138_v11 = vpop.eup %5051  ;;  %v2240_v6 = vsub.f32 1.5, %v7085_v50  ;;  %vm2093_vm15 = vweird.f32 %v7059_v8 }
 0x5ea   : > { %v2538_v17 = vunpack.c.l.b16 %v2442_v46  ;;  %v2539_v29 = vunpack.c.l.b16 %v2443_v18  ;;  %vm2073_vm1 = vweird.f32 %v6927_v47  ;;  %v2255_v23 = vsel %vm7145_vm14, %v7039_v33, %v7123_v1  ;;  %vm7187_vm7 = vmor %vm2092_vm10, %vm2093_vm15 }
 0x5eb   : > { %v2091_v10 = vmul.f32 %v7059_v8, %v2090_v42  ;;  %v2078_v62 = vmul.f32 %v7112_v55, %v2077_v28  ;;  %v2257_v0 = vmul.f32 %v7138_v11, %v7047_v19  ;;  %vm2262_vm3 = vweird.f32 %v7047_v19 }
 0x5ec   : > { %v7164_v25 = vpop.permute.xlu2 %3143  ;;  %vm2083_vm12 = vweird.f32 %v7112_v55  ;;  %v7167_v60 = vpack.c.b16 %v2539_v29, %v2538_v17  ;;  %v2125_v7 = vsel %vm2124_vm2, %v6978_v49, %v2121_v36  ;;  %v2390_v32 = vmul.f32 %v2115_v59, %v6496_v16 }
 0x5ed   : > { %v2408_v3 = vmul.f32 %v2295_v30, %v6506_v31  ;;  %vm2072_vm6 = vweird.f32 %v6851_v48  ;;  %v2079_v9 = vmul.f32 0.5, %v2078_v62  ;;  %v2258_v5 = vmul.f32 %v7138_v11, %v2257_v0 }
 0x5ee   : > { %v2391_v46 = vmul.f32 %v2125_v7, %v6528_v34  ;;  %v8777_v22 = vsel %vm6897_vm13, %v6739_v12, %v6863_v44  ;;  %v7181_v18 = vpop.eup %5053  ;;  %vm2082_vm11 = vweird.f32 %v7037_v37  ;;  %vm2263_vm0 = vweird.f32 %v7138_v11  ;;  %vm2074_vm2 = vmor %vm2072_vm6, %vm2073_vm1 }
 0x5ef   : > { %v2409_v63 = vmul.f32 %v8777_v22, %v6406_v15  ;;  %v2599_v31 = vsel %vm1937_vm5, %v7167_v60, 0  ;;  %v2422_v34 = vpack.c.bf16 %v2390_v32, %v2390_v32  ;;  %v2440_v12 = vpack.c.bf16 %v2408_v3, %v2408_v3  ;;  %v3154_v15 = vpop.permute.xlu0 %3153 }
 0x5f0   : > { %v2080_v44 = vsub.f32 1.5, %v2079_v9  ;;  %v2259_v4 = vmul.f32 0.5, %v2258_v5  ;;  %v2227_v49 = vmul.f32 %v7181_v18, %v7099_v43  ;;  %3163 = vmatpush.bf16.msra.mxu1 %v3154_v15  ;;  %v2095_v56 = vsel %vm7187_vm7, %v7059_v8, %v2091_v10  ;;  %3287 = vmatpush.bf16.xpose.msra.mxu3 %v2599_v31  ;;  %v8784_v15 = vld [vmem:[#allocation43_spill] sm:$0xff] }
 0x5f1   : > { %vm8780_vm13 = vweird.f32 %v6793_v58  ;;  %v2423_v30 = vpack.c.bf16 %v2391_v46, %v2391_v46  ;;  %v2518_v36 = vunpack.c.l.b16 %v2422_v34  ;;  %v2441_v42 = vpack.c.bf16 %v2409_v63, %v2409_v63  ;;  %v8783_v34 = vld [vmem:[#allocation40_spill] sm:$0xff] }
 0x5f2   : > { %vm2104_vm10 = vmor %vm8780_vm13, %vm2103_vm8  ;;  %v2536_v28 = vunpack.c.l.b16 %v2440_v12  ;;  %vm2243_vm15 = vweird.f32 %v7025_v41  ;;  %v2081_v59 = vmul.f32 %v7112_v55, %v2080_v44  ;;  %v2260_v17 = vsub.f32 1.5, %v2259_v4  ;;  %v8786_v4 = vld [vmem:[#allocation45_spill] sm:$0xff] }
 0x5f3   : > { %v2228_v29 = vmul.f32 %v7181_v18, %v2227_v49  ;;  %v2105_v8 = vsel %vm2104_vm10, %v6845_v27, %v7016_v57  ;;  %v2519_v10 = vunpack.c.l.b16 %v2423_v30  ;;  %v2537_v62 = vunpack.c.l.b16 %v2441_v42  ;;  %vm7225_vm8 = vmor %vm2262_vm3, %vm2263_vm0 }
 0x5f4   : > { %v2388_v58 = vmul.f32 %v2095_v56, %v6550_v38  ;;  %v2389_v0 = vmul.f32 %v2105_v8, %v6493_v45  ;;  %v2261_v7 = vmul.f32 %v7138_v11, %v2260_v17  ;;  %v2406_v3 = vmul.f32 %v2275_v54, %v6453_v53  ;;  %v7219_v5 = vpop.permute.xlu2 %3881  ;;  %vm2084_vm3 = vmor %vm2082_vm11, %vm2083_vm12  ;;  %v8791_v17 = vld [vmem:[#allocation46_spill] sm:$0xff] }
 0x5f5   : > { %v2229_v32 = vmul.f32 0.5, %v2228_v29  ;;  %v2407_v9 = vmul.f32 %v2285_v2, %v6523_v26  ;;  %v7229_v38 = vpack.c.b16 %v2519_v10, %v2518_v36  ;;  %v7231_v27 = vpack.c.b16 %v2537_v62, %v2536_v28 }
 0x5f6   : > { %v2420_v61 = vpack.c.bf16 %v2388_v58, %v2388_v58  ;;  %v2421_v57 = vpack.c.bf16 %v2389_v0, %v2389_v0  ;;  %v2265_v53 = vsel %vm7225_vm8, %v7138_v11, %v2261_v7  ;;  %vm2233_vm9 = vweird.f32 %v7181_v18  ;;  %v8792_v0 = vld [vmem:[#allocation42_spill] sm:$0xff] }
 0x5f7   : > { %v2230_v26 = vsub.f32 1.5, %v2229_v32  ;;  %v2439_v21 = vpack.c.bf16 %v2407_v9, %v2407_v9  ;;  %v2569_v35 = vsel %vm1937_vm5, %v7229_v38, 0  ;;  %v2438_v2 = vpack.c.bf16 %v2406_v3, %v2406_v3  ;;  %v3150_v46 = vpop.permute.xlu0 %3149 }
 0x5f8   : > { %v2516_v54 = vunpack.c.l.b16 %v2420_v61  ;;  %v2517_v19 = vunpack.c.l.b16 %v2421_v57  ;;  %2615 = vmatpush.bf16.xpose.msrb.mxu2 %v2569_v35  ;;  %v2596_v22 = vsel %vm1937_vm5, %v7231_v27, 0  ;;  %v2075_v63 = vsel %vm2074_vm2, %v6927_v47, %v7071_v20  ;;  %v8785_v47 = vld [vmem:[#allocation44_spill] sm:$0xff] }
 0x5f9   : > { %v2231_v11 = vmul.f32 %v7181_v18, %v2230_v26  ;;  %v2535_v48 = vunpack.c.l.b16 %v2439_v21  ;;  %v2085_v31 = vsel %vm2084_vm3, %v7112_v55, %v2081_v59  ;;  %v2386_v12 = vmul.f32 %v2075_v63, %v8783_v34  ;;  %3288 = vmatpush.bf16.xpose.msra.mxu3 %v2596_v22 }
 0x5fa   : > { %v7252_v16 = vpack.c.b16 %v2517_v19, %v2516_v54  ;;  %v2404_v37 = vmul.f32 %v2255_v23, %v8784_v15  ;;  %v2241_v44 = vmul.f32 %v7025_v41, %v2240_v6  ;;  %vm2232_vm1 = vweird.f32 %v7099_v43 }
 0x5fb   : > { %v2387_v20 = vmul.f32 %v2085_v31, %v8785_v47  ;;  %v2405_v55 = vmul.f32 %v2265_v53, %v8786_v4  ;;  %vm7270_vm12 = vmor %vm2232_vm1, %vm2233_vm9  ;;  %v2534_v14 = vunpack.c.l.b16 %v2438_v2  ;;  %v2418_v33 = vpack.c.bf16 %v2386_v12, %v2386_v12 }
 0x5fc   : > { %vm2242_vm14 = vweird.f32 %v6946_v51  ;;  %v2235_v50 = vsel %vm7270_vm12, %v7181_v18, %v2231_v11  ;;  %v3892_v6 = vpop.permute.xlu2 %3891  ;;  %v2566_v56 = vsel %vm1937_vm5, %v7252_v16, 0  ;;  %v2436_v36 = vpack.c.bf16 %v2404_v37, %v2404_v37 }
 0x5fd   : > { %v2419_v43 = vpack.c.bf16 %v2387_v20, %v2387_v20  ;;  %v2437_v1 = vpack.c.bf16 %v2405_v55, %v2405_v55  ;;  %vm7280_vm6 = vmor %vm2242_vm14, %vm2243_vm15  ;;  %v7286_v30 = vpack.c.b16 %v2535_v48, %v2534_v14  ;;  %v3152_v51 = vpop.permute.xlu1 %3151  ;;  %3901 = vmatpush.bf16.msra.mxu0 %v3892_v6  ;;  %v2514_v28 = vunpack.c.l.b16 %v2418_v33 }
 0x5fe   : > { %v2245_v18 = vsel %vm7280_vm6, %v7025_v41, %v2241_v44  ;;  %3164 = vmatpush.bf16.msra.mxu1 %v3152_v51  ;;  %v2402_v29 = vmul.f32 %v2235_v50, %v8791_v17  ;;  %v2532_v62 = vunpack.c.l.b16 %v2436_v36  ;;  %v2467_v11 = vpack.c.bf16 %v8792_v0, %v8792_v0  ;;  %v8797_v51 = vld [vmem:[#allocation48_spill] sm:$0xff] }
 0x5ff   : > { %v2515_v42 = vunpack.c.l.b16 %v2419_v43  ;;  %v2533_v59 = vunpack.c.l.b16 %v2437_v1  ;;  %v2593_v8 = vsel %vm1937_vm5, %v7286_v30, 0  ;;  %v3888_v58 = vpop.permute.xlu0 %3887  ;;  %v2403_v7 = vmul.f32 %v2245_v18, %v8792_v0 }
 0x600   : > { %2616 = vmatpush.bf16.xpose.msrb.mxu2 %v2566_v56  ;;  %v2434_v32 = vpack.c.bf16 %v2402_v29, %v2402_v29  ;;  %v2466_v48 = vpack.c.bf16 %v8791_v17, %v8791_v17  ;;  %v2469_v63 = vpack.c.bf16 %v8786_v4, %v8786_v4  ;;  %v3854_v31 = vunpack.c.l.b16 %v2467_v11  ;;  %v8796_v56 = vld [vmem:[#allocation47_spill] sm:$0xff] }
 0x601   : > { %v2546_v10 = vpack.c.b16 %v2515_v42, %v2514_v28  ;;  %3902 = vmatpush.bf16.msra.mxu0 %v7009_v13  ;;  %3289 = vmatpush.bf16.xpose.msra.mxu3 %v2593_v8  ;;  %v2555_v41 = vpack.c.b16 %v2533_v59, %v2532_v62  ;;  %v2435_v9 = vpack.c.bf16 %v2403_v7, %v2403_v7 }
 0x602   : > { %3165 = vmatpush.bf16.msra.mxu1 %v3150_v46  ;;  %v2530_v57 = vunpack.c.l.b16 %v2434_v32  ;;  %v2468_v34 = vpack.c.bf16 %v8784_v15, %v8784_v15  ;;  %v3853_v12 = vunpack.c.l.b16 %v2466_v48  ;;  %v3856_v37 = vunpack.c.l.b16 %v2469_v63 }
 0x603   : > { %v2563_v3 = vsel %vm1937_vm5, %v2546_v10, 0  ;;  %v2590_v61 = vsel %vm1937_vm5, %v2555_v41, 0  ;;  %v2531_v53 = vunpack.c.l.b16 %v2435_v9 }
 0x604   : > { %v3869_v44 = vpack.c.b16 %v3854_v31, %v3853_v12  ;;  %v3855_v47 = vunpack.c.l.b16 %v2468_v34 }
 0x605   : > { %v3148_v45 = vpop.permute.xlu1 %3147  ;;  %3903 = vmatpush.bf16.msra.mxu0 %v3888_v58  ;;  %v2554_v13 = vpack.c.b16 %v2531_v53, %v2530_v57 }
 0x606   : > { %3166 = vmatpush.bf16.msra.mxu1 %v3148_v45  ;;  %v3870_v55 = vpack.c.b16 %v3856_v37, %v3855_v47 }
 0x607   : > { %v3142_v26 = vpop.permute.xlu0 %3141  ;;  %v2587_v35 = vsel %vm1937_vm5, %v2554_v13, 0 }
 0x608   : > { %2617 = vmatpush.bf16.xpose.msrb.mxu2 %v2563_v3 }
 0x609   : > { %3290 = vmatpush.bf16.xpose.msra.mxu3 %v2590_v61 }
 0x60a   : > { %3167 = vmatpush.bf16.msra.mxu1 %v7076_v40  ;;  %v8793_v40 = vld [vmem:[#allocation41_spill] sm:$0xff] }
 0x60d   : > { %v3886_v21 = vpop.permute.xlu1 %3885 }
 0x60e   : > { %3168 = vmatpush.bf16.msra.mxu1 %v7164_v25  ;;  %3904 = vmatpush.bf16.msra.mxu0 %v3886_v21  ;;  %v8794_v25 = vld [vmem:[#allocation39_spill] sm:$0xff] }
 0x60f   : > { %4710 = vmatmul.msk.bf16.vlgmr.msrb.gmra.mxu2 %vm1937_vm5, %v2546_v10  ;;  %v3140_v54 = vpop.permute.xlu0 %3139 }
 0x611   : > { %3291 = vmatpush.bf16.xpose.msra.mxu3 %v2587_v35 }
 0x612   : > { %3169 = vmatpush.bf16.msra.mxu1 %v3142_v26 }
 0x615   : > { %v3884_v19 = vpop.permute.xlu1 %3883 }
 0x616   : > { %3170 = vmatpush.bf16.msra.mxu1 %v3140_v54  ;;  %3905 = vmatpush.bf16.msra.mxu0 %v3884_v19 }
 0x618   : > { %4726 = vmatmul.msk.bf16.vlgmr.msra.gmra.mxu3 %vm1937_vm5, %v2546_v10 }
 0x61a   : > { %3906 = vmatpush.bf16.msra.mxu0 %v7219_v5  ;;  %v8795_v5 = vld [vmem:[#allocation38_spill] sm:$0xff] }
 0x61f   : > { %4711 = vmatmul.msk.bf16.gmra.mxu2 %vm1937_vm5, %v7252_v16 }
 0x628   : > { %4727 = vmatmul.msk.bf16.gmra.mxu3 %vm1937_vm5, %v7252_v16 }
 0x62f   : > { %4712 = vmatmul.msk.bf16.gmra.mxu2 %vm1937_vm5, %v7229_v38 }
 0x638   : > { %4728 = vmatmul.msk.bf16.gmra.mxu3 %vm1937_vm5, %v7229_v38 }
 0x63f   : > { %4713 = vmatmul.msk.bf16.gmra.mxu2 %vm1937_vm5, %v7067_v24 }
 0x648   : > { %4729 = vmatmul.msk.bf16.gmra.mxu3 %vm1937_vm5, %v7067_v24 }
 0x64f   : > { %4714 = vmatmul.msk.bf16.gmra.mxu2 %vm1937_vm5, %v6944_v39 }
 0x658   : > { %4730 = vmatmul.msk.bf16.gmra.mxu3 %vm1937_vm5, %v6944_v39 }
 0x65f   : > { %4715 = vmatmul.msk.bf16.gmra.mxu2 %vm1937_vm5, %v8793_v40 }
 0x668   : > { %4731 = vmatmul.msk.bf16.gmra.mxu3 %vm1937_vm5, %v8793_v40 }
 0x66f   : > { %4716 = vmatmul.msk.bf16.gmra.mxu2 %vm1937_vm5, %v8794_v25 }
 0x678   : > { %4732 = vmatmul.msk.bf16.gmra.mxu3 %vm1937_vm5, %v8794_v25 }
 0x67f   : > { %4717 = vmatmul.msk.bf16.gmra.mxu2 %vm1937_vm5, %v8795_v5 }
 0x688   : > { %4733 = vmatmul.msk.bf16.gmra.mxu3 %vm1937_vm5, %v8795_v5 }
 0x68f   : > { %4718 = vmatmul.msk.bf16.gmra.mxu2 %vm1937_vm5, %v2554_v13 }
 0x692   : > { %v7333_v39 = vpop.f32.mrf.mxu2 }
 0x693   : > { %2699 = vmax.xlane.f32.xlu0 %v7333_v39 }
 0x698   : > { %4734 = vmatmul.msk.bf16.gmra.mxu3 %vm1937_vm5, %v2554_v13 }
 0x69a   : > { %v7337_v24 = vpop.f32.mrf.mxu2 }
 0x69b   : > { %2701 = vmax.xlane.f32.xlu2 %v7337_v24  ;;  %v7340_v38 = vpop.f32.mrf.mxu3 }
 0x69c   : > { %3373 = vmax.xlane.f32.xlu1 %v7340_v38 }
 0x69f   : > { %4719 = vmatmul.msk.bf16.gmra.mxu2 %vm1937_vm5, %v2555_v41 }
 0x6a2   : > { %v7344_v2 = vpop.f32.mrf.mxu2 }
 0x6a3   : > { %v7346_v46 = vpop.f32.mrf.mxu3 }
 0x6a4   : > { %3375 = vmax.xlane.f32.xlu0 %v7346_v46 }
 0x6a8   : > { %4735 = vmatmul.msk.bf16.gmra.mxu3 %vm1937_vm5, %v2555_v41 }
 0x6aa   : > { %v7352_v22 = vpop.f32.mrf.mxu2 }
 0x6ab   : > { %v7358_v16 = vpop.f32.mrf.mxu3 }
 0x6ac   : > { %2703 = vmax.xlane.f32.xlu0 %v7344_v2 }
 0x6af   : > { %4720 = vmatmul.msk.bf16.gmra.mxu2 %vm1937_vm5, %v7286_v30 }
 0x6b2   : > { %v7365_v20 = vpop.f32.mrf.mxu2 }
 0x6b3   : > { %3877 = vrot.lane.b32.xlu2 %v3869_v44, %s5386_s30  ;;  %v7368_v4 = vpop.f32.mrf.mxu3 }
 0x6b4   : > { %3379 = vmax.xlane.f32.xlu0 %v7368_v4 }
 0x6b5   : > { %3879 = vrot.lane.b32.xlu1 %v3870_v55, %s5386_s30 }
 0x6b8   : > { %4736 = vmatmul.msk.bf16.gmra.mxu3 %vm1937_vm5, %v7286_v30 }
 0x6ba   : > { %v7374_v15 = vpop.f32.mrf.mxu2 }
 0x6bb   : > { %v7387_v33 = vpop.f32.mrf.mxu3 }
 0x6bf   : > { %4721 = vmatmul.msk.bf16.gmra.mxu2 %vm1937_vm5, %v7231_v27 }
 0x6c2   : > { %v7378_v49 = vpop.f32.mrf.mxu2 }
 0x6c3   : > { %v7394_v43 = vpop.f32.mrf.mxu3 }
 0x6c8   : > { %4737 = vmatmul.msk.bf16.gmra.mxu3 %vm1937_vm5, %v7231_v27 }
 0x6ca   : > { %v7382_v14 = vpop.f32.mrf.mxu2 }
 0x6cb   : > { %2713 = vmax.xlane.f32.xlu0 %v7382_v14  ;;  %v7405_v6 = vpop.f32.mrf.mxu3 }
 0x6cf   : > { %4722 = vmatmul.msk.bf16.gmra.mxu2 %vm1937_vm5, %v7167_v60 }
 0x6d2   : > { %v7389_v50 = vpop.f32.mrf.mxu2 }
 0x6d3   : > { %3381 = vmax.xlane.f32.xlu0 %v7387_v33  ;;  %v7414_v23 = vpop.f32.mrf.mxu3 }
 0x6d8   : > { %4738 = vmatmul.msk.bf16.gmra.mxu3 %vm1937_vm5, %v7167_v60 }
 0x6da   : > { %v7396_v1 = vpop.f32.mrf.mxu2 }
 0x6db   : > { %2715 = vmax.xlane.f32.xlu0 %v7389_v50  ;;  %v7422_v36 = vpop.f32.mrf.mxu3 }
 0x6dc   : > { %3377 = vmax.xlane.f32.xlu2 %v7358_v16 }
 0x6df   : > { %4723 = vmatmul.msk.bf16.gmra.mxu2 %vm1937_vm5, %v7096_v52  ;;  %2705 = vmax.xlane.f32.xlu1 %v7352_v22 }
 0x6e2   : > { %v7403_v27 = vpop.f32.mrf.mxu2 }
 0x6e3   : > { %v7434_v18 = vpop.f32.mrf.mxu3 }
 0x6e4   : > { %2709 = vmax.xlane.f32.xlu2 %v7374_v15 }
 0x6e7   : > { %2707 = vmax.xlane.f32.xlu1 %v7365_v20 }
 0x6e8   : > { %4739 = vmatmul.msk.bf16.gmra.mxu3 %vm1937_vm5, %v7096_v52 }
 0x6ea   : > { %v7411_v60 = vpop.f32.mrf.mxu2 }
 0x6eb   : > { %v7450_v29 = vpop.f32.mrf.mxu3 }
 0x6ec   : > { %2711 = vmax.xlane.f32.xlu2 %v7378_v49 }
 0x6ef   : > { %4724 = vmatmul.msk.bf16.gmra.mxu2 %vm1937_vm5, %v8796_v56  ;;  %3383 = vmax.xlane.f32.xlu1 %v7394_v43 }
 0x6f2   : > { %v7419_v30 = vpop.f32.mrf.mxu2 }
 0x6f3   : > { %v7465_v3 = vpop.f32.mrf.mxu3 }
 0x6f4   : > { %2721 = vmax.xlane.f32.xlu2 %v7411_v60 }
 0x6f7   : > { %2717 = vmax.xlane.f32.xlu1 %v7396_v1 }
 0x6f8   : > { %4740 = vmatmul.msk.bf16.gmra.mxu3 %vm1937_vm5, %v8796_v56 }
 0x6fa   : > { %v7427_v52 = vpop.f32.mrf.mxu2 }
 0x6fb   : > { %2725 = vmax.xlane.f32.xlu0 %v7427_v52  ;;  %v7480_v54 = vpop.f32.mrf.mxu3 }
 0x6fc   : > { %3387 = vmax.xlane.f32.xlu2 %v7414_v23 }
 0x6ff   : > { %4725 = vmatmul.msk.bf16.gmra.mxu2 %vm1937_vm5, %v8797_v51  ;;  %3385 = vmax.xlane.f32.xlu1 %v7405_v6 }
 0x702   : > { %v7436_v42 = vpop.f32.mrf.mxu2 }
 0x703   : > { %2727 = vmax.xlane.f32.xlu0 %v7436_v42 }
 0x704   : > { %2723 = vmax.xlane.f32.xlu2 %v7419_v30 }
 0x706   : > { %v7440_v28 = vpop.xlane.xlu0 %2699 }
 0x707   : > { %2719 = vmax.xlane.f32.xlu1 %v7403_v27  ;;  %v2859_v59 = vsub.f32 %v7333_v39, %v7440_v28 }
 0x708   : > { %4741 = vmatmul.msk.bf16.gmra.mxu3 %vm1937_vm5, %v8797_v51 }
 0x709   : > { %v2891_v8 = vmul.f32 1.442695, %v2859_v59 }
 0x70a   : > { %v7447_v17 = vpop.f32.mrf.mxu2 }
 0x70b   : > { %3391 = vmax.xlane.f32.xlu0 %v7434_v18  ;;  %5055 = vpow2.f32 %v2891_v8 }
 0x70c   : > { %3389 = vmax.xlane.f32.xlu2 %v7422_v36 }
 0x70e   : > { %v7453_v10 = vpop.xlane.xlu2 %2701 }
 0x70f   : > { %v2860_v62 = vsub.f32 %v7337_v24, %v7453_v10  ;;  %2729 = vmax.xlane.f32.xlu1 %v7447_v17  ;;  %v3374_v58 = vpop.xlane.xlu1 %3373 }
 0x710   : > { %v7459_v7 = vmax.f32 %v7440_v28, %v3374_v58 }
 0x711   : > { %v2893_v0 = vmul.f32 1.442695, %v2860_v62  ;;  %v5056_v9 = vpop.eup %5055 }
 0x712   : > { %v7461_v41 = vpop.f32.mrf.mxu2  ;;  %v3565_v35 = vsub.f32 %v7340_v38, %v7459_v7  ;;  %v7491_v38 = vpop.f32.mrf.mxu3 }
 0x713   : > { %5057 = vpow2.f32 %v2893_v0 }
 0x714   : > { %v3597_v25 = vmul.f32 1.442695, %v3565_v35 }
 0x716   : > { %v3878_v48 = vpop.permute.xlu2 %3877 }
 0x717   : > { %v3376_v45 = vpop.xlane.xlu0 %3375  ;;  %2731 = vmax.xlane.f32.xlu1 %v7461_v41 }
 0x718   : > { %v7469_v57 = vmax.f32 %v7453_v10, %v3376_v45 }
 0x719   : > { %v5058_v61 = vpop.eup %5057 }
 0x71a   : > { %v7471_v53 = vpop.f32.mrf.mxu2  ;;  %2989 = vadd.xlane.f32.xlu0 %v5058_v61  ;;  %v3083_v13 = vpack.c.bf16 %v5058_v61, %v5056_v9  ;;  %v3566_v21 = vsub.f32 %v7346_v46, %v7469_v57  ;;  %v7507_v12 = vpop.f32.mrf.mxu3 }
 0x71b   : > { %2733 = vmax.xlane.f32.xlu2 %v7471_v53  ;;  %8799 = vst [vmem:[#allocation43_spill] sm:$0xff] %v7507_v12 }
 0x71c   : > { %3171 = vmatmul.bf16.vlgmr.msra.gmra.mxu1 %v3083_v13  ;;  %v3599_v19 = vmul.f32 1.442695, %v3566_v21 }
 0x71e   : > { %5059 = vpow2.f32 %v3599_v19 }
 0x71f   : > { %3395 = vmax.xlane.f32.xlu1 %v7465_v3  ;;  %v7486_v5 = vpop.xlane.xlu0 %2703  ;;  %5061 = vpow2.f32 %v3597_v25 }
 0x720   : > { %v2861_v24 = vsub.f32 %v7344_v2, %v7486_v5 }
 0x722   : > { %v7483_v40 = vpop.f32.mrf.mxu2  ;;  %3393 = vmax.xlane.f32.xlu0 %v7450_v29  ;;  %v2895_v31 = vmul.f32 1.442695, %v2861_v24  ;;  %v7509_v44 = vpop.f32.mrf.mxu3 }
 0x723   : > { %2987 = vadd.xlane.f32.xlu2 %v5056_v9  ;;  %8800 = vst [vmem:[#allocation44_spill] sm:$0xff] %v7509_v44 }
 0x724   : > { %v7495_v11 = vpop.eup %5059  ;;  %5063 = vpow2.f32 %v2895_v31 }
 0x725   : > { %v7498_v63 = vpop.eup %5061 }
 0x726   : > { %v3821_v34 = vpack.c.bf16 %v7495_v11, %v7498_v63 }
 0x727   : > { %2735 = vmax.xlane.f32.xlu1 %v7483_v40  ;;  %v3880_v39 = vpop.permute.xlu1 %3879  ;;  %v3380_v56 = vpop.xlane.xlu0 %3379 }
 0x728   : > { %3907 = vmatpush.bf16.msra.mxu0 %v3880_v39 }
 0x72a   : > { %v7493_v46 = vpop.f32.mrf.mxu2  ;;  %v5064_v37 = vpop.eup %5063 }
 0x72b   : > { %2737 = vmax.xlane.f32.xlu2 %v7493_v46  ;;  %v7514_v55 = vpop.f32.mrf.mxu3 }
 0x72c   : > { %3908 = vmatpush.bf16.msra.mxu0 %v3878_v48 }
 0x72f   : > { %3397 = vmax.xlane.f32.xlu1 %v7480_v54  ;;  %3909 = vmatmul.bf16.vlgmr.msra.gmra.mxu0 %v3821_v34 }
 0x732   : > { %v7503_v2 = vpop.f32.mrf.mxu2 }
 0x733   : > { %8798 = vst [vmem:[#allocation40_spill] sm:$0xff] %v7503_v2  ;;  %2739 = vmax.xlane.f32.xlu0 %v7503_v2  ;;  %3399 = vmax.xlane.f32.xlu2 %v7491_v38  ;;  %v7521_v62 = vpop.f32.mrf.mxu3 }
 0x734   : > { %8801 = vst [vmem:[#allocation45_spill] sm:$0xff] %v7521_v62 }
 0x737   : > { %2991 = vadd.xlane.f32.xlu1 %v5064_v37 }
 0x73a   : > { %v7511_v47 = vpop.f32.mrf.mxu2 }
 0x73b   : > { %v7544_v31 = vpop.f32.mrf.mxu3 }
 0x73e   : > { %v7519_v8 = vpop.xlane.xlu0 %2713 }
 0x73f   : > { %2741 = vmax.xlane.f32.xlu1 %v7511_v47 }
 0x746   : > { %v3382_v24 = vpop.xlane.xlu0 %3381 }
 0x74f   : > { %v3378_v51 = vpop.xlane.xlu2 %3377 }
 0x750   : > { %v7517_v59 = vmax.f32 %v7486_v5, %v3378_v51  ;;  %v7551_v51 = vpop.f32.mrf.mxu2 }
 0x751   : > { %8802 = vst [vmem:[#allocation46_spill] sm:$0xff] %v7551_v51 }
 0x752   : > { %v3567_v0 = vsub.f32 %v7358_v16, %v7517_v59  ;;  %v7527_v9 = vpop.xlane.xlu1 %2705 }
 0x753   : > { %v2862_v45 = vsub.f32 %v7352_v22, %v7527_v9  ;;  %v7532_v61 = vmax.f32 %v7527_v9, %v3380_v56 }
 0x754   : > { %v3601_v13 = vmul.f32 1.442695, %v3567_v0 }
 0x755   : > { %v2897_v21 = vmul.f32 1.442695, %v2862_v45  ;;  %v3568_v19 = vsub.f32 %v7368_v4, %v7532_v61 }
 0x757   : > { %v7538_v25 = vpop.xlane.xlu2 %2709  ;;  %v3603_v39 = vmul.f32 1.442695, %v3568_v19  ;;  %5065 = vpow2.f32 %v2897_v21 }
 0x758   : > { %v2864_v16 = vsub.f32 %v7374_v15, %v7538_v25  ;;  %5067 = vpow2.f32 %v3601_v13 }
 0x759   : > { %5069 = vpow2.f32 %v3603_v39 }
 0x75a   : > { %v2901_v22 = vmul.f32 1.442695, %v2864_v16  ;;  %v7542_v48 = vpop.xlane.xlu1 %2707 }
 0x75b   : > { %v2863_v34 = vsub.f32 %v7365_v20, %v7542_v48  ;;  %v7549_v4 = vmax.f32 %v7542_v48, %v3382_v24 }
 0x75c   : > { %5071 = vpow2.f32 %v2901_v22 }
 0x75d   : > { %v5066_v56 = vpop.eup %5065  ;;  %v2899_v15 = vmul.f32 1.442695, %v2863_v34  ;;  %v3569_v39 = vsub.f32 %v7387_v33, %v7549_v4  ;;  %v7568_v34 = vpop.f32.mrf.mxu3 }
 0x75e   : > { %2993 = vadd.xlane.f32.xlu2 %v5066_v56  ;;  %v3084_v13 = vpack.c.bf16 %v5066_v56, %v5064_v37  ;;  %v7557_v21 = vpop.eup %5067  ;;  %8803 = vst [vmem:[#allocation42_spill] sm:$0xff] %v7568_v34  ;;  %v7570_v56 = vpop.xlane.xlu0 %2715 }
 0x75f   : > { %v7555_v45 = vpop.xlane.xlu2 %2711  ;;  %5073 = vpow2.f32 %v2899_v15  ;;  %v7559_v19 = vpop.eup %5069  ;;  %v3605_v15 = vmul.f32 1.442695, %v3569_v39 }
 0x760   : > { %3176 = vmatmul.bf16.gmra.mxu1 %v3084_v13  ;;  %v3822_v16 = vpack.c.bf16 %v7559_v19, %v7557_v21 }
 0x761   : > { %5075 = vpow2.f32 %v3605_v15 }
 0x762   : > { %v5072_v20 = vpop.eup %5071  ;;  %v3384_v22 = vpop.xlane.xlu1 %3383  ;;  %3914 = vmatmul.bf16.gmra.mxu0 %v3822_v16 }
 0x763   : > { %2997 = vadd.xlane.f32.xlu1 %v5072_v20  ;;  %v7566_v24 = vmax.f32 %v7538_v25, %v3384_v22  ;;  %v7579_v16 = vpop.f32.mrf.mxu2  ;;  %v2865_v22 = vsub.f32 %v7378_v49, %v7555_v45  ;;  %v2866_v49 = vsub.f32 %v7382_v14, %v7519_v8 }
 0x764   : > { %8805 = vst [vmem:[#allocation39_spill] sm:$0xff] %v7579_v16 }
 0x765   : > { %v5074_v37 = vpop.eup %5073  ;;  %v3570_v33 = vsub.f32 %v7394_v43, %v7566_v24  ;;  %v2903_v13 = vmul.f32 1.442695, %v2865_v22  ;;  %v2905_v14 = vmul.f32 1.442695, %v2866_v49 }
 0x766   : > { %3401 = vmax.xlane.f32.xlu2 %v7507_v12  ;;  %2995 = vadd.xlane.f32.xlu0 %v5074_v37  ;;  %v3085_v32 = vpack.c.bf16 %v5072_v20, %v5074_v37  ;;  %v7592_v12 = vpop.f32.mrf.mxu3 }
 0x767   : > { %v7577_v0 = vpop.xlane.xlu2 %2721  ;;  %v3607_v35 = vmul.f32 1.442695, %v3570_v33  ;;  %v7590_v26 = vpop.eup %5075  ;;  %8806 = vst [vmem:[#allocation38_spill] sm:$0xff] %v7592_v12 }
 0x768   : > { %8804 = vst [vmem:[#allocation41_spill] sm:$0xff] %v7577_v0 }
 0x769   : > { %5077 = vpow2.f32 %v3607_v35 }
 0x76a   : > { %v7583_v39 = vpop.xlane.xlu1 %2717  ;;  %5079 = vpow2.f32 %v2903_v13  ;;  %v2867_v13 = vsub.f32 %v7389_v50, %v7570_v56 }
 0x76b   : > { %3407 = vmax.xlane.f32.xlu1 %v7521_v62  ;;  %v7601_v33 = vpop.f32.mrf.mxu2  ;;  %5081 = vpow2.f32 %v2905_v14 }
 0x76c   : > { %8808 = vst [vmem:[#allocation48_spill] sm:$0xff] %v7601_v33  ;;  %v2907_v50 = vmul.f32 1.442695, %v2867_v13 }
 0x76e   : > { %v7586_v58 = vpop.xlane.xlu0 %2725  ;;  %2743 = vmax.xlane.f32.xlu2 %v7551_v51  ;;  %2745 = vmax.xlane.f32.xlu0 %v7579_v16 }
 0x76f   : > { %v3388_v43 = vpop.xlane.xlu2 %3387  ;;  %v7599_v15 = vpop.eup %5077 }
 0x770   : > { %v7597_v35 = vmax.f32 %v7519_v8, %v3388_v43  ;;  %3181 = vmatmul.bf16.gmra.mxu1 %v3085_v32  ;;  %v3823_v37 = vpack.c.bf16 %v7599_v15, %v7590_v26  ;;  %v5080_v43 = vpop.eup %5079 }
 0x771   : > { %v5082_v22 = vpop.eup %5081 }
 0x772   : > { %8807 = vst [vmem:[#allocation47_spill] sm:$0xff] %v7597_v35  ;;  %v3572_v20 = vsub.f32 %v7414_v23, %v7597_v35  ;;  %v3386_v62 = vpop.xlane.xlu1 %3385  ;;  %3919 = vmatmul.bf16.gmra.mxu0 %v3823_v37 }
 0x773   : > { %2747 = vmax.xlane.f32.xlu1 %v7601_v33  ;;  %v7613_v32 = vmax.f32 %v7555_v45, %v3386_v62  ;;  %v7624_v62 = vpop.f32.mrf.mxu3  ;;  %v7630_v33 = vpop.f32.mrf.mxu2 }
 0x774   : > { %v3611_v16 = vmul.f32 1.442695, %v3572_v20  ;;  %8811 = vst [vmem:[#allocation51_spill] sm:$0xff] %v7624_v62 }
 0x775   : > { %8809 = vst [vmem:[#allocation49_spill] sm:$0xff] %v7613_v32  ;;  %v3571_v23 = vsub.f32 %v7405_v6, %v7613_v32  ;;  %v2764_v6 = vsub.f32 -inf, %v7453_v10 }
 0x776   : > { %v7619_v51 = vpop.xlane.xlu0 %2727  ;;  %2999 = vadd.xlane.f32.xlu2 %v5080_v43  ;;  %3403 = vmax.xlane.f32.xlu0 %v7509_v44  ;;  %5083 = vpow2.f32 %v3611_v16  ;;  %8812 = vst [vmem:[#allocation52_spill] sm:$0xff] %v7630_v33  ;;  %v2868_v44 = vsub.f32 %v7396_v1, %v7583_v39 }
 0x777   : > { %8810 = vst [vmem:[#allocation50_spill] sm:$0xff] %v7619_v51  ;;  %v7622_v49 = vpop.xlane.xlu2 %2723  ;;  %v3609_v37 = vmul.f32 1.442695, %v3571_v23  ;;  %v3086_v23 = vpack.c.bf16 %v5082_v22, %v5080_v43 }
 0x779   : > { %5085 = vpow2.f32 %v3609_v37  ;;  %v2797_v37 = vmul.f32 1.442695, %v2764_v6 }
 0x77a   : > { %v7626_v20 = vpop.xlane.xlu1 %2719  ;;  %5087 = vpow2.f32 %v2907_v50 }
 0x77b   : > { %3695 = vadd.xlane.f32.xlu1 %v7495_v11  ;;  %5089 = vpow2.f32 %v2797_v37 }
 0x77c   : > { %v7638_v11 = vpop.eup %5083 }
 0x77e   : > { %v3392_v13 = vpop.xlane.xlu0 %3391  ;;  %2749 = vmax.xlane.f32.xlu2 %v7630_v33  ;;  %3001 = vadd.xlane.f32.xlu0 %v5082_v22 }
 0x77f   : > { %v7636_v16 = vmax.f32 %v7583_v39, %v3392_v13  ;;  %v3390_v14 = vpop.xlane.xlu2 %3389  ;;  %v7643_v35 = vpop.eup %5085  ;;  %v2909_v13 = vmul.f32 1.442695, %v2868_v44 }
 0x780   : > { %v7641_v50 = vmax.f32 %v7570_v56, %v3390_v14  ;;  %3186 = vmatmul.bf16.gmra.mxu1 %v3086_v23  ;;  %v5088_v32 = vpop.eup %5087  ;;  %v3824_v6 = vpack.c.bf16 %v7638_v11, %v7643_v35  ;;  %v8814_v14 = vsub.f32 %v7453_v10, %v7469_v57  ;;  %v2763_v23 = vsub.f32 -inf, %v7440_v28 }
 0x781   : > { %8813 = vst [vmem:[#allocation53_spill] sm:$0xff] %v7636_v16  ;;  %v3574_v33 = vsub.f32 %v7434_v18, %v7636_v16  ;;  %v7660_v18 = vpop.f32.mrf.mxu3  ;;  %5091 = vpow2.f32 %v2909_v13  ;;  %v5090_v10 = vpop.eup %5089 }
 0x782   : > { %v3573_v43 = vsub.f32 %v7422_v36, %v7641_v50  ;;  %v3503_v2 = vmul.f32 1.442695, %v8814_v14  ;;  %v7658_v1 = vpop.xlane.xlu1 %2729  ;;  %8816 = vst [vmem:[#allocation55_spill] sm:$0xff] %v7660_v18  ;;  %3924 = vmatmul.bf16.gmra.mxu0 %v3824_v6  ;;  %v2795_v36 = vmul.f32 1.442695, %v2763_v23  ;;  %v8818_v6 = vsub.f32 %v7440_v28, %v7459_v7 }
 0x783   : > { %8815 = vst [vmem:[#allocation54_spill] sm:$0xff] %v7658_v1  ;;  %3003 = vadd.xlane.f32.xlu1 %v5088_v32  ;;  %v3615_v44 = vmul.f32 1.442695, %v3574_v33  ;;  %v7670_v33 = vmul.f32 0.0, %v5090_v10  ;;  %v2870_v28 = vsub.f32 %v7411_v60, %v7577_v0 }
 0x784   : > { %v3613_v22 = vmul.f32 1.442695, %v3573_v43  ;;  %5093 = vpow2.f32 %v3503_v2  ;;  %v3501_v14 = vmul.f32 1.442695, %v8818_v6 }
 0x785   : > { %5095 = vpow2.f32 %v3615_v44 }
 0x786   : > { %3409 = vmax.xlane.f32.xlu2 %v7544_v31  ;;  %3405 = vmax.xlane.f32.xlu0 %v7514_v55  ;;  %5097 = vpow2.f32 %v3613_v22  ;;  %v2869_v22 = vsub.f32 %v7403_v27, %v7626_v20 }
 0x787   : > { %v7668_v37 = vpop.eup %5091  ;;  %5099 = vpow2.f32 %v2795_v36 }
 0x788   : > { %v3087_v36 = vpack.c.bf16 %v7668_v37, %v5088_v32  ;;  %5101 = vpow2.f32 %v3501_v14 }
 0x789   : > { %v7679_v44 = vpop.f32.mrf.mxu3 }
 0x78a   : > { %v7665_v57 = vpop.xlane.xlu1 %2731  ;;  %v7672_v43 = vpop.eup %5093 }
 0x78b   : > { %8817 = vst [vmem:[#allocation56_spill] sm:$0xff] %v7665_v57  ;;  %3413 = vmax.xlane.f32.xlu1 %v7592_v12  ;;  %v7674_v13 = vpop.eup %5095 }
 0x78c   : > { %v7686_v10 = vpop.eup %5097 }
 0x78d   : > { %v2990_v2 = vpop.xlane.xlu0 %2989  ;;  %v5100_v27 = vpop.eup %5099  ;;  %v3825_v6 = vpack.c.bf16 %v7674_v13, %v7686_v10 }
 0x78e   : > { %v3052_v23 = vadd.f32 %v2990_v2, %v7670_v33  ;;  %v7684_v12 = vpop.xlane.xlu2 %2733  ;;  %3697 = vadd.xlane.f32.xlu2 %v7557_v21  ;;  %3693 = vadd.xlane.f32.xlu0 %v7498_v63  ;;  %v2911_v2 = vmul.f32 1.442695, %v2869_v22  ;;  %v2913_v21 = vmul.f32 1.442695, %v2870_v28  ;;  %v2955_v60 = vmul.f32 0.0, %v5100_v27  ;;  %v7713_v27 = vpop.f32.mrf.mxu2 }
 0x78f   : > { %8819 = vst [vmem:[#allocation57_spill] sm:$0xff] %v7684_v12 }
 0x790   : > { %v7694_v7 = vmul.f32 %v7672_v43, %v3052_v23  ;;  %3191 = vmatmul.bf16.gmra.mxu1 %v3087_v36  ;;  %5103 = vpow2.f32 %v2911_v2  ;;  %v2765_v23 = vsub.f32 -inf, %v7486_v5 }
 0x791   : > { %v7711_v28 = vpop.f32.mrf.mxu3  ;;  %5105 = vpow2.f32 %v2913_v21 }
 0x792   : > { %v3396_v16 = vpop.xlane.xlu1 %3395  ;;  %3929 = vmatmul.bf16.gmra.mxu0 %v3825_v6  ;;  %8822 = vst [vmem:[#allocation60_spill] sm:$0xff] %v7711_v28 }
 0x793   : > { %3701 = vadd.xlane.f32.xlu1 %v7590_v26  ;;  %v7700_v63 = vmax.f32 %v7577_v0, %v3396_v16  ;;  %v5102_v16 = vpop.eup %5101 }
 0x795   : > { %8820 = vst [vmem:[#allocation58_spill] sm:$0xff] %v7700_v63  ;;  %v3394_v32 = vpop.xlane.xlu0 %3393  ;;  %v3576_v14 = vsub.f32 %v7465_v3, %v7700_v63 }
 0x796   : > { %v7707_v22 = vmax.f32 %v7626_v20, %v3394_v32  ;;  %v2988_v36 = vpop.xlane.xlu2 %2987  ;;  %3415 = vmax.xlane.f32.xlu2 %v7624_v62  ;;  %3411 = vmax.xlane.f32.xlu0 %v7568_v34  ;;  %v7725_v34 = vpop.eup %5103 }
 0x797   : > { %v3051_v26 = vadd.f32 %v2988_v36, %v2955_v60  ;;  %v3619_v2 = vmul.f32 1.442695, %v3576_v14  ;;  %v2799_v14 = vmul.f32 1.442695, %v2765_v23  ;;  %v5106_v6 = vpop.eup %5105 }
 0x798   : > { %8821 = vst [vmem:[#allocation59_spill] sm:$0xff] %v7707_v22  ;;  %v3575_v3 = vsub.f32 %v7450_v29, %v7707_v22  ;;  %v2871_v29 = vsub.f32 %v7419_v30, %v7622_v49 }
 0x799   : > { %v3172_v32 = vpop.f32.mrf.mxu1  ;;  %v7720_v63 = vmul.f32 %v5102_v16, %v3051_v26  ;;  %5107 = vpow2.f32 %v3619_v2  ;;  %v2872_v26 = vsub.f32 %v7427_v52, %v7586_v58  ;;  %v7740_v23 = vpop.f32.mrf.mxu3 }
 0x79a   : > { %v3617_v62 = vmul.f32 1.442695, %v3575_v3  ;;  %v3252_v36 = vadd.f32 %v3172_v32, %v2955_v60  ;;  %v7722_v0 = vpop.xlane.xlu1 %2735  ;;  %v3088_v60 = vpack.c.bf16 %v5106_v6, %v7725_v34  ;;  %8824 = vst [vmem:[#allocation62_spill] sm:$0xff] %v7740_v23  ;;  %v7742_v2 = vpop.f32.mrf.mxu2  ;;  %v2915_v30 = vmul.f32 1.442695, %v2871_v29 }
 0x79b   : > { %8823 = vst [vmem:[#allocation61_spill] sm:$0xff] %v7722_v0  ;;  %3419 = vmax.xlane.f32.xlu1 %v7679_v44  ;;  %v2917_v52 = vmul.f32 1.442695, %v2872_v26 }
 0x79c   : > { %v7727_v21 = vmul.f32 %v5102_v16, %v3252_v36  ;;  %5109 = vpow2.f32 %v3617_v62 }
 0x79d   : > { %5111 = vpow2.f32 %v2799_v14 }
 0x79e   : > { %v7731_v22 = vpop.xlane.xlu2 %2737  ;;  %3699 = vadd.xlane.f32.xlu0 %v7559_v19  ;;  %3703 = vadd.xlane.f32.xlu2 %v7599_v15  ;;  %v8825_v15 = vsub.f32 %v7486_v5, %v7517_v59  ;;  %5113 = vpow2.f32 %v2915_v30 }
 0x79f   : > { %v7738_v62 = vpop.eup %5107 }
 0x7a0   : > { %3196 = vmatmul.bf16.gmra.mxu1 %v3088_v60  ;;  %v3505_v32 = vmul.f32 1.442695, %v8825_v15 }
 0x7a1   : > { %v3174_v16 = vpop.f32.mrf.mxu1 }
 0x7a2   : > { %v3253_v3 = vadd.f32 %v3174_v16, %v7670_v33  ;;  %v7745_v19 = vpop.eup %5109  ;;  %v3398_v36 = vpop.xlane.xlu1 %3397  ;;  %5115 = vpow2.f32 %v3505_v32 }
 0x7a3   : > { %2753 = vmax.xlane.f32.xlu1 %v7742_v2  ;;  %v7752_v14 = vmax.f32 %v7622_v49, %v3398_v36  ;;  %v3826_v60 = vpack.c.bf16 %v7738_v62, %v7745_v19  ;;  %v5112_v16 = vpop.eup %5111  ;;  %5117 = vpow2.f32 %v2917_v52 }
 0x7a4   : > { %v7757_v29 = vmul.f32 %v7672_v43, %v3253_v3  ;;  %v7775_v32 = vpop.eup %5113 }
 0x7a5   : > { %8826 = vst [vmem:[#allocation63_spill] sm:$0xff] %v7752_v14  ;;  %v3577_v5 = vsub.f32 %v7480_v54, %v7752_v14  ;;  %3934 = vmatmul.bf16.gmra.mxu0 %v3826_v60  ;;  %v7772_v54 = vmul.f32 0.0, %v5112_v16 }
 0x7a6   : > { %v3400_v59 = vpop.xlane.xlu2 %3399  ;;  %2751 = vmax.xlane.f32.xlu0 %v7713_v27  ;;  %3005 = vadd.xlane.f32.xlu2 %v7668_v37  ;;  %v7777_v37 = vpop.f32.mrf.mxu3 }
 0x7a7   : > { %v7766_v26 = vmax.f32 %v7586_v58, %v3400_v59  ;;  %v3621_v43 = vmul.f32 1.442695, %v3577_v5  ;;  %8828 = vst [vmem:[#allocation65_spill] sm:$0xff] %v7777_v37  ;;  %v7784_v59 = vpop.f32.mrf.mxu2 }
 0x7a8   : > { %v7780_v52 = vpop.eup %5115  ;;  %8829 = vst [vmem:[#allocation66_spill] sm:$0xff] %v7784_v59 }
 0x7a9   : > { %8827 = vst [vmem:[#allocation64_spill] sm:$0xff] %v7766_v26  ;;  %v3578_v3 = vsub.f32 %v7491_v38, %v7766_v26  ;;  %5119 = vpow2.f32 %v3621_v43  ;;  %v7782_v5 = vpop.eup %5117  ;;  %v2874_v38 = vsub.f32 %v7447_v17, %v7658_v1  ;;  %v2873_v43 = vsub.f32 %v7436_v42, %v7619_v51  ;;  %v4834_v17 = vld [vmem:[%s8575_s9 + $0x8] sm:$0xff] }
 0x7aa   : > { %v2992_v36 = vpop.xlane.xlu1 %2991  ;;  %4172 = vmatpush.bf16.msra.mxu2 %v4834_v17 }
 0x7ab   : > { %v3623_v15 = vmul.f32 1.442695, %v3578_v3  ;;  %3707 = vadd.xlane.f32.xlu1 %v7638_v11  ;;  %v3053_v60 = vadd.f32 %v2992_v36, %v7772_v54  ;;  %v3089_v11 = vpack.c.bf16 %v7782_v5, %v7775_v32  ;;  %v2921_v3 = vmul.f32 1.442695, %v2874_v38 }
 0x7ac   : > { %v2876_v38 = vsub.f32 %v7471_v53, %v7684_v12 }
 0x7ad   : > { %5121 = vpow2.f32 %v3623_v15  ;;  %v7789_v16 = vmul.f32 %v7780_v52, %v3053_v60  ;;  %v2919_v60 = vmul.f32 1.442695, %v2873_v43 }
 0x7ae   : > { %3417 = vmax.xlane.f32.xlu0 %v7660_v18  ;;  %2755 = vmax.xlane.f32.xlu2 %v7784_v59  ;;  %v7806_v33 = vpop.f32.mrf.mxu3  ;;  %5123 = vpow2.f32 %v2921_v3  ;;  %v2925_v3 = vmul.f32 1.442695, %v2876_v38  ;;  %v8832_v38 = vsub.f32 %v7527_v9, %v7532_v61  ;;  %v8839_v59 = vld [vmem:[#allocation49_spill] sm:$0xff] }
 0x7af   : > { %v7797_v36 = vpop.eup %5119  ;;  %8830 = vst [vmem:[#allocation67_spill] sm:$0xff] %v7806_v33  ;;  %5125 = vpow2.f32 %v2919_v60 }
 0x7b0   : > { %3201 = vmatmul.bf16.gmra.mxu1 %v3089_v11  ;;  %5127 = vpow2.f32 %v2925_v3 }
 0x7b2   : > { %v7848_v61 = vpop.xlane.xlu1 %2741 }
 0x7b3   : > { %3009 = vadd.xlane.f32.xlu1 %v5106_v6  ;;  %v7802_v15 = vpop.eup %5121 }
 0x7b4   : > { %v3827_v30 = vpack.c.bf16 %v7802_v15, %v7797_v36  ;;  %v7811_v42 = vpop.eup %5123 }
 0x7b5   : > { %v7813_v6 = vpop.eup %5125 }
 0x7b6   : > { %3421 = vmax.xlane.f32.xlu2 %v7711_v28  ;;  %3705 = vadd.xlane.f32.xlu0 %v7643_v35  ;;  %v3090_v11 = vpack.c.bf16 %v7811_v42, %v7813_v6  ;;  %v2766_v35 = vsub.f32 -inf, %v7527_v9  ;;  %v7822_v43 = vpop.f32.mrf.mxu3  ;;  %v2878_v9 = vsub.f32 %v7493_v46, %v7731_v22 }
 0x7b7   : > { %3939 = vmatmul.bf16.gmra.mxu0 %v3827_v30  ;;  %v2875_v30 = vsub.f32 %v7461_v41, %v7665_v57  ;;  %v2767_v41 = vsub.f32 -inf, %v7542_v48 }
 0x7b8   : > { %v2801_v17 = vmul.f32 1.442695, %v2766_v35  ;;  %v7839_v35 = vpop.eup %5127 }
 0x7b9   : > { %v2923_v53 = vmul.f32 1.442695, %v2875_v30  ;;  %v2803_v30 = vmul.f32 1.442695, %v2767_v41 }
 0x7ba   : > { %5129 = vpow2.f32 %v2801_v17  ;;  %v8834_v17 = vsub.f32 %v7538_v25, %v7566_v24 }
 0x7bb   : > { %3425 = vmax.xlane.f32.xlu1 %v7777_v37  ;;  %5131 = vpow2.f32 %v2923_v53 }
 0x7bc   : > { %v3511_v53 = vmul.f32 1.442695, %v8834_v17 }
 0x7be   : > { %3709 = vadd.xlane.f32.xlu2 %v7686_v10  ;;  %3007 = vadd.xlane.f32.xlu0 %v7725_v34  ;;  %v2768_v10 = vsub.f32 -inf, %v7538_v25  ;;  %v7828_v34 = vpop.f32.mrf.mxu2  ;;  %v8835_v25 = vsub.f32 %v7542_v48, %v7549_v4 }
 0x7bf   : > { %8831 = vst [vmem:[#allocation68_spill] sm:$0xff] %v7828_v34 }
 0x7c0   : > { %3206 = vmatmul.bf16.gmra.mxu1 %v3090_v11  ;;  %v2805_v60 = vmul.f32 1.442695, %v2768_v10  ;;  %v7836_v11 = vpop.f32.mrf.mxu3  ;;  %v5130_v3 = vpop.eup %5129  ;;  %v3509_v24 = vmul.f32 1.442695, %v8835_v25  ;;  %v2769_v25 = vsub.f32 -inf, %v7555_v45 }
 0x7c1   : > { %8833 = vst [vmem:[#allocation69_spill] sm:$0xff] %v7836_v11  ;;  %v7841_v37 = vpop.eup %5131  ;;  %v7861_v46 = vmul.f32 0.0, %v5130_v3 }
 0x7c2   : > { %5133 = vpow2.f32 %v2805_v60  ;;  %v3091_v10 = vpack.c.bf16 %v7839_v35, %v7841_v37  ;;  %v2877_v60 = vsub.f32 %v7483_v40, %v7722_v0 }
 0x7c3   : > { %3713 = vadd.xlane.f32.xlu1 %v7745_v19  ;;  %v3507_v19 = vmul.f32 1.442695, %v8832_v38 }
 0x7c5   : > { %5135 = vpow2.f32 %v3507_v19 }
 0x7c6   : > { %3427 = vmax.xlane.f32.xlu2 %v7806_v33  ;;  %3423 = vmax.xlane.f32.xlu0 %v7740_v23  ;;  %5137 = vpow2.f32 %v2803_v30  ;;  %v7859_v41 = vpop.f32.mrf.mxu2  ;;  %v2927_v30 = vmul.f32 1.442695, %v2877_v60 }
 0x7c7   : > { %8836 = vst [vmem:[#allocation70_spill] sm:$0xff] %v7859_v41  ;;  %5139 = vpow2.f32 %v3511_v53 }
 0x7c8   : > { %v5134_v38 = vpop.eup %5133  ;;  %5141 = vpow2.f32 %v3509_v24 }
 0x7c9   : > { %v7867_v48 = vmul.f32 0.0, %v5134_v38 }
 0x7cb   : > { %3431 = vmax.xlane.f32.xlu1 %v7836_v11  ;;  %v5136_v40 = vpop.eup %5135  ;;  %v2880_v11 = vsub.f32 %v7511_v47, %v7848_v61  ;;  %v8840_v47 = vsub.f32 %v7555_v45, %v8839_v59 }
 0x7cd   : > { %v3513_v28 = vmul.f32 1.442695, %v8840_v47  ;;  %v8844_v47 = vld [vmem:[#allocation47_spill] sm:$0xff] }
 0x7ce   : > { %3711 = vadd.xlane.f32.xlu0 %v7674_v13  ;;  %3715 = vadd.xlane.f32.xlu2 %v7738_v62  ;;  %v2929_v13 = vmul.f32 1.442695, %v2878_v9  ;;  %v7863_v62 = vpop.xlane.xlu0 %2739 }
 0x7d0   : > { %3211 = vmatmul.bf16.gmra.mxu1 %v3091_v10  ;;  %v5138_v10 = vpop.eup %5137  ;;  %5143 = vpow2.f32 %v2929_v13 }
 0x7d1   : > { %v2994_v19 = vpop.xlane.xlu2 %2993  ;;  %v7874_v9 = vpop.eup %5139  ;;  %5145 = vpow2.f32 %v2927_v30  ;;  %v7877_v60 = vmul.f32 0.0, %v5138_v10  ;;  %v2807_v30 = vmul.f32 1.442695, %v2769_v25  ;;  %v2770_v25 = vsub.f32 -inf, %v7519_v8 }
 0x7d2   : > { %v3054_v17 = vadd.f32 %v2994_v19, %v7861_v46  ;;  %v7882_v13 = vpop.eup %5141 }
 0x7d3   : > { %2759 = vmax.xlane.f32.xlu1 %v7859_v41  ;;  %v7890_v41 = vpop.f32.mrf.mxu2  ;;  %5147 = vpow2.f32 %v2807_v30  ;;  %v7919_v30 = vpop.f32.mrf.mxu3 }
 0x7d4   : > { %v7869_v4 = vmul.f32 %v5136_v40, %v3054_v17  ;;  %v7884_v17 = vpop.f32.mrf.mxu0  ;;  %8837 = vst [vmem:[#allocation71_spill] sm:$0xff] %v7890_v41  ;;  %5149 = vpow2.f32 %v3513_v28 }
 0x7d6   : > { %v2998_v3 = vpop.xlane.xlu1 %2997  ;;  %2757 = vmax.xlane.f32.xlu0 %v7828_v34  ;;  %3011 = vadd.xlane.f32.xlu2 %v7775_v32 }
 0x7d7   : > { %v3056_v53 = vadd.f32 %v2998_v3, %v7867_v48  ;;  %v7888_v3 = vpop.eup %5143 }
 0x7d9   : > { %v7880_v24 = vmul.f32 %v7874_v9, %v3056_v53  ;;  %v3402_v38 = vpop.xlane.xlu2 %3401  ;;  %v2996_v19 = vpop.xlane.xlu0 %2995 }
 0x7da   : > { %v3055_v32 = vadd.f32 %v2996_v19, %v7877_v60  ;;  %v7895_v53 = vpop.eup %5145  ;;  %v8838_v19 = vld [vmem:[#allocation40_spill] sm:$0xff] }
 0x7db   : > { %3719 = vadd.xlane.f32.xlu1 %v7802_v15  ;;  %v3092_v15 = vpack.c.bf16 %v7888_v3, %v7895_v53  ;;  %8841 = vst [vmem:[#allocation40_spill] sm:$0xff] %v7919_v30 }
 0x7dc   : > { %v7893_v10 = vmul.f32 %v7882_v13, %v3055_v32  ;;  %v2879_v32 = vsub.f32 %v8838_v19, %v7863_v62  ;;  %v2771_v19 = vsub.f32 -inf, %v7570_v56  ;;  %v7921_v45 = vpop.f32.mrf.mxu0 }
 0x7dd   : > { %v3177_v34 = vpop.f32.mrf.mxu1 }
 0x7de   : > { %v3408_v23 = vpop.xlane.xlu1 %3407  ;;  %v3254_v33 = vadd.f32 %v3177_v34, %v7772_v54  ;;  %3013 = vadd.xlane.f32.xlu0 %v7782_v5  ;;  %2761 = vmax.xlane.f32.xlu2 %v7890_v41  ;;  %v2933_v54 = vmul.f32 1.442695, %v2880_v11  ;;  %v2809_v41 = vmul.f32 1.442695, %v2770_v25  ;;  %v2931_v18 = vmul.f32 1.442695, %v2879_v32 }
 0x7df   : > { %v2811_v28 = vmul.f32 1.442695, %v2771_v19 }
 0x7e0   : > { %v7911_v26 = vmul.f32 %v7780_v52, %v3254_v33  ;;  %3216 = vmatmul.bf16.gmra.mxu1 %v3092_v15  ;;  %v7924_v33 = vmax.f32 %v7619_v51, %v3402_v38  ;;  %v5148_v52 = vpop.eup %5147  ;;  %5151 = vpow2.f32 %v2933_v54  ;;  %v8845_v54 = vsub.f32 %v7519_v8, %v8844_v47  ;;  %v8849_v47 = vld [vmem:[#allocation46_spill] sm:$0xff] }
 0x7e1   : > { %v7913_v5 = vpop.xlane.xlu2 %2743  ;;  %v7915_v34 = vpop.xlane.xlu0 %2745  ;;  %5153 = vpow2.f32 %v2809_v41  ;;  %v7935_v38 = vmul.f32 0.0, %v5148_v52  ;;  %v7952_v52 = vmax.f32 %v7684_v12, %v3408_v23 }
 0x7e2   : > { %8842 = vst [vmem:[#allocation49_spill] sm:$0xff] %v7924_v33  ;;  %5155 = vpow2.f32 %v2931_v18  ;;  %v3515_v51 = vmul.f32 1.442695, %v8845_v54  ;;  %v8850_v54 = vld [vmem:[#allocation44_spill] sm:$0xff] }
 0x7e3   : > { %3015 = vadd.xlane.f32.xlu1 %v7813_v6  ;;  %v8843_v6 = vld [vmem:[#allocation43_spill] sm:$0xff]  ;;  %8848 = vst [vmem:[#allocation47_spill] sm:$0xff] %v7952_v52  ;;  %5157 = vpow2.f32 %v2811_v28 }
 0x7e4   : > { %v3579_v25 = vsub.f32 %v8843_v6, %v7924_v33  ;;  %v7954_v6 = vpop.f32.mrf.mxu0  ;;  %5159 = vpow2.f32 %v3515_v51  ;;  %v8852_v51 = vld [vmem:[#allocation45_spill] sm:$0xff] }
 0x7e5   : > { %v3179_v59 = vpop.f32.mrf.mxu1 }
 0x7e6   : > { %v7926_v11 = vpop.xlane.xlu1 %2747  ;;  %v3255_v15 = vadd.f32 %v3179_v59, %v7861_v46  ;;  %3429 = vmax.xlane.f32.xlu0 %v7822_v43  ;;  %3433 = vmax.xlane.f32.xlu2 %v7919_v30  ;;  %v7940_v59 = vpop.eup %5149 }
 0x7e7   : > { %v7946_v41 = vpop.eup %5151 }
 0x7e8   : > { %v7933_v32 = vmul.f32 %v5136_v40, %v3255_v15  ;;  %v8847_v40 = vsub.f32 %v7570_v56, %v7641_v50  ;;  %v5154_v8 = vpop.eup %5153  ;;  %v3625_v15 = vmul.f32 1.442695, %v3579_v25  ;;  %v8851_v56 = vld [vmem:[#allocation39_spill] sm:$0xff] }
 0x7e9   : > { %v3000_v14 = vpop.xlane.xlu2 %2999  ;;  %v3404_v46 = vpop.xlane.xlu0 %3403  ;;  %v2882_v50 = vsub.f32 %v8851_v56, %v7915_v34 }
 0x7ea   : > { %v3057_v30 = vadd.f32 %v3000_v14, %v7935_v38  ;;  %v7944_v18 = vmax.f32 %v7658_v1, %v3404_v46  ;;  %v3517_v19 = vmul.f32 1.442695, %v8847_v40  ;;  %v2881_v14 = vsub.f32 %v8849_v47, %v7913_v5  ;;  %v7963_v1 = vpop.eup %5155 }
 0x7ec   : > { %8846 = vst [vmem:[#allocation43_spill] sm:$0xff] %v7944_v18  ;;  %v3580_v46 = vsub.f32 %v8850_v54, %v7944_v18  ;;  %v7961_v33 = vmul.f32 %v7940_v59, %v3057_v30  ;;  %v3093_v30 = vpack.c.bf16 %v7946_v41, %v7963_v1  ;;  %5161 = vpow2.f32 %v3517_v19 }
 0x7ed   : > { %v3182_v23 = vpop.f32.mrf.mxu1  ;;  %v3582_v54 = vsub.f32 %v8852_v51, %v7952_v52  ;;  %5163 = vpow2.f32 %v3625_v15  ;;  %v2935_v56 = vmul.f32 1.442695, %v2881_v14  ;;  %v7988_v15 = vpop.f32.mrf.mxu3 }
 0x7ee   : > { %v3696_v28 = vpop.xlane.xlu1 %3695  ;;  %v3627_v25 = vmul.f32 1.442695, %v3580_v46  ;;  %v3256_v40 = vadd.f32 %v3182_v23, %v7877_v60  ;;  %3017 = vadd.xlane.f32.xlu2 %v7811_v42  ;;  %3717 = vadd.xlane.f32.xlu0 %v7797_v36  ;;  %v7978_v60 = vmul.f32 0.0, %v5154_v8  ;;  %v5158_v42 = vpop.eup %5157  ;;  %v2937_v46 = vmul.f32 1.442695, %v2882_v50  ;;  %8853 = vst [vmem:[#allocation46_spill] sm:$0xff] %v7988_v15 }
 0x7ef   : > { %v3758_v47 = vadd.f32 %v3696_v28, %v7694_v7  ;;  %v7983_v23 = vpop.eup %5159  ;;  %v3631_v28 = vmul.f32 1.442695, %v3582_v54  ;;  %v7990_v8 = vmul.f32 0.0, %v5158_v42  ;;  %v3991_v42 = vadd.f32 %v7921_v45, %v7757_v29 }
 0x7f0   : > { %v7976_v12 = vmul.f32 %v7882_v13, %v3256_v40  ;;  %3221 = vmatmul.bf16.gmra.mxu1 %v3093_v30  ;;  %5165 = vpow2.f32 %v3627_v25  ;;  %v4833_v13 = vld [vmem:[%s8575_s9] sm:$0xff]  ;;  %v7997_v30 = vpop.f32.mrf.mxu0 }
 0x7f1   : > { %v7980_v36 = vpop.xlane.xlu2 %2749  ;;  %v3002_v7 = vpop.xlane.xlu0 %3001  ;;  %5167 = vrcp.f32 %v3758_v47  ;;  %4173 = vmatpush.bf16.msra.mxu2 %v4833_v13 }
 0x7f2   : > { %v3058_v19 = vadd.f32 %v3002_v7, %v7978_v60  ;;  %5169 = vpow2.f32 %v2935_v56  ;;  %v7995_v50 = vpop.eup %5161 }
 0x7f3   : > { %5171 = vpow2.f32 %v2937_v46  ;;  %v5164_v47 = vpop.eup %5163 }
 0x7f4   : > { %v7993_v14 = vmul.f32 %v7983_v23, %v3058_v19  ;;  %5173 = vpow2.f32 %v3631_v28 }
 0x7f5   : > { %v3184_v25 = vpop.f32.mrf.mxu1 }
 0x7f6   : > { %v3004_v40 = vpop.xlane.xlu1 %3003  ;;  %v3257_v51 = vadd.f32 %v3184_v25, %v7867_v48  ;;  %3019 = vadd.xlane.f32.xlu2 %v7841_v37  ;;  %3435 = vmax.xlane.f32.xlu0 %v7988_v15  ;;  %v5166_v56 = vpop.eup %5165 }
 0x7f7   : > { %v3059_v54 = vadd.f32 %v3004_v40, %v7990_v8  ;;  %v5168_v46 = vpop.eup %5167  ;;  %3723 = vadd.xlane.f32.xlu1 %v5166_v56  ;;  %v3828_v19 = vpack.c.bf16 %v5166_v56, %v5164_v47 }
 0x7f8   : > { %v8006_v7 = vmul.f32 %v7874_v9, %v3257_v51  ;;  %v8011_v48 = vmul.f32 %v5168_v46, %v3991_v42  ;;  %v8013_v52 = vpop.eup %5169 }
 0x7f9   : > { %v8009_v13 = vmul.f32 %v7995_v50, %v3059_v54  ;;  %v3410_v37 = vpop.xlane.xlu2 %3409  ;;  %v3406_v25 = vpop.xlane.xlu0 %3405  ;;  %3944 = vmatmul.bf16.gmra.mxu0 %v3828_v19  ;;  %v8856_v54 = vld [vmem:[#allocation52_spill] sm:$0xff] }
 0x7fa   : > { %v8016_v40 = vmax.f32 %v7722_v0, %v3410_v37  ;;  %v8019_v29 = vmax.f32 %v7665_v57, %v3406_v25  ;;  %v8021_v9 = vpop.eup %5171  ;;  %v2884_v56 = vsub.f32 %v8856_v54, %v7980_v36  ;;  %v8857_v37 = vld [vmem:[#allocation48_spill] sm:$0xff] }
 0x7fb   : > { %v5174_v51 = vpop.eup %5173  ;;  %v2883_v25 = vsub.f32 %v8857_v37, %v7926_v11 }
 0x7fc   : > { %8854 = vst [vmem:[#allocation44_spill] sm:$0xff] %v8016_v40  ;;  %v3583_v45 = vsub.f32 %v7544_v31, %v8016_v40  ;;  %v3581_v28 = vsub.f32 %v7514_v55, %v8019_v29  ;;  %v3094_v31 = vpack.c.bf16 %v8021_v9, %v8013_v52  ;;  %v3920_v55 = vpop.f32.mrf.mxu0  ;;  %v2941_v54 = vmul.f32 1.442695, %v2884_v56 }
 0x7fd   : > { %8855 = vst [vmem:[#allocation39_spill] sm:$0xff] %v8019_v29  ;;  %v3187_v42 = vpop.f32.mrf.mxu1  ;;  %v2939_v18 = vmul.f32 1.442695, %v2883_v25 }
 0x7fe   : > { %v8029_v46 = vpop.xlane.xlu1 %3413  ;;  %v3633_v0 = vmul.f32 1.442695, %v3583_v45  ;;  %v3258_v19 = vadd.f32 %v3187_v42, %v7935_v38  ;;  %3721 = vadd.xlane.f32.xlu0 %v5164_v47  ;;  %3727 = vadd.xlane.f32.xlu2 %v5174_v51  ;;  %v3629_v40 = vmul.f32 1.442695, %v3581_v28  ;;  %v2772_v38 = vsub.f32 -inf, %v7583_v39 }
 0x800   : > { %v8037_v29 = vmul.f32 %v7940_v59, %v3258_v19  ;;  %3226 = vmatmul.bf16.gmra.mxu1 %v3094_v31  ;;  %5175 = vpow2.f32 %v3633_v0 }
 0x801   : > { %v3698_v57 = vpop.xlane.xlu2 %3697  ;;  %v3694_v15 = vpop.xlane.xlu0 %3693  ;;  %5177 = vpow2.f32 %v3629_v40 }
 0x802   : > { %v3759_v45 = vadd.f32 %v3698_v57, %v7789_v16  ;;  %v3757_v47 = vadd.f32 %v3694_v15, %v7720_v63  ;;  %v2813_v57 = vmul.f32 1.442695, %v2772_v38  ;;  %v8859_v38 = vld [vmem:[#allocation53_spill] sm:$0xff] }
 0x804   : > { %5179 = vrcp.f32 %v3759_v45 }
 0x805   : > { %5181 = vpow2.f32 %v2941_v54  ;;  %v3189_v28 = vpop.f32.mrf.mxu1 }
 0x806   : > { %v3702_v42 = vpop.xlane.xlu1 %3701  ;;  %5183 = vpow2.f32 %v2939_v18  ;;  %v3259_v59 = vadd.f32 %v3189_v28, %v7978_v60  ;;  %3021 = vadd.xlane.f32.xlu0 %v7839_v35  ;;  %v8045_v56 = vpop.eup %5175  ;;  %v3992_v18 = vadd.f32 %v7954_v6, %v7911_v26  ;;  %v3990_v26 = vadd.f32 %v7884_v17, %v7727_v21  ;;  %v8858_v6 = vld [vmem:[#allocation42_spill] sm:$0xff] }
 0x807   : > { %v3761_v0 = vadd.f32 %v3702_v42, %v7893_v10  ;;  %5185 = vrcp.f32 %v3757_v47  ;;  %3729 = vadd.xlane.f32.xlu2 %v8045_v56  ;;  %v5178_v63 = vpop.eup %5177  ;;  %v8053_v35 = vpop.f32.mrf.mxu0  ;;  %v3994_v28 = vadd.f32 %v3920_v55, %v7976_v12  ;;  %v8087_v55 = vmax.f32 %v7863_v62, %v8029_v46 }
 0x808   : > { %v8048_v16 = vmul.f32 %v7983_v23, %v3259_v59  ;;  %3725 = vadd.xlane.f32.xlu1 %v5178_v63  ;;  %v3829_v37 = vpack.c.bf16 %v5174_v51, %v5178_v63  ;;  %v2773_v23 = vsub.f32 -inf, %v7626_v20  ;;  %v8860_v51 = vsub.f32 %v7583_v39, %v8859_v38 }
 0x809   : > { %5187 = vrcp.f32 %v3761_v0  ;;  %v3416_v15 = vpop.xlane.xlu2 %3415  ;;  %v3412_v60 = vpop.xlane.xlu0 %3411 }
 0x80a   : > { %v5180_v40 = vpop.eup %5179  ;;  %v8056_v10 = vmax.f32 %v7731_v22, %v3412_v60  ;;  %5189 = vpow2.f32 %v2813_v57  ;;  %3949 = vmatmul.bf16.gmra.mxu0 %v3829_v37  ;;  %v3519_v47 = vmul.f32 1.442695, %v8860_v51  ;;  %v8074_v63 = vmax.f32 %v7848_v61, %v3416_v15 }
 0x80b   : > { %v8059_v25 = vpop.eup %5181  ;;  %v8061_v19 = vmul.f32 %v5180_v40, %v3992_v18  ;;  %v2815_v17 = vmul.f32 1.442695, %v2773_v23 }
 0x80c   : > { %v8063_v31 = vpop.eup %5183  ;;  %v3584_v54 = vsub.f32 %v8858_v6, %v8056_v10  ;;  %5191 = vpow2.f32 %v3519_v47 }
 0x80d   : > { %v5186_v45 = vpop.eup %5185  ;;  %v3192_v42 = vpop.f32.mrf.mxu1  ;;  %v3095_v21 = vpack.c.bf16 %v8059_v25, %v8063_v31  ;;  %5193 = vpow2.f32 %v2815_v17 }
 0x80e   : > { %v3420_v59 = vpop.xlane.xlu1 %3419  ;;  %v4054_v57 = vmul.f32 %v5186_v45, %v3990_v26  ;;  %3023 = vadd.xlane.f32.xlu0 %v7895_v53  ;;  %v3635_v60 = vmul.f32 1.442695, %v3584_v54  ;;  %v3260_v39 = vadd.f32 %v3192_v42, %v7990_v8  ;;  %v8863_v45 = vld [vmem:[#allocation59_spill] sm:$0xff] }
 0x80f   : > { %v5188_v0 = vpop.eup %5187  ;;  %v8083_v12 = vmax.f32 %v7915_v34, %v3420_v59  ;;  %3029 = vadd.xlane.f32.xlu2 %v7946_v41  ;;  %v8108_v51 = vpop.f32.mrf.mxu0 }
 0x810   : > { %v8079_v18 = vmul.f32 %v5188_v0, %v3994_v28  ;;  %v4086_v15 = vpack.c.bf16 %v8011_v48, %v4054_v57  ;;  %3231 = vmatmul.bf16.gmra.mxu1 %v3095_v21  ;;  %v5190_v53 = vpop.eup %5189  ;;  %v8092_v40 = vmul.f32 %v7995_v50, %v3260_v39  ;;  %3025 = vadd.xlane.f32.xlu1 %v7888_v3  ;;  %v8861_v48 = vld [vmem:[#allocation41_spill] sm:$0xff]  ;;  %v8862_v50 = vld [vmem:[#allocation51_spill] sm:$0xff]  ;;  %5195 = vpow2.f32 %v3635_v60  ;;  %v8865_v3 = vld [vmem:[#allocation38_spill] sm:$0xff] }
 0x811   : > { %v3492_v8 = vsub.f32 %v7915_v34, %v8083_v12  ;;  %v3588_v37 = vsub.f32 %v7679_v44, %v8083_v12  ;;  %v3700_v23 = vpop.xlane.xlu0 %3699  ;;  %v3704_v26 = vpop.xlane.xlu2 %3703  ;;  %v2774_v46 = vsub.f32 -inf, %v8861_v48  ;;  %v3586_v6 = vsub.f32 %v8862_v50, %v8074_v63 }
 0x812   : > { %4750 = vmatmul.msk.bf16.vlgmr.msra.gmra.mxu2 %vm1937_vm5, %v4086_v15  ;;  %v3760_v41 = vadd.f32 %v3700_v23, %v7869_v4  ;;  %v3762_v54 = vadd.f32 %v3704_v26, %v7880_v24  ;;  %v8864_v44 = vsub.f32 %v7626_v20, %v8863_v45  ;;  %v3585_v47 = vsub.f32 %v8865_v3, %v8087_v55  ;;  %v5192_v21 = vpop.eup %5191 }
 0x813   : > { %v2964_v4 = vmul.f32 0.0, %v5190_v53  ;;  %v3643_v28 = vmul.f32 1.442695, %v3588_v37  ;;  %v2817_v24 = vmul.f32 1.442695, %v2774_v46  ;;  %v5194_v20 = vpop.eup %5193  ;;  %v3993_v53 = vadd.f32 %v7997_v30, %v7933_v32 }
 0x814   : > { %v3521_v38 = vmul.f32 1.442695, %v8864_v44  ;;  %5197 = vrcp.f32 %v3760_v41  ;;  %v3639_v17 = vmul.f32 1.442695, %v3586_v6  ;;  %v3637_v60 = vmul.f32 1.442695, %v3585_v47 }
 0x815   : > { %v3194_v42 = vpop.f32.mrf.mxu1  ;;  %5199 = vrcp.f32 %v3762_v54  ;;  %v8128_v30 = vmul.f32 0.0, %v5194_v20  ;;  %v3995_v6 = vadd.f32 %v8053_v35, %v8006_v7  ;;  %v2782_v12 = vsub.f32 -inf, %v7731_v22 }
 0x816   : > { %v8112_v59 = vpop.xlane.xlu1 %2753  ;;  %v3261_v0 = vadd.f32 %v3194_v42, %v2964_v4  ;;  %5201 = vpow2.f32 %v3521_v38  ;;  %v5196_v15 = vpop.eup %5195 }
 0x817   : > { %v2886_v57 = vsub.f32 %v7742_v2, %v8112_v59  ;;  %3031 = vadd.xlane.f32.xlu2 %v8013_v52  ;;  %5203 = vpow2.f32 %v3643_v28  ;;  %3731 = vadd.xlane.f32.xlu0 %v5196_v15  ;;  %v2775_v52 = vsub.f32 -inf, %v7622_v49  ;;  %v3830_v32 = vpack.c.bf16 %v5196_v15, %v8045_v56  ;;  %v3927_v28 = vpop.f32.mrf.mxu0 }
 0x818   : > { %v8116_v39 = vmul.f32 %v5192_v21, %v3261_v0  ;;  %3027 = vadd.xlane.f32.xlu1 %v7963_v1  ;;  %5205 = vpow2.f32 %v2817_v24 }
 0x819   : > { %v2945_v37 = vmul.f32 1.442695, %v2886_v57  ;;  %v8121_v23 = vpop.xlane.xlu0 %2751  ;;  %v3006_v2 = vpop.xlane.xlu2 %3005  ;;  %5207 = vpow2.f32 %v3639_v17 }
 0x81a   : > { %v5198_v26 = vpop.eup %5197  ;;  %v2885_v41 = vsub.f32 %v7713_v27, %v8121_v23  ;;  %v3060_v46 = vadd.f32 %v3006_v2, %v2964_v4  ;;  %5209 = vpow2.f32 %v3637_v60  ;;  %v8866_v27 = vld [vmem:[#allocation58_spill] sm:$0xff]  ;;  %3954 = vmatmul.bf16.gmra.mxu0 %v3830_v32  ;;  %v8868_v2 = vld [vmem:[#allocation63_spill] sm:$0xff]  ;;  %v3997_v32 = vadd.f32 %v3927_v28, %v8048_v16 }
 0x81b   : > { %v4057_v50 = vmul.f32 %v5198_v26, %v3993_v53  ;;  %v5200_v45 = vpop.eup %5199  ;;  %v8867_v44 = vsub.f32 %v8861_v48, %v8866_v27  ;;  %5211 = vpow2.f32 %v2945_v37  ;;  %v2819_v48 = vmul.f32 1.442695, %v2775_v52 }
 0x81c   : > { %v2943_v54 = vmul.f32 1.442695, %v2885_v41  ;;  %v8132_v1 = vmul.f32 %v5192_v21, %v3060_v46  ;;  %v8138_v4 = vpop.eup %5201  ;;  %v8140_v42 = vmul.f32 %v5200_v45, %v3995_v6  ;;  %v2776_v53 = vsub.f32 -inf, %v7586_v58  ;;  %v8870_v46 = vld [vmem:[#allocation55_spill] sm:$0xff] }
 0x81d   : > { %v3523_v38 = vmul.f32 1.442695, %v8867_v44  ;;  %v3197_v3 = vpop.f32.mrf.mxu1  ;;  %v4087_v47 = vpack.c.bf16 %v4057_v50, %v8061_v19  ;;  %v8144_v0 = vpop.eup %5203  ;;  %v8869_v26 = vsub.f32 %v7622_v49, %v8868_v2 }
 0x81e   : > { %v3708_v56 = vpop.xlane.xlu1 %3707  ;;  %5213 = vpow2.f32 %v2943_v54  ;;  %v3262_v7 = vadd.f32 %v3197_v3, %v8128_v30  ;;  %v5206_v57 = vpop.eup %5205  ;;  %v4088_v24 = vpack.c.bf16 %v8140_v42, %v8079_v18 }
 0x81f   : > { %v3764_v35 = vadd.f32 %v3708_v56, %v7993_v14  ;;  %3739 = vadd.xlane.f32.xlu2 %v8144_v0  ;;  %v5208_v21 = vpop.eup %5207  ;;  %v3525_v41 = vmul.f32 1.442695, %v8869_v26  ;;  %v2966_v50 = vmul.f32 0.0, %v5206_v57  ;;  %v2821_v56 = vmul.f32 1.442695, %v2776_v53  ;;  %v8871_v53 = vld [vmem:[#allocation64_spill] sm:$0xff] }
 0x820   : > { %v8148_v19 = vmul.f32 %v8138_v4, %v3262_v7  ;;  %v5210_v60 = vpop.eup %5209  ;;  %3735 = vadd.xlane.f32.xlu1 %v5208_v21  ;;  %v3930_v7 = vpop.f32.mrf.mxu0 }
 0x821   : > { %5215 = vrcp.f32 %v3764_v35  ;;  %v3418_v17 = vpop.xlane.xlu0 %3417  ;;  %v8152_v20 = vpop.xlane.xlu2 %2755  ;;  %3733 = vadd.xlane.f32.xlu0 %v5210_v60  ;;  %v3831_v26 = vpack.c.bf16 %v5208_v21, %v5210_v60 }
 0x822   : > { %5217 = vpow2.f32 %v3523_v38  ;;  %4751 = vmatmul.msk.bf16.gmra.mxu2 %vm1937_vm5, %v4087_v47  ;;  %v8156_v14 = vmax.f32 %v7913_v5, %v3418_v17  ;;  %v8158_v15 = vpop.eup %5211 }
 0x823   : > { %5219 = vpow2.f32 %v2819_v48 }
 0x824   : > { %v8161_v37 = vpop.eup %5213  ;;  %v3587_v52 = vsub.f32 %v8870_v46, %v8156_v14  ;;  %5221 = vpow2.f32 %v3525_v41  ;;  %v8872_v41 = vsub.f32 %v7586_v58, %v8871_v53 }
 0x825   : > { %v3199_v6 = vpop.f32.mrf.mxu1  ;;  %v3096_v54 = vpack.c.bf16 %v8158_v15, %v8161_v37 }
 0x826   : > { %v3010_v45 = vpop.xlane.xlu1 %3009  ;;  %v3641_v44 = vmul.f32 1.442695, %v3587_v52  ;;  %v3263_v38 = vadd.f32 %v3199_v6, %v2966_v50  ;;  %v3527_v46 = vmul.f32 1.442695, %v8872_v41  ;;  %v8873_v52 = vld [vmem:[#allocation60_spill] sm:$0xff] }
 0x827   : > { %v5216_v27 = vpop.eup %5215  ;;  %3236 = vmatmul.bf16.gmra.mxu1 %v3096_v54  ;;  %v3062_v49 = vadd.f32 %v3010_v45, %v2966_v50 }
 0x828   : > { %v5218_v3 = vpop.eup %5217  ;;  %v8171_v47 = vmul.f32 %v5216_v27, %v3997_v32  ;;  %5223 = vpow2.f32 %v3641_v44 }
 0x829   : > { %v8173_v35 = vmul.f32 %v5218_v3, %v3263_v38  ;;  %v5220_v48 = vpop.eup %5219  ;;  %v3422_v16 = vpop.xlane.xlu2 %3421  ;;  %v8175_v57 = vmul.f32 %v5218_v3, %v3062_v49  ;;  %3033 = vadd.xlane.f32.xlu0 %v8021_v9  ;;  %5225 = vpow2.f32 %v2821_v56  ;;  %v3996_v38 = vadd.f32 %v8108_v51, %v8037_v29 }
 0x82a   : > { %v3706_v28 = vpop.xlane.xlu0 %3705  ;;  %v8178_v17 = vmax.f32 %v7926_v11, %v3422_v16  ;;  %v8187_v32 = vmul.f32 0.0, %v5220_v48  ;;  %3959 = vmatmul.bf16.gmra.mxu0 %v3831_v26  ;;  %v8189_v45 = vpop.eup %5221 }
 0x82b   : > { %v3763_v2 = vadd.f32 %v3706_v28, %v7961_v33  ;;  %v8202_v48 = vpop.f32.mrf.mxu0 }
 0x82c   : > { %v3589_v50 = vsub.f32 %v8873_v52, %v8178_v17 }
 0x82d   : > { %5227 = vrcp.f32 %v3763_v2  ;;  %v3202_v6 = vpop.f32.mrf.mxu1 }
 0x82e   : > { %v3426_v54 = vpop.xlane.xlu1 %3425  ;;  %v3645_v33 = vmul.f32 1.442695, %v3589_v50  ;;  %v3264_v9 = vadd.f32 %v3202_v6, %v8187_v32  ;;  %v5224_v60 = vpop.eup %5223  ;;  %5229 = vpow2.f32 %v3527_v46 }
 0x82f   : > { %v8193_v21 = vmax.f32 %v8121_v23, %v3426_v54  ;;  %3737 = vadd.xlane.f32.xlu1 %v5224_v60  ;;  %v5226_v44 = vpop.eup %5225  ;;  %v3998_v54 = vadd.f32 %v3930_v7, %v8092_v40 }
 0x830   : > { %v8198_v27 = vmul.f32 %v8189_v45, %v3264_v9  ;;  %5231 = vpow2.f32 %v3645_v33  ;;  %v8211_v26 = vmul.f32 0.0, %v5226_v44  ;;  %v3832_v33 = vpack.c.bf16 %v8144_v0, %v5224_v60 }
 0x831   : > { %v3495_v58 = vsub.f32 %v8121_v23, %v8193_v21  ;;  %v3710_v3 = vpop.xlane.xlu2 %3709  ;;  %3035 = vadd.xlane.f32.xlu0 %v8063_v31 }
 0x832   : > { %v3008_v49 = vpop.xlane.xlu0 %3007  ;;  %4752 = vmatmul.msk.bf16.gmra.mxu2 %vm1937_vm5, %v4088_v24  ;;  %v3765_v16 = vadd.f32 %v3710_v3, %v8009_v13 }
 0x833   : > { %v5228_v56 = vpop.eup %5227  ;;  %v3061_v28 = vadd.f32 %v3008_v49, %v8128_v30  ;;  %v8874_v30 = vld [vmem:[#allocation66_spill] sm:$0xff]  ;;  %v3935_v52 = vpop.f32.mrf.mxu0 }
 0x834   : > { %v4060_v2 = vmul.f32 %v5228_v56, %v3996_v38  ;;  %v8215_v46 = vpop.eup %5229  ;;  %5233 = vrcp.f32 %v3765_v16  ;;  %v2887_v24 = vsub.f32 %v8874_v30, %v8152_v20  ;;  %v8875_v38 = vld [vmem:[#allocation67_spill] sm:$0xff]  ;;  %v8876_v49 = vld [vmem:[#allocation62_spill] sm:$0xff]  ;;  %v4000_v16 = vadd.f32 %v3935_v52, %v8148_v19 }
 0x835   : > { %v3671_v29 = vmul.f32 %v8138_v4, %v3061_v28  ;;  %v3204_v51 = vpop.f32.mrf.mxu1 }
 0x836   : > { %v3714_v53 = vpop.xlane.xlu1 %3713  ;;  %v4089_v41 = vpack.c.bf16 %v8171_v47, %v4060_v2  ;;  %v3265_v18 = vadd.f32 %v3204_v51, %v8211_v26  ;;  %v8218_v13 = vpop.eup %5231  ;;  %v2947_v9 = vmul.f32 1.442695, %v2887_v24 }
 0x837   : > { %v3767_v42 = vadd.f32 %v3714_v53, %v3671_v29  ;;  %3037 = vadd.xlane.f32.xlu1 %v8059_v25  ;;  %3741 = vadd.xlane.f32.xlu2 %v8218_v13 }
 0x838   : > { %v8225_v31 = vmul.f32 %v8215_v46, %v3265_v18 }
 0x839   : > { %5235 = vrcp.f32 %v3767_v42  ;;  %v3428_v4 = vpop.xlane.xlu2 %3427  ;;  %v8877_v42 = vld [vmem:[#allocation65_spill] sm:$0xff] }
 0x83a   : > { %v3424_v47 = vpop.xlane.xlu0 %3423  ;;  %v8228_v50 = vmax.f32 %v8112_v59, %v3428_v4  ;;  %v5234_v25 = vpop.eup %5233  ;;  %3964 = vmatmul.bf16.gmra.mxu0 %v3832_v33  ;;  %5237 = vpow2.f32 %v2947_v9  ;;  %v3591_v30 = vsub.f32 %v8877_v42, %v8193_v21 }
 0x83b   : > { %v8231_v6 = vmax.f32 %v7980_v36, %v3424_v47  ;;  %v4062_v28 = vmul.f32 %v5234_v25, %v3998_v54  ;;  %v8878_v25 = vld [vmem:[#allocation68_spill] sm:$0xff] }
 0x83c   : > { %v3592_v3 = vsub.f32 %v8875_v38, %v8228_v50  ;;  %v3649_v47 = vmul.f32 1.442695, %v3591_v30 }
 0x83d   : > { %v3590_v56 = vsub.f32 %v8876_v49, %v8231_v6  ;;  %v8242_v2 = vpop.f32.mrf.mxu1 }
 0x83e   : > { %v3651_v7 = vmul.f32 1.442695, %v3592_v3  ;;  %v3432_v29 = vpop.xlane.xlu1 %3431 }
 0x83f   : > { %v5236_v40 = vpop.eup %5235  ;;  %v3647_v60 = vmul.f32 1.442695, %v3590_v56  ;;  %3039 = vadd.xlane.f32.xlu1 %v8161_v37  ;;  %3041 = vadd.xlane.f32.xlu2 %v8158_v15  ;;  %v3937_v15 = vpop.f32.mrf.mxu0 }
 0x840   : > { %v8244_v0 = vmul.f32 %v5236_v40, %v4000_v16  ;;  %5239 = vpow2.f32 %v3651_v7  ;;  %v5238_v37 = vpop.eup %5237  ;;  %v4001_v33 = vadd.f32 %v3937_v15, %v8173_v35  ;;  %v8879_v7 = vld [vmem:[#allocation69_spill] sm:$0xff]  ;;  %v8880_v15 = vld [vmem:[#allocation70_spill] sm:$0xff] }
 0x841   : > { %v3716_v53 = vpop.xlane.xlu2 %3715  ;;  %5241 = vpow2.f32 %v3647_v60 }
 0x842   : > { %v3712_v51 = vpop.xlane.xlu0 %3711  ;;  %4753 = vmatmul.msk.bf16.gmra.mxu2 %vm1937_vm5, %v4089_v41  ;;  %v3768_v18 = vadd.f32 %v3716_v53, %v8175_v57 }
 0x843   : > { %v3766_v19 = vadd.f32 %v3712_v51, %v8132_v1  ;;  %v3999_v1 = vadd.f32 %v8202_v48, %v8116_v39 }
 0x845   : > { %5243 = vrcp.f32 %v3766_v19  ;;  %v8253_v24 = vpop.f32.mrf.mxu1 }
 0x846   : > { %5245 = vrcp.f32 %v3768_v18  ;;  %v8255_v4 = vpop.eup %5239  ;;  %v8269_v16 = vpop.xlane.xlu1 %2759 }
 0x847   : > { %3747 = vadd.xlane.f32.xlu1 %v8255_v4  ;;  %3043 = vadd.xlane.f32.xlu2 %v5238_v37  ;;  %v5242_v41 = vpop.eup %5241  ;;  %5247 = vpow2.f32 %v3649_v47  ;;  %v8283_v19 = vpop.f32.mrf.mxu0  ;;  %v2889_v47 = vsub.f32 %v8880_v15, %v8269_v16 }
 0x848   : > { %3743 = vadd.xlane.f32.xlu0 %v5242_v41  ;;  %v3833_v39 = vpack.c.bf16 %v5242_v41, %v8218_v13 }
 0x849   : > { %v3012_v52 = vpop.xlane.xlu2 %3011 }
 0x84a   : > { %v8260_v57 = vpop.xlane.xlu0 %2757  ;;  %v3063_v3 = vadd.f32 %v3012_v52, %v8187_v32  ;;  %3969 = vmatmul.bf16.gmra.mxu0 %v3833_v39 }
 0x84b   : > { %v5244_v54 = vpop.eup %5243  ;;  %v2888_v9 = vsub.f32 %v8878_v25, %v8260_v57  ;;  %v8266_v38 = vmax.f32 %v8260_v57, %v3432_v29  ;;  %v2951_v25 = vmul.f32 1.442695, %v2889_v47 }
 0x84c   : > { %v5246_v49 = vpop.eup %5245  ;;  %v4063_v56 = vmul.f32 %v5244_v54, %v3999_v1  ;;  %v3673_v51 = vmul.f32 %v8189_v45, %v3063_v3 }
 0x84d   : > { %v8272_v48 = vmul.f32 %v5246_v49, %v4001_v33  ;;  %v2949_v40 = vmul.f32 1.442695, %v2888_v9  ;;  %v3594_v60 = vsub.f32 %v8879_v7, %v8266_v38  ;;  %v8278_v29 = vpop.f32.mrf.mxu1  ;;  %v5248_v18 = vpop.eup %5247 }
 0x84e   : > { %v4090_v32 = vpack.c.bf16 %v4063_v56, %v4062_v28  ;;  %v8881_v28 = vld [vmem:[#allocation71_spill] sm:$0xff]  ;;  %v3720_v52 = vpop.xlane.xlu1 %3719  ;;  %v3834_v7 = vpack.c.bf16 %v8255_v4, %v5248_v18  ;;  %v8884_v4 = vld [vmem:[#allocation54_spill] sm:$0xff] }
 0x84f   : > { %5249 = vpow2.f32 %v2949_v40  ;;  %v3655_v53 = vmul.f32 1.442695, %v3594_v60  ;;  %v4091_v13 = vpack.c.bf16 %v8272_v48, %v8244_v0  ;;  %v3942_v39 = vpop.f32.mrf.mxu0  ;;  %v8882_v48 = vld [vmem:[#allocation50_spill] sm:$0xff]  ;;  %v8891_v60 = vld [vmem:[#allocation39_spill] sm:$0xff] }
 0x850   : > { %3745 = vadd.xlane.f32.xlu0 %v5248_v18  ;;  %v2777_v40 = vsub.f32 -inf, %v8882_v48  ;;  %v4003_v47 = vadd.f32 %v3942_v39, %v8225_v31  ;;  %v2778_v18 = vsub.f32 -inf, %v8884_v4 }
 0x851   : > { %5251 = vpow2.f32 %v3655_v53  ;;  %v8285_v30 = vpop.xlane.xlu2 %2761 }
 0x852   : > { %v3014_v42 = vpop.xlane.xlu0 %3013  ;;  %4754 = vmatmul.msk.bf16.gmra.mxu2 %vm1937_vm5, %v4090_v32  ;;  %v2890_v41 = vsub.f32 %v8881_v28, %v8285_v30 }
 0x853   : > { %v3064_v45 = vadd.f32 %v3014_v42, %v8211_v26  ;;  %v8883_v42 = vld [vmem:[#allocation40_spill] sm:$0xff] }
 0x854   : > { %v2953_v49 = vmul.f32 1.442695, %v2890_v41  ;;  %v2823_v41 = vmul.f32 1.442695, %v2777_v40  ;;  %v8886_v40 = vld [vmem:[#allocation43_spill] sm:$0xff] }
 0x855   : > { %v5250_v1 = vpop.eup %5249  ;;  %v3674_v0 = vmul.f32 %v8215_v46, %v3064_v45  ;;  %v8294_v54 = vpop.f32.mrf.mxu1 }
 0x856   : > { %v3097_v33 = vpack.c.bf16 %v5250_v1, %v5238_v37 }
 0x857   : > { %v3770_v9 = vadd.f32 %v3720_v52, %v3674_v0  ;;  %v8296_v3 = vpop.eup %5251 }
 0x858   : > { %3241 = vmatmul.bf16.gmra.mxu1 %v3097_v33  ;;  %3751 = vadd.xlane.f32.xlu2 %v8296_v3 }
 0x859   : > { %5253 = vrcp.f32 %v3770_v9  ;;  %v3434_v56 = vpop.xlane.xlu2 %3433  ;;  %3045 = vadd.xlane.f32.xlu0 %v5250_v1  ;;  %v2825_v9 = vmul.f32 1.442695, %v2778_v18 }
 0x85a   : > { %v3430_v26 = vpop.xlane.xlu0 %3429  ;;  %5255 = vpow2.f32 %v2951_v25  ;;  %v8304_v37 = vmax.f32 %v8269_v16, %v3434_v56  ;;  %3974 = vmatmul.bf16.gmra.mxu0 %v3834_v7  ;;  %v3484_v7 = vsub.f32 %v8884_v4, %v8886_v40 }
 0x85b   : > { %v8301_v46 = vmax.f32 %v8152_v20, %v3430_v26  ;;  %5257 = vpow2.f32 %v2953_v49  ;;  %v8885_v49 = vld [vmem:[#allocation49_spill] sm:$0xff] }
 0x85c   : > { %v3595_v15 = vsub.f32 %v8883_v42, %v8304_v37  ;;  %v3483_v26 = vsub.f32 %v8882_v48, %v8885_v49  ;;  %v3531_v18 = vmul.f32 1.442695, %v3484_v7 }
 0x85d   : > { %v3593_v32 = vsub.f32 %v7822_v43, %v8301_v46  ;;  %v8316_v45 = vpop.f32.mrf.mxu1 }
 0x85e   : > { %v3657_v0 = vmul.f32 1.442695, %v3595_v15 }
 0x85f   : > { %v5254_v28 = vpop.eup %5253  ;;  %v3653_v1 = vmul.f32 1.442695, %v3593_v32 }
 0x860   : > { %v4067_v52 = vmul.f32 %v5254_v28, %v4003_v47  ;;  %v5256_v33 = vpop.eup %5255  ;;  %v3529_v47 = vmul.f32 1.442695, %v3483_v26 }
 0x861   : > { %v5258_v43 = vpop.eup %5257  ;;  %5259 = vpow2.f32 %v3653_v1  ;;  %3047 = vadd.xlane.f32.xlu0 %v5256_v33  ;;  %v3018_v42 = vpop.xlane.xlu2 %3017 }
 0x862   : > { %v3718_v25 = vpop.xlane.xlu0 %3717  ;;  %5261 = vpow2.f32 %v2823_v41  ;;  %4755 = vmatmul.msk.bf16.gmra.mxu2 %vm1937_vm5, %v4091_v13  ;;  %v3098_v39 = vpack.c.bf16 %v5258_v43, %v5256_v33  ;;  %v3016_v33 = vpop.xlane.xlu1 %3015 }
 0x863   : > { %v3769_v31 = vadd.f32 %v3718_v25, %v3673_v51  ;;  %5263 = vpow2.f32 %v3657_v0  ;;  %v4002_v51 = vadd.f32 %v8283_v19, %v8198_v27  ;;  %v8888_v19 = vld [vmem:[#allocation57_spill] sm:$0xff] }
 0x864   : > { %v2780_v49 = vsub.f32 -inf, %v8888_v19 }
 0x865   : > { %5265 = vrcp.f32 %v3769_v31  ;;  %v8322_v56 = vpop.f32.mrf.mxu1 }
 0x866   : > { %5267 = vpow2.f32 %v2825_v9  ;;  %v8887_v9 = vld [vmem:[#allocation46_spill] sm:$0xff] }
 0x867   : > { %v5260_v32 = vpop.eup %5259  ;;  %5269 = vpow2.f32 %v3529_v47 }
 0x868   : > { %3246 = vmatmul.bf16.gmra.mxu1 %v3098_v39  ;;  %v5262_v15 = vpop.eup %5261  ;;  %3749 = vadd.xlane.f32.xlu1 %v5260_v32  ;;  %v3835_v48 = vpack.c.bf16 %v8296_v3, %v5260_v32  ;;  %5271 = vpow2.f32 %v3531_v18  ;;  %v8889_v32 = vld [vmem:[#allocation56_spill] sm:$0xff] }
 0x869   : > { %v5264_v13 = vpop.eup %5263  ;;  %v2969_v27 = vmul.f32 0.0, %v5262_v15  ;;  %v2779_v47 = vsub.f32 -inf, %v8889_v32  ;;  %v2786_v15 = vsub.f32 -inf, %v7915_v34 }
 0x86a   : > { %v3436_v28 = vpop.xlane.xlu0 %3435  ;;  %3753 = vadd.xlane.f32.xlu2 %v5264_v13  ;;  %3979 = vmatmul.bf16.gmra.mxu0 %v3835_v48  ;;  %v3724_v18 = vpop.xlane.xlu1 %3723 }
 0x86b   : > { %v5266_v41 = vpop.eup %5265  ;;  %v8330_v1 = vmax.f32 %v8285_v30, %v3436_v28  ;;  %v3065_v7 = vadd.f32 %v3016_v33, %v2969_v27 }
 0x86c   : > { %v4066_v4 = vmul.f32 %v5266_v41, %v4002_v51  ;;  %v5268_v0 = vpop.eup %5267  ;;  %v2829_v51 = vmul.f32 1.442695, %v2780_v49  ;;  %v3020_v41 = vpop.xlane.xlu2 %3019 }
 0x86d   : > { %v3596_v31 = vsub.f32 %v8887_v9, %v8330_v1  ;;  %v8337_v3 = vpop.f32.mrf.mxu1  ;;  %v2970_v40 = vmul.f32 0.0, %v5268_v0  ;;  %v5270_v9 = vpop.eup %5269 }
 0x86e   : > { %v4092_v26 = vpack.c.bf16 %v4067_v52, %v4066_v4  ;;  %v3675_v48 = vmul.f32 %v5270_v9, %v3065_v7  ;;  %v5272_v53 = vpop.eup %5271  ;;  %v2827_v52 = vmul.f32 1.442695, %v2779_v47  ;;  %v8890_v4 = vld [vmem:[#allocation47_spill] sm:$0xff] }
 0x86f   : > { %v3659_v39 = vmul.f32 1.442695, %v3596_v31  ;;  %v3066_v28 = vadd.f32 %v3018_v42, %v2970_v40  ;;  %v3486_v0 = vsub.f32 %v8888_v19, %v8890_v4  ;;  %v2841_v42 = vmul.f32 1.442695, %v2786_v15 }
 0x870   : > { %3049 = vadd.xlane.f32.xlu1 %v5258_v43  ;;  %v3266_v19 = vadd.f32 %v8242_v2, %v2969_v27 }
 0x871   : > { %5273 = vpow2.f32 %v3659_v39  ;;  %v3676_v33 = vmul.f32 %v5272_v53, %v3066_v28  ;;  %v3535_v7 = vmul.f32 1.442695, %v3486_v0 }
 0x872   : > { %v3722_v25 = vpop.xlane.xlu0 %3721  ;;  %4756 = vmatmul.msk.bf16.gmra.mxu2 %vm1937_vm5, %v4092_v26  ;;  %5275 = vpow2.f32 %v2829_v51  ;;  %v3485_v26 = vsub.f32 %v8889_v32, %v8891_v60  ;;  %v3267_v51 = vadd.f32 %v8253_v24, %v2970_v40  ;;  %v3547_v60 = vmul.f32 1.442695, %v3492_v8 }
 0x873   : > { %v3771_v43 = vadd.f32 %v3722_v25, %v3675_v48  ;;  %v3772_v39 = vadd.f32 %v3724_v18, %v3676_v33  ;;  %5277 = vpow2.f32 %v2827_v52  ;;  %v8892_v18 = vld [vmem:[#allocation61_spill] sm:$0xff]  ;;  %v3803_v27 = vmul.f32 %v5270_v9, %v3266_v19 }
 0x874   : > { %v3728_v28 = vpop.xlane.xlu2 %3727  ;;  %v3533_v15 = vmul.f32 1.442695, %v3485_v26  ;;  %v2781_v2 = vsub.f32 -inf, %v8892_v18  ;;  %v3804_v24 = vmul.f32 %v5272_v53, %v3267_v51  ;;  %v2833_v51 = vmul.f32 1.442695, %v2782_v12 }
 0x875   : > { %v8344_v31 = vpop.f32.mrf.mxu1  ;;  %5279 = vrcp.f32 %v3771_v43 }
 0x876   : > { %v3945_v35 = vpop.f32.mrf.mxu0  ;;  %5281 = vpow2.f32 %v2841_v42  ;;  %v2831_v8 = vmul.f32 1.442695, %v2781_v2 }
 0x877   : > { %v5274_v49 = vpop.eup %5273  ;;  %5283 = vrcp.f32 %v3772_v39  ;;  %v4004_v33 = vadd.f32 %v3945_v35, %v3803_v27  ;;  %v8893_v27 = vld [vmem:[#allocation44_spill] sm:$0xff] }
 0x878   : > { %3755 = vadd.xlane.f32.xlu0 %v5274_v49  ;;  %v3836_v44 = vpack.c.bf16 %v5274_v49, %v5264_v13  ;;  %v5276_v25 = vpop.eup %5275  ;;  %5285 = vpow2.f32 %v3535_v7 }
 0x879   : > { %v5278_v52 = vpop.eup %5277  ;;  %v2972_v13 = vmul.f32 0.0, %v5276_v25  ;;  %5287 = vpow2.f32 %v3533_v15 }
 0x87a   : > { %v3022_v47 = vpop.xlane.xlu0 %3021  ;;  %3984 = vmatmul.bf16.gmra.mxu0 %v3836_v44  ;;  %5289 = vpow2.f32 %v3547_v60  ;;  %v2971_v34 = vmul.f32 0.0, %v5278_v52  ;;  %v3487_v60 = vsub.f32 %v8892_v18, %v8893_v27  ;;  %v2789_v27 = vsub.f32 -inf, %v8121_v23 }
 0x87b   : > { %v3726_v32 = vpop.xlane.xlu1 %3725  ;;  %v5280_v40 = vpop.eup %5279  ;;  %v3068_v43 = vadd.f32 %v3022_v47, %v2972_v13  ;;  %5291 = vpow2.f32 %v2831_v8  ;;  %v3269_v12 = vadd.f32 %v8294_v54, %v2972_v13 }
 0x87c   : > { %v5282_v0 = vpop.eup %5281  ;;  %v4068_v44 = vmul.f32 %v5280_v40, %v4004_v33  ;;  %v3067_v7 = vadd.f32 %v3020_v41, %v2971_v34  ;;  %v3730_v15 = vpop.xlane.xlu2 %3729  ;;  %5293 = vpow2.f32 %v2833_v51  ;;  %v3537_v18 = vmul.f32 1.442695, %v3487_v60 }
 0x87d   : > { %v8353_v48 = vpop.f32.mrf.mxu1  ;;  %v5284_v49 = vpop.eup %5283  ;;  %v8357_v19 = vmul.f32 0.0, %v5282_v0  ;;  %v3488_v0 = vsub.f32 %v7731_v22, %v8056_v10 }
 0x87e   : > { %v3947_v4 = vpop.f32.mrf.mxu0  ;;  %v5286_v26 = vpop.eup %5285 }
 0x87f   : > { %v4005_v42 = vadd.f32 %v3947_v4, %v3804_v24  ;;  %v3678_v9 = vmul.f32 %v5286_v26, %v3068_v43  ;;  %v5288_v47 = vpop.eup %5287  ;;  %v3539_v8 = vmul.f32 1.442695, %v3488_v0 }
 0x880   : > { %v8363_v2 = vpop.eup %5289  ;;  %v3677_v41 = vmul.f32 %v5288_v47, %v3067_v7 }
 0x881   : > { %v4069_v39 = vmul.f32 %v5284_v49, %v4005_v42  ;;  %v3774_v40 = vadd.f32 %v3728_v28, %v3678_v9  ;;  %v3268_v42 = vadd.f32 %v8278_v29, %v2971_v34  ;;  %v5292_v49 = vpop.eup %5291  ;;  %v2784_v9 = vsub.f32 -inf, %v7848_v61 }
 0x882   : > { %v3024_v25 = vpop.xlane.xlu0 %3023  ;;  %v3773_v33 = vadd.f32 %v3726_v32, %v3677_v41  ;;  %v2973_v7 = vmul.f32 0.0, %v5292_v49  ;;  %v3806_v32 = vmul.f32 %v5286_v26, %v3269_v12  ;;  %v2783_v29 = vsub.f32 -inf, %v7863_v62 }
 0x883   : > { %v4093_v53 = vpack.c.bf16 %v4069_v39, %v4068_v44  ;;  %v3026_v24 = vpop.xlane.xlu1 %3025  ;;  %5295 = vrcp.f32 %v3774_v40  ;;  %v3805_v28 = vmul.f32 %v5288_v47, %v3268_v42  ;;  %v5294_v39 = vpop.eup %5293  ;;  %v2847_v49 = vmul.f32 1.442695, %v2789_v27 }
 0x884   : > { %5297 = vrcp.f32 %v3773_v33  ;;  %v8373_v22 = vpop.xlane.xlu2 %3029  ;;  %v3069_v34 = vadd.f32 %v3024_v25, %v2973_v7  ;;  %v2974_v51 = vmul.f32 0.0, %v5294_v39  ;;  %v2835_v33 = vmul.f32 1.442695, %v2783_v29 }
 0x885   : > { %v3229_v35 = vpop.f32.mrf.mxu1  ;;  %4757 = vmatmul.msk.bf16.gmra.mxu2 %vm1937_vm5, %v4093_v53  ;;  %5299 = vpow2.f32 %v3537_v18  ;;  %v2790_v29 = vsub.f32 -inf, %v8112_v59 }
 0x886   : > { %v3275_v52 = vadd.f32 %v3229_v35, %v8357_v19  ;;  %5301 = vpow2.f32 %v3539_v8  ;;  %v3070_v40 = vadd.f32 %v3026_v24, %v2974_v51  ;;  %v3490_v8 = vsub.f32 %v7848_v61, %v8074_v63 }
 0x887   : > { %v3950_v43 = vpop.f32.mrf.mxu0  ;;  %v3489_v24 = vsub.f32 %v7863_v62, %v8087_v55  ;;  %v3553_v63 = vmul.f32 1.442695, %v3495_v58 }
 0x888   : > { %v8366_v4 = vmul.f32 %v8363_v2, %v3275_v52  ;;  %v4006_v10 = vadd.f32 %v3950_v43, %v3805_v28  ;;  %v2837_v52 = vmul.f32 1.442695, %v2784_v9 }
 0x889   : > { %v5296_v13 = vpop.eup %5295  ;;  %v3541_v55 = vmul.f32 1.442695, %v3489_v24 }
 0x88a   : > { %v3732_v44 = vpop.xlane.xlu0 %3731  ;;  %v5298_v60 = vpop.eup %5297  ;;  %5303 = vpow2.f32 %v2837_v52 }
 0x88b   : > { %v8376_v53 = vpop.xlane.xlu1 %3027  ;;  %v5300_v41 = vpop.eup %5299  ;;  %v4070_v0 = vmul.f32 %v5298_v60, %v4006_v10  ;;  %5305 = vpow2.f32 %v2835_v33  ;;  %v8895_v60 = vld [vmem:[#allocation6_spill] sm:$0xff] }
 0x88c   : > { %v3679_v43 = vmul.f32 %v5300_v41, %v3069_v34  ;;  %v5302_v12 = vpop.eup %5301  ;;  %v8388_v9 = vpop.xlane.xlu2 %3031  ;;  %5307 = vpow2.f32 %v2847_v49  ;;  %v3543_v34 = vmul.f32 1.442695, %v3490_v8 }
 0x88d   : > { %v8378_v35 = vpop.f32.mrf.mxu1  ;;  %v3680_v28 = vmul.f32 %v5302_v12, %v3070_v40 }
 0x88e   : > { %v3775_v39 = vadd.f32 %v3730_v15, %v3679_v43  ;;  %v3271_v15 = vadd.f32 %v8322_v56, %v2974_v51 }
 0x88f   : > { %v3952_v54 = vpop.f32.mrf.mxu0  ;;  %v3776_v10 = vadd.f32 %v3732_v44, %v3680_v28 }
 0x890   : > { %v4007_v47 = vadd.f32 %v3952_v54, %v3806_v32  ;;  %v3270_v54 = vadd.f32 %v8316_v45, %v2973_v7  ;;  %v5304_v62 = vpop.eup %5303  ;;  %5309 = vrcp.f32 %v3775_v39  ;;  %v2849_v45 = vmul.f32 1.442695, %v2790_v29 }
 0x891   : > { %5311 = vrcp.f32 %v3776_v10  ;;  %v5306_v7 = vpop.eup %5305  ;;  %v2976_v58 = vmul.f32 0.0, %v5304_v62  ;;  %v3808_v43 = vmul.f32 %v5302_v12, %v3271_v15  ;;  %v8896_v10 = vsub.f32 %v8112_v59, %v8228_v50  ;;  %v8897_v15 = vld [vmem:[#allocation8_spill] sm:$0xff] }
 0x892   : > { %v4071_v26 = vmul.f32 %v5296_v13, %v4007_v47  ;;  %v8894_v47 = vld [vmem:[#allocation5_spill] sm:$0xff]  ;;  %5313 = vpow2.f32 %v3543_v34  ;;  %v5308_v21 = vpop.eup %5307 }
 0x893   : > { %v3736_v61 = vpop.xlane.xlu1 %3735  ;;  %5315 = vpow2.f32 %v3553_v63  ;;  %v8410_v24 = vmul.f32 0.0, %v5308_v21 }
 0x894   : > { %v4094_v25 = vpack.c.bf16 %v4071_v26, %v4070_v0  ;;  %v8381_v42 = vpop.xlane.xlu0 %3733  ;;  %v3807_v0 = vmul.f32 %v5300_v41, %v3270_v54  ;;  %v2785_v26 = vsub.f32 -inf, %v7913_v5  ;;  %5317 = vpow2.f32 %v3541_v55  ;;  %v8406_v8 = vpop.xlane.xlu2 %3739 }
 0x895   : > { %v4175_v18 = vpop.f32.mrf.mxu2  ;;  %v8395_v13 = vpop.f32.mrf.mxu1  ;;  %5319 = vpow2.f32 %v2849_v45  ;;  %v3072_v41 = vadd.f32 %v8373_v22, %v2976_v58  ;;  %v3491_v45 = vsub.f32 %v7913_v5, %v8156_v14 }
 0x896   : > { %4758 = vmatmul.msk.bf16.gmra.mxu2 %vm1937_vm5, %v4094_v25  ;;  %v4176_v27 = vadd.f32 %v4175_v18, %v8894_v47  ;;  %v2975_v18 = vmul.f32 0.0, %v5306_v7  ;;  %v5310_v49 = vpop.eup %5309  ;;  %v2839_v34 = vmul.f32 1.442695, %v2785_v26 }
 0x897   : > { %v3955_v32 = vpop.f32.mrf.mxu0  ;;  %v5312_v39 = vpop.eup %5311 }
 0x898   : > { %v4008_v51 = vadd.f32 %v3955_v32, %v3807_v0  ;;  %v3071_v12 = vadd.f32 %v8376_v53, %v2975_v18  ;;  %v5314_v29 = vpop.eup %5313  ;;  %v3272_v21 = vadd.f32 %v8337_v3, %v2975_v18  ;;  %v2787_v18 = vsub.f32 -inf, %v7926_v11 }
 0x899   : > { %v5316_v55 = vpop.eup %5315 }
 0x89a   : > { %v4072_v54 = vmul.f32 %v5310_v49, %v4008_v51  ;;  %v5318_v47 = vpop.eup %5317  ;;  %v3545_v49 = vmul.f32 1.442695, %v3491_v45 }
 0x89b   : > { %v5320_v59 = vpop.eup %5319  ;;  %v3681_v50 = vmul.f32 %v5318_v47, %v3071_v12  ;;  %v2788_v12 = vsub.f32 -inf, %v7980_v36 }
 0x89c   : > { %v3034_v40 = vpop.xlane.xlu0 %3033 }
 0x89d   : > { %v4177_v44 = vpop.f32.mrf.mxu2  ;;  %v3074_v23 = vadd.f32 %v3034_v40, %v8357_v19  ;;  %v2791_v40 = vsub.f32 -inf, %v8152_v20  ;;  %v3777_v0 = vadd.f32 %v8381_v42, %v3681_v50 }
 0x89e   : > { %v4178_v52 = vadd.f32 %v4177_v44, %v8895_v60 }
 0x89f   : > { %v8403_v33 = vmul.f32 %v8363_v2, %v3074_v23  ;;  %v3957_v25 = vpop.f32.mrf.mxu0  ;;  %v3555_v2 = vmul.f32 1.442695, %v8896_v10  ;;  %v3809_v10 = vmul.f32 %v5318_v47, %v3272_v21 }
 0x8a0   : > { %v4293_v56 = vadd.f32 %v4178_v52, %v4176_v27  ;;  %v4009_v19 = vadd.f32 %v3957_v25, %v3808_v43  ;;  %v3682_v27 = vmul.f32 %v5314_v29, %v3072_v41  ;;  %v2982_v43 = vmul.f32 0.0, %v5320_v59 }
 0x8a1   : > { %5321 = vpow2.f32 %v3555_v2  ;;  %v2851_v25 = vmul.f32 1.442695, %v2791_v40  ;;  %v3273_v41 = vadd.f32 %v8344_v31, %v2976_v58 }
 0x8a2   : > { %v8408_v28 = vpop.xlane.xlu1 %3737  ;;  %v4073_v63 = vmul.f32 %v5312_v39, %v4009_v19  ;;  %5323 = vpow2.f32 %v2839_v34  ;;  %v3778_v7 = vadd.f32 %v3736_v61, %v3682_v27  ;;  %v8898_v19 = vld [vmem:[#allocation7_spill] sm:$0xff] }
 0x8a3   : > { %v3810_v31 = vmul.f32 %v5314_v29, %v3273_v41  ;;  %v3780_v41 = vadd.f32 %v8406_v8, %v8403_v33 }
 0x8a4   : > { %v3237_v32 = vpop.f32.mrf.mxu1  ;;  %v4095_v60 = vpack.c.bf16 %v4073_v63, %v4072_v54  ;;  %5325 = vrcp.f32 %v3778_v7  ;;  %v8899_v63 = vsub.f32 %v8152_v20, %v8301_v46  ;;  %v3036_v40 = vpop.xlane.xlu0 %3035 }
 0x8a5   : > { %v4180_v22 = vpop.f32.mrf.mxu2  ;;  %v3278_v62 = vadd.f32 %v3237_v32, %v8410_v24  ;;  %5327 = vrcp.f32 %v3777_v0 }
 0x8a6   : > { %v4181_v44 = vadd.f32 %v4180_v22, %v8897_v15  ;;  %4759 = vmatmul.msk.bf16.gmra.mxu2 %vm1937_vm5, %v4095_v60  ;;  %5329 = vpow2.f32 %v2851_v25  ;;  %v3557_v22 = vmul.f32 1.442695, %v8899_v63  ;;  %v2843_v60 = vmul.f32 1.442695, %v2787_v18 }
 0x8a7   : > { %v8418_v52 = vmul.f32 %v5316_v55, %v3278_v62  ;;  %v3960_v23 = vpop.f32.mrf.mxu0  ;;  %v5322_v61 = vpop.eup %5321  ;;  %5331 = vpow2.f32 %v3545_v49  ;;  %v3494_v49 = vsub.f32 %v7980_v36, %v8231_v6 }
 0x8a8   : > { %v4294_v53 = vadd.f32 %v4293_v56, %v4181_v44  ;;  %v5324_v39 = vpop.eup %5323  ;;  %v4010_v32 = vadd.f32 %v3960_v23, %v3809_v10  ;;  %v8900_v23 = vld [vmem:[#allocation10_spill] sm:$0xff]  ;;  %5333 = vpow2.f32 %v3557_v22 }
 0x8a9   : > { %v2977_v58 = vmul.f32 0.0, %v5324_v39  ;;  %5335 = vpow2.f32 %v2843_v60  ;;  %v3551_v6 = vmul.f32 1.442695, %v3494_v49  ;;  %v8904_v49 = vsub.f32 %v8269_v16, %v8304_v37 }
 0x8aa   : > { %v8426_v26 = vpop.xlane.xlu2 %3741  ;;  %v8428_v51 = vpop.xlane.xlu1 %3037 }
 0x8ab   : > { %v5326_v54 = vpop.eup %5325  ;;  %v3073_v27 = vadd.f32 %v8388_v9, %v2977_v58  ;;  %v3493_v9 = vsub.f32 %v7926_v11, %v8178_v17  ;;  %v2792_v17 = vsub.f32 -inf, %v8260_v57 }
 0x8ac   : > { %v3239_v56 = vpop.f32.mrf.mxu1  ;;  %v5328_v47 = vpop.eup %5327 }
 0x8ad   : > { %v4182_v5 = vpop.f32.mrf.mxu2  ;;  %v3279_v14 = vadd.f32 %v3239_v56, %v2982_v43  ;;  %v4074_v29 = vmul.f32 %v5328_v47, %v4010_v32  ;;  %v5330_v0 = vpop.eup %5329 }
 0x8ae   : > { %v4183_v42 = vadd.f32 %v4182_v5, %v8898_v19  ;;  %v5332_v56 = vpop.eup %5331  ;;  %v3549_v19 = vmul.f32 1.442695, %v3493_v9 }
 0x8af   : > { %v8432_v3 = vmul.f32 %v5322_v61, %v3279_v14  ;;  %v3962_v34 = vpop.f32.mrf.mxu0  ;;  %v8454_v14 = vmul.f32 0.0, %v5330_v0  ;;  %v8459_v36 = vpop.eup %5333 }
 0x8b0   : > { %v4295_v2 = vadd.f32 %v4294_v53, %v4183_v42  ;;  %v4011_v62 = vadd.f32 %v3962_v34, %v3810_v31  ;;  %v2845_v53 = vmul.f32 1.442695, %v2788_v12  ;;  %v5336_v39 = vpop.eup %5335  ;;  %v2853_v12 = vmul.f32 1.442695, %v2792_v17 }
 0x8b1   : > { %v2979_v31 = vmul.f32 0.0, %v5336_v39 }
 0x8b2   : > { %v3042_v15 = vpop.xlane.xlu2 %3041  ;;  %v3040_v44 = vpop.xlane.xlu1 %3039  ;;  %v4075_v45 = vmul.f32 %v5326_v54, %v4011_v62  ;;  %5337 = vpow2.f32 %v2845_v53 }
 0x8b3   : > { %v3078_v59 = vadd.f32 %v3042_v15, %v2982_v43  ;;  %v3077_v50 = vadd.f32 %v3040_v44, %v8410_v24  ;;  %v3683_v24 = vmul.f32 %v5332_v56, %v3073_v27  ;;  %5339 = vrcp.f32 %v3780_v41 }
 0x8b4   : > { %v4096_v25 = vpack.c.bf16 %v4075_v45, %v4074_v29  ;;  %v3075_v22 = vadd.f32 %v3036_v40, %v2979_v31  ;;  %v2793_v15 = vsub.f32 -inf, %v8269_v16  ;;  %v8902_v27 = vsub.f32 %v8260_v57, %v8266_v38 }
 0x8b5   : > { %v4185_v7 = vpop.f32.mrf.mxu2  ;;  %v8442_v20 = vmul.f32 %v5322_v61, %v3078_v59  ;;  %v8444_v46 = vmul.f32 %v5316_v55, %v3077_v50  ;;  %v3779_v55 = vadd.f32 %v8408_v28, %v3683_v24  ;;  %v3274_v61 = vadd.f32 %v8353_v48, %v2977_v58  ;;  %v8901_v28 = vld [vmem:[#allocation9_spill] sm:$0xff] }
 0x8b6   : > { %v4186_v21 = vadd.f32 %v4185_v7, %v8900_v23  ;;  %4760 = vmatmul.msk.bf16.gmra.mxu2 %vm1937_vm5, %v4096_v25  ;;  %v3559_v60 = vmul.f32 1.442695, %v8902_v27  ;;  %v8903_v7 = vld [vmem:[#allocation11_spill] sm:$0xff]  ;;  %v3276_v24 = vadd.f32 %v8378_v35, %v2979_v31  ;;  %v3561_v41 = vmul.f32 1.442695, %v8904_v49 }
 0x8b7   : > { %v3965_v5 = vpop.f32.mrf.mxu0  ;;  %5341 = vrcp.f32 %v3779_v55  ;;  %v2794_v16 = vsub.f32 -inf, %v8285_v30 }
 0x8b8   : > { %v4296_v43 = vadd.f32 %v4295_v2, %v4186_v21  ;;  %v5338_v48 = vpop.eup %5337  ;;  %v3811_v2 = vmul.f32 %v5332_v56, %v3274_v61  ;;  %5343 = vpow2.f32 %v3549_v19  ;;  %v2855_v21 = vmul.f32 1.442695, %v2793_v15 }
 0x8b9   : > { %5345 = vpow2.f32 %v3551_v6  ;;  %v2980_v34 = vmul.f32 0.0, %v5338_v48  ;;  %v5340_v63 = vpop.eup %5339 }
 0x8ba   : > { %v3044_v11 = vpop.xlane.xlu2 %3043  ;;  %v4012_v58 = vadd.f32 %v3965_v5, %v3811_v2  ;;  %5347 = vpow2.f32 %v2853_v12 }
 0x8bb   : > { %v3079_v42 = vadd.f32 %v3044_v11, %v8454_v14  ;;  %v3744_v33 = vpop.xlane.xlu0 %3743  ;;  %v3076_v47 = vadd.f32 %v8428_v51, %v2980_v34  ;;  %5349 = vpow2.f32 %v3559_v60  ;;  %v3277_v55 = vadd.f32 %v8395_v13, %v2980_v34  ;;  %v8905_v11 = vld [vmem:[#allocation12_spill] sm:$0xff] }
 0x8bc   : > { %5351 = vpow2.f32 %v2855_v21  ;;  %v8908_v21 = vld [vmem:[#allocation14_spill] sm:$0xff] }
 0x8bd   : > { %v4187_v8 = vpop.f32.mrf.mxu2  ;;  %v8463_v18 = vmul.f32 %v8459_v36, %v3079_v42  ;;  %v5342_v44 = vpop.eup %5341 }
 0x8be   : > { %v4188_v10 = vadd.f32 %v4187_v8, %v8901_v28  ;;  %v4076_v59 = vmul.f32 %v5342_v44, %v4012_v58  ;;  %v5344_v45 = vpop.eup %5343 }
 0x8bf   : > { %v3967_v54 = vpop.f32.mrf.mxu0  ;;  %v5346_v40 = vpop.eup %5345  ;;  %v3685_v23 = vmul.f32 %v5344_v45, %v3075_v22  ;;  %v3813_v42 = vmul.f32 %v5344_v45, %v3276_v24  ;;  %v2857_v22 = vmul.f32 1.442695, %v2794_v16 }
 0x8c0   : > { %v4297_v32 = vadd.f32 %v4296_v43, %v4188_v10  ;;  %v4013_v62 = vadd.f32 %v3967_v54, %v8366_v4  ;;  %v3686_v56 = vmul.f32 %v5346_v40, %v3076_v47  ;;  %v5348_v9 = vpop.eup %5347  ;;  %v3814_v39 = vmul.f32 %v5346_v40, %v3277_v55  ;;  %v3748_v10 = vpop.xlane.xlu1 %3747 }
 0x8c1   : > { %v3781_v51 = vadd.f32 %v8426_v26, %v3685_v23  ;;  %v2984_v43 = vmul.f32 0.0, %v5348_v9  ;;  %v5350_v19 = vpop.eup %5349 }
 0x8c2   : > { %v4077_v50 = vmul.f32 %v5340_v63, %v4013_v62  ;;  %v3782_v57 = vadd.f32 %v3744_v33, %v3686_v56  ;;  %v5352_v35 = vpop.eup %5351  ;;  %v8906_v62 = vld [vmem:[#allocation13_spill] sm:$0xff] }
 0x8c3   : > { %v3746_v29 = vpop.xlane.xlu0 %3745  ;;  %5353 = vrcp.f32 %v3781_v51  ;;  %v2985_v12 = vmul.f32 0.0, %v5352_v35 }
 0x8c4   : > { %v4097_v4 = vpack.c.bf16 %v4077_v50, %v4076_v59  ;;  %5355 = vrcp.f32 %v3782_v57  ;;  %v3783_v37 = vadd.f32 %v3746_v29, %v8444_v46  ;;  %v3784_v50 = vadd.f32 %v3748_v10, %v8442_v20 }
 0x8c5   : > { %v4190_v53 = vpop.f32.mrf.mxu2  ;;  %5357 = vpow2.f32 %v3561_v41 }
 0x8c6   : > { %v4191_v0 = vadd.f32 %v4190_v53, %v8903_v7  ;;  %4761 = vmatmul.msk.bf16.gmra.mxu2 %vm1937_vm5, %v4097_v4  ;;  %5359 = vrcp.f32 %v3783_v37 }
 0x8c7   : > { %v3970_v38 = vpop.f32.mrf.mxu0  ;;  %5361 = vpow2.f32 %v2857_v22 }
 0x8c8   : > { %v4298_v25 = vadd.f32 %v4297_v32, %v4191_v0  ;;  %v4014_v8 = vadd.f32 %v3970_v38, %v3813_v42  ;;  %5363 = vrcp.f32 %v3784_v50 }
 0x8c9   : > { %v5354_v28 = vpop.eup %5353 }
 0x8ca   : > { %v5356_v2 = vpop.eup %5355  ;;  %v4078_v31 = vmul.f32 %v5354_v28, %v4014_v8  ;;  %v8910_v28 = vld [vmem:[#allocation16_spill] sm:$0xff] }
 0x8cb   : > { %v5358_v47 = vpop.eup %5357 }
 0x8cc   : > { %v3046_v61 = vpop.xlane.xlu0 %3045  ;;  %v5360_v0 = vpop.eup %5359 }
 0x8cd   : > { %v4192_v5 = vpop.f32.mrf.mxu2  ;;  %v3080_v17 = vadd.f32 %v3046_v61, %v2984_v43  ;;  %v8909_v61 = vld [vmem:[#allocation17_spill] sm:$0xff] }
 0x8ce   : > { %v4193_v26 = vadd.f32 %v4192_v5, %v8905_v11 }
 0x8cf   : > { %v8480_v33 = vmul.f32 %v5350_v19, %v3080_v17  ;;  %v3972_v13 = vpop.f32.mrf.mxu0  ;;  %v3752_v17 = vpop.xlane.xlu2 %3751 }
 0x8d0   : > { %v4299_v6 = vadd.f32 %v4298_v25, %v4193_v26  ;;  %v4015_v48 = vadd.f32 %v3972_v13, %v3814_v39  ;;  %v5362_v25 = vpop.eup %5361 }
 0x8d1   : > { %v5364_v38 = vpop.eup %5363 }
 0x8d2   : > { %v4079_v58 = vmul.f32 %v5356_v2, %v4015_v48 }
 0x8d4   : > { %v3048_v54 = vpop.xlane.xlu0 %3047  ;;  %v4098_v46 = vpack.c.bf16 %v4079_v58, %v4078_v31 }
 0x8d5   : > { %v3242_v32 = vpop.f32.mrf.mxu1  ;;  %v4195_v34 = vpop.f32.mrf.mxu2  ;;  %v3081_v44 = vadd.f32 %v3048_v54, %v2985_v12 }
 0x8d6   : > { %v3280_v63 = vadd.f32 %v3242_v32, %v8454_v14  ;;  %v4196_v15 = vadd.f32 %v4195_v34, %v8906_v62  ;;  %4762 = vmatmul.msk.bf16.gmra.mxu2 %vm1937_vm5, %v4098_v46  ;;  %v8907_v14 = vsub.f32 %v8285_v30, %v8330_v1  ;;  %v2986_v30 = vmul.f32 0.0, %v5362_v25 }
 0x8d7   : > { %v3691_v59 = vmul.f32 %v5358_v47, %v3081_v44  ;;  %v3975_v53 = vpop.f32.mrf.mxu0 }
 0x8d8   : > { %v3817_v27 = vmul.f32 %v8459_v36, %v3280_v63  ;;  %v4300_v60 = vadd.f32 %v4299_v6, %v4196_v15  ;;  %v3563_v29 = vmul.f32 1.442695, %v8907_v14  ;;  %v4016_v45 = vadd.f32 %v3975_v53, %v8418_v52 }
 0x8da   : > { %v4080_v23 = vmul.f32 %v5360_v0, %v4016_v45  ;;  %5365 = vpow2.f32 %v3563_v29 }
 0x8db   : > { %v3750_v7 = vpop.xlane.xlu1 %3749 }
 0x8dc   : > { %v3785_v51 = vadd.f32 %v3750_v7, %v8463_v18 }
 0x8dd   : > { %v3244_v40 = vpop.f32.mrf.mxu1  ;;  %v4197_v4 = vpop.f32.mrf.mxu2 }
 0x8de   : > { %v3281_v36 = vadd.f32 %v3244_v40, %v2984_v43  ;;  %v4198_v56 = vadd.f32 %v4197_v4, %v8908_v21  ;;  %5367 = vrcp.f32 %v3785_v51  ;;  %v3754_v48 = vpop.xlane.xlu2 %3753 }
 0x8df   : > { %v3977_v57 = vpop.f32.mrf.mxu0  ;;  %v3787_v32 = vadd.f32 %v3754_v48, %v3691_v59  ;;  %v8912_v59 = vld [vmem:[#allocation19_spill] sm:$0xff] }
 0x8e0   : > { %v3818_v9 = vmul.f32 %v5350_v19, %v3281_v36  ;;  %v4301_v20 = vadd.f32 %v4300_v60, %v4198_v56  ;;  %v4017_v1 = vadd.f32 %v3977_v57, %v8432_v3  ;;  %v5366_v41 = vpop.eup %5365  ;;  %v3786_v3 = vadd.f32 %v3752_v17, %v8480_v33  ;;  %v8911_v33 = vld [vmem:[#allocation18_spill] sm:$0xff]  ;;  %v8913_v36 = vld [vmem:[#allocation20_spill] sm:$0xff] }
 0x8e2   : > { %v4081_v55 = vmul.f32 %v5364_v38, %v4017_v1  ;;  %5369 = vrcp.f32 %v3786_v3 }
 0x8e3   : > { %v3050_v52 = vpop.xlane.xlu1 %3049  ;;  %5371 = vrcp.f32 %v3787_v32 }
 0x8e4   : > { %v3082_v24 = vadd.f32 %v3050_v52, %v2986_v30  ;;  %v4099_v19 = vpack.c.bf16 %v4081_v55, %v4080_v23  ;;  %v5368_v8 = vpop.eup %5367 }
 0x8e5   : > { %v3247_v49 = vpop.f32.mrf.mxu1  ;;  %v4200_v43 = vpop.f32.mrf.mxu2 }
 0x8e6   : > { %v3282_v5 = vadd.f32 %v3247_v49, %v2985_v12  ;;  %v4201_v11 = vadd.f32 %v4200_v43, %v8909_v61  ;;  %v3692_v26 = vmul.f32 %v5366_v41, %v3082_v24  ;;  %4763 = vmatmul.msk.bf16.gmra.mxu2 %vm1937_vm5, %v4099_v19  ;;  %v8916_v24 = vld [vmem:[#allocation22_spill] sm:$0xff]  ;;  %v8917_v43 = vld [vmem:[#allocation24_spill] sm:$0xff] }
 0x8e7   : > { %v3980_v6 = vpop.f32.mrf.mxu0 }
 0x8e8   : > { %v3819_v42 = vmul.f32 %v5358_v47, %v3282_v5  ;;  %v4302_v18 = vadd.f32 %v4301_v20, %v4201_v11  ;;  %v4018_v35 = vadd.f32 %v3980_v6, %v3817_v27  ;;  %v5370_v34 = vpop.eup %5369 }
 0x8e9   : > { %v5372_v60 = vpop.eup %5371 }
 0x8ea   : > { %v4082_v16 = vmul.f32 %v5368_v8, %v4018_v35 }
 0x8eb   : > { %v3756_v62 = vpop.xlane.xlu0 %3755 }
 0x8ec   : > { %v3788_v47 = vadd.f32 %v3756_v62, %v3692_v26  ;;  %v8918_v26 = vld [vmem:[#allocation25_spill] sm:$0xff]  ;;  %v8923_v62 = vld [vmem:[#allocation30_spill] sm:$0xff] }
 0x8ed   : > { %v3249_v39 = vpop.f32.mrf.mxu1  ;;  %v4202_v37 = vpop.f32.mrf.mxu2 }
 0x8ee   : > { %v3283_v13 = vadd.f32 %v3249_v39, %v2986_v30  ;;  %v4203_v10 = vadd.f32 %v4202_v37, %v8910_v28  ;;  %5373 = vrcp.f32 %v3788_v47  ;;  %v8915_v30 = vld [vmem:[#allocation23_spill] sm:$0xff]  ;;  %v4842_v39 = vld [vmem:[%s8580_s14 + $0x38] sm:$0xff] }
 0x8ef   : > { %v3982_v31 = vpop.f32.mrf.mxu0  ;;  %4405 = vmatpush.bf16.msrb.mxu1 %v4842_v39  ;;  %v4331_v39 = vld [vmem:[%s8578_s12] sm:$0x1] }
 0x8f0   : > { %v3820_v2 = vmul.f32 %v5366_v41, %v3283_v13  ;;  %v4303_v12 = vadd.f32 %v4302_v18, %v4203_v10  ;;  %v4019_v58 = vadd.f32 %v3982_v31, %v3818_v9  ;;  %v8914_v9 = vld [vmem:[#allocation21_spill] sm:$0xff]  ;;  %v8919_v18 = vld [vmem:[#allocation26_spill] sm:$0xff] }
 0x8f1   : > { %v4841_v10 = vld [vmem:[%s8580_s14 + $0x30] sm:$0xff] }
 0x8f2   : > { %v4083_v54 = vmul.f32 %v5370_v34, %v4019_v58  ;;  %v8921_v31 = vld [vmem:[#allocation29_spill] sm:$0xff] }
 0x8f3   : > { %4406 = vmatpush.bf16.msrb.mxu1 %v4841_v10 }
 0x8f4   : > { %v4100_v15 = vpack.c.bf16 %v4083_v54, %v4082_v16  ;;  %v5374_v0 = vpop.eup %5373  ;;  %v8922_v54 = vld [vmem:[#allocation28_spill] sm:$0xff] }
 0x8f5   : > { %v4205_v63 = vpop.f32.mrf.mxu2 }
 0x8f6   : > { %v4206_v22 = vadd.f32 %v4205_v63, %v8911_v33  ;;  %4764 = vmatmul.msk.bf16.gmra.mxu2 %vm1937_vm5, %v4100_v15 }
 0x8f7   : > { %v3985_v46 = vpop.f32.mrf.mxu0 }
 0x8f8   : > { %v4304_v44 = vadd.f32 %v4303_v12, %v4206_v22  ;;  %v4020_v27 = vadd.f32 %v3985_v46, %v3819_v42  ;;  %v8920_v12 = vld [vmem:[#allocation27_spill] sm:$0xff] }
 0x8fa   : > { %v4084_v50 = vmul.f32 %v5372_v60, %v4020_v27  ;;  %v8925_v27 = vld [vmem:[#allocation31_spill] sm:$0xff] }
 0x8fd   : > { %v4207_v53 = vpop.f32.mrf.mxu2 }
 0x8fe   : > { %v4208_v14 = vadd.f32 %v4207_v53, %v8912_v59  ;;  %v8926_v53 = vld [vmem:[#allocation32_spill] sm:$0xff] }
 0x8ff   : > { %v3987_v45 = vpop.f32.mrf.mxu0 }
 0x900   : > { %v4305_v29 = vadd.f32 %v4304_v44, %v4208_v14  ;;  %v4021_v7 = vadd.f32 %v3987_v45, %v3820_v2  ;;  %v8924_v44 = vld [vmem:[#allocation15_spill] sm:$0xff]  ;;  %v4840_v14 = vld [vmem:[%s8580_s14 + $0x28] sm:$0xff] }
 0x901   : > { %v4286_v47 = vrot.slane %v8924_v44, 4  ;;  %4407 = vmatpush.bf16.msrb.mxu1 %v4840_v14 }
 0x902   : > { %v4085_v40 = vmul.f32 %v5374_v0, %v4021_v7  ;;  %v8927_v7 = vld [vmem:[#allocation33_spill] sm:$0xff] }
 0x904   : > { %v4101_v23 = vpack.c.bf16 %v4085_v40, %v4084_v50  ;;  %v4839_v40 = vld [vmem:[%s8580_s14 + $0x20] sm:$0xff] }
 0x905   : > { %4408 = vmatpush.bf16.msrb.mxu1 %v4839_v40 }
 0x906   : > { %4765 = vmatmul.msk.bf16.gmra.mxu2 %vm1937_vm5, %v4101_v23  ;;  %vm4338_vm5 = vcmask 1040384  }
 0x908   : > { %v4210_v4 = vpop.f32.mrf.mxu2 }
 0x909   : > { %v4211_v21 = vadd.f32 %v4210_v4, %v8913_v36  ;;  %v8928_v36 = vld [vmem:[#allocation35_spill] sm:$0xff] }
 0x90b   : > { %v4306_v56 = vadd.f32 %v4305_v29, %v4211_v21  ;;  %v4287_v29 = vadd.f32 %v4286_v47, %v8924_v44 }
 0x910   : > { %v4212_v25 = vpop.f32.mrf.mxu2 }
 0x911   : > { %v4213_v20 = vadd.f32 %v4212_v25, %v8914_v9  ;;  %v8929_v9 = vld [vmem:[#allocation34_spill] sm:$0xff] }
 0x913   : > { %v4307_v51 = vadd.f32 %v4306_v56, %v4213_v20  ;;  %v4288_v56 = vrot.slane %v4287_v29, 2 }
 0x919   : > { %v4215_v57 = vpop.f32.mrf.mxu2 }
 0x91a   : > { %v4216_v1 = vadd.f32 %v4215_v57, %v8915_v30  ;;  %v8930_v30 = vld [vmem:[#allocation36_spill] sm:$0xff] }
 0x91c   : > { %v4308_v52 = vadd.f32 %v4307_v51, %v4216_v1  ;;  %v4838_v51 = vld [vmem:[%s8580_s14 + $0x18] sm:$0xff] }
 0x91d   : > { %4409 = vmatpush.bf16.msrb.mxu1 %v4838_v51 }
 0x921   : > { %v4217_v38 = vpop.f32.mrf.mxu2 }
 0x922   : > { %v4218_v49 = vadd.f32 %v4217_v38, %v8916_v24  ;;  %v4837_v24 = vld [vmem:[%s8580_s14 + $0x10] sm:$0xff] }
 0x923   : > { %4410 = vmatpush.bf16.msrb.mxu1 %v4837_v24 }
 0x924   : > { %v4309_v41 = vadd.f32 %v4308_v52, %v4218_v49  ;;  %v4289_v52 = vadd.f32 %v4288_v56, %v4287_v29 }
 0x929   : > { %v4220_v55 = vpop.f32.mrf.mxu2 }
 0x92a   : > { %v4221_v5 = vadd.f32 %v4220_v55, %v8917_v43  ;;  %v8931_v55 = vld [vmem:[#allocation37_spill] sm:$0xff] }
 0x92c   : > { %v4310_v61 = vadd.f32 %v4309_v41, %v4221_v5  ;;  %v4290_v5 = vrot.slane %v4289_v52, 1 }
 0x931   : > { %v4222_v11 = vpop.f32.mrf.mxu2 }
 0x932   : > { %v4223_v17 = vadd.f32 %v4222_v11, %v8918_v26  ;;  %v4836_v11 = vld [vmem:[%s8580_s14 + $0x8] sm:$0xff] }
 0x933   : > { %4411 = vmatpush.bf16.msrb.mxu1 %v4836_v11 }
 0x934   : > { %v4311_v19 = vadd.f32 %v4310_v61, %v4223_v17  ;;  %v4291_v17 = vadd.f32 %v4290_v5, %v4289_v52 }
 0x936   : > { %5375 = vrcp.f32 %v4291_v17 }
 0x939   : > { %v4225_v42 = vpop.f32.mrf.mxu2 }
 0x93a   : > { %v4226_v3 = vadd.f32 %v4225_v42, %v8919_v18  ;;  %v4835_v42 = vld [vmem:[%s8580_s14] sm:$0xff] }
 0x93b   : > { %4412 = vmatpush.bf16.msrb.mxu1 %v4835_v42 }
 0x93c   : > { %v4312_v6 = vadd.f32 %v4311_v19, %v4226_v3 }
 0x941   : > { %v4227_v35 = vpop.f32.mrf.mxu2 }
 0x942   : > { %v4228_v32 = vadd.f32 %v4227_v35, %v8920_v12 }
 0x944   : > { %v4313_v34 = vadd.f32 %v4312_v6, %v4228_v32 }
 0x949   : > { %v4230_v8 = vpop.f32.mrf.mxu2 }
 0x94a   : > { %v4231_v58 = vadd.f32 %v4230_v8, %v8921_v31  ;;  %v5376_v8 = vpop.eup %5375 }
 0x94c   : > { %v4314_v22 = vadd.f32 %v4313_v34, %v4231_v58 }
 0x951   : > { %v4232_v16 = vpop.f32.mrf.mxu2 }
 0x952   : > { %v4233_v63 = vadd.f32 %v4232_v16, %v8922_v54 }
 0x954   : > { %v4315_v46 = vadd.f32 %v4314_v22, %v4233_v63 }
 0x959   : > { %v4235_v37 = vpop.f32.mrf.mxu2 }
 0x95a   : > { %v4236_v15 = vadd.f32 %v4235_v37, %v8923_v62  ;;  %v4333_v37 = vld [vmem:[%s8579_s13] sm:$0x1] }
 0x95c   : > { %v4316_v50 = vadd.f32 %v4315_v46, %v4236_v15 }
 0x961   : > { %v4237_v13 = vpop.f32.mrf.mxu2 }
 0x962   : > { %v4238_v60 = vadd.f32 %v4237_v13, %v8925_v27 }
 0x964   : > { %v4317_v45 = vadd.f32 %v4316_v50, %v4238_v60 }
 0x969   : > { %v4240_v28 = vpop.f32.mrf.mxu2 }
 0x96a   : > { %v4241_v59 = vadd.f32 %v4240_v28, %v8926_v53 }
 0x96c   : > { %v4318_v4 = vadd.f32 %v4317_v45, %v4241_v59 }
 0x971   : > { %v4242_v48 = vpop.f32.mrf.mxu2 }
 0x972   : > { %v4243_v0 = vadd.f32 %v4242_v48, %v8927_v7 }
 0x974   : > { %v4319_v25 = vadd.f32 %v4318_v4, %v4243_v0 }
 0x979   : > { %v4245_v2 = vpop.f32.mrf.mxu2 }
 0x97a   : > { %v4246_v21 = vadd.f32 %v4245_v2, %v8928_v36  ;;  %v8933_v2 = vld [vmem:[#allocation3_spill] sm:$0xff] }
 0x97c   : > { %v4320_v57 = vadd.f32 %v4319_v25, %v4246_v21 }
 0x981   : > { %v4247_v33 = vpop.f32.mrf.mxu2 }
 0x982   : > { %v4248_v20 = vadd.f32 %v4247_v33, %v8929_v9 }
 0x984   : > { %v4321_v38 = vadd.f32 %v4320_v57, %v4248_v20 }
 0x989   : > { %v4250_v23 = vpop.f32.mrf.mxu2 }
 0x98a   : > { %v4251_v1 = vadd.f32 %v4250_v23, %v8930_v30 }
 0x98c   : > { %v4322_v41 = vadd.f32 %v4321_v38, %v4251_v1 }
 0x991   : > { %v4252_v49 = vpop.f32.mrf.mxu2 }
 0x992   : > { %v4253_v43 = vadd.f32 %v4252_v49, %v8931_v55 }
 0x994   : > { %v4323_v61 = vadd.f32 %v4322_v41, %v4253_v43 }
 0x996   : > { %v4324_v26 = vrot.slane %v4323_v61, 4 }
 0x998   : > { %v4325_v19 = vadd.f32 %v4324_v26, %v4323_v61 }
 0x99a   : > { %v4326_v18 = vrot.slane %v4325_v19, 2 }
 0x99c   : > { %v4327_v3 = vadd.f32 %v4326_v18, %v4325_v19 }
 0x99e   : > { %v4328_v6 = vrot.slane %v4327_v3, 1 }
 0x9a0   : > { %v4329_v35 = vadd.f32 %v4328_v6, %v4327_v3 }
 0x9a2   : > { %v4330_v16 = vmul.f32 %v5376_v8, %v4329_v35 }
 0x9a4   : > { %v4332_v13 = vmul.f32 %v4331_v39, %v4330_v16 }
 0x9a6   : > { %v4334_v28 = vadd.f32 %v4333_v37, %v4332_v13 }
 0x9a8   : > { %v4336_v10 = vrot.slane %v4334_v28, 7  ;;  %4424 = vst.msk [vmem:[%s5794_s18 + $0x1] sm:$0x1] %vm5796_vm4, %v4334_v28 }
 0x9aa   : > { %v4339_v12 = vsel %vm4338_vm5, %v8933_v2, %v4336_v10 }
 0x9ab   : > { %v4340_v32 = vpack.c.bf16 %v4339_v12, %v4339_v12 }
 0x9ad   : > { %4413 = vmatmul.bf16.vlgmr.msrb.gmra.mxu1 %v4340_v32 }
 0xa2a   : > { %v4414_v31 = vpop.f32.mrf.mxu1 }
 0xa2b   : > { %4418 = vst [vmem:[%s527_s21] sm:$0x3] %v4414_v31 }
 0xa32   : > { %v4416_v58 = vpop.f32.mrf.mxu1 }
 0xa33 PF: > { %s28_s24 = sadd.s32 1, %s5383_s24  }
 0xa34   : > { %p25_p4 = scmp.ge.s32.totalorder %s28_s24, 4  }
 0xa36   :  { %27 = sbr.rel (!%p25_p4) target bundleno = 9 (0x9), region = 122 }

</bundles_post_ra>
